<compile_context>
chip_gen: v6e
topology: v6e:2x2x1
jax: 0.10.0
libtpu: 0.0.40
codegen_flags: <defaults>
</compile_context>

<pallas_src>
import numpy as np
import jax
import jax.numpy as jnp
from jax.experimental import pallas as pl
from jax.experimental.pallas import tpu as pltpu

_H, _W = 14, 14                                  # attention-map size
_PH, _PW = 16, 16                                # per-map padded size (zero border)
_MAPS_SUB, _MAPS_LANE = 4, 8                     # maps stacked along sublanes / lanes
_MAPS_PER_BLOCK = _MAPS_SUB * _MAPS_LANE         # 32 maps per (64,128) sub-block
_BH, _BW = _MAPS_SUB * _PH, _MAPS_LANE * _PW     # (64, 128) lane/sublane-dense block
_BIG = _PH * _PW + 2                             # sentinel label > any real label (<=239)
_NUM_ITERS = _H * _W                             # hard upper bound on propagation
_CHECK_EVERY = 14                                # propagation steps per convergence check
_K_MAX = 8                                       # packed sub-blocks per grid step


def _cc_kernel(x_ref, lbl_ref):
    """Label 8-connected components of K packed (64,128) sub-blocks (32 maps each).

    x_ref:   (K, 64, 128) int8 0/1 masks.
    lbl_ref: (K, 64, 128) int16 labels; 0 = background, labels in raster-first-pixel order.
    """
    nsub = x_ref.shape[0]                                 # static
    row = jax.lax.broadcasted_iota(jnp.int32, (_BH, _BW), 0)
    col = jax.lax.broadcasted_iota(jnp.int32, (_BH, _BW), 1)
    # Per-map local raster index: unique within each map and ascending in raster
    # order (reproduces cv2.connectedComponents' ordering).  Hoisted: shared by
    # all K sub-blocks of this grid step.
    base = (row % _PH) * _PW + (col % _PW) + 1

    def run_block(k, carry):
        mask = x_ref[k].astype(jnp.int32) > 0             # (64, 128) bool
        init = jnp.where(mask, base, _BIG)                 # int32 propagation labels

        def prop_step(lbl):
            # Separable closed 3x3 min (8-connectivity): 4 rolls + 4 mins.
            # Circular rolls are safe: every packed map keeps its zero border, so both
            # the wrap-around and the neighboring map only ever contribute sentinels.
            mh = jnp.minimum(lbl, pltpu.roll(lbl, shift=1, axis=1))
            mh = jnp.minimum(mh, pltpu.roll(lbl, shift=_BW - 1, axis=1))
            mv = jnp.minimum(mh, pltpu.roll(mh, shift=1, axis=0))
            mv = jnp.minimum(mv, pltpu.roll(mh, shift=_BH - 1, axis=0))
            # Background keeps the sentinel so labels never bridge through it.
            return jnp.where(mask, mv, _BIG)

        def cond(c):
            it, _, changed = c
            return jnp.logical_and(it < _NUM_ITERS, changed)

        def body(c):
            it, lbl, _ = c
            new = lbl
            for _ in range(_CHECK_EVERY):                  # unrolled at trace time
                new = prop_step(new)
            # Labels are monotonically non-increasing and bounded by _BIG per element
            # (64*128 elements), so this int32 sum cannot overflow and is 0 iff this
            # 32-map group has converged.
            changed = jnp.sum(lbl - new) > 0
            return it + _CHECK_EVERY, new, changed

        _, lbl, _ = jax.lax.while_loop(
            cond, body, (jnp.int32(0), init, jnp.bool_(True)))
        lbl_ref[k] = jnp.where(mask, lbl, 0).astype(jnp.int16)   # background -> 0
        return carry

    # Loop over sub-blocks; keeps the while-loop working set at 32-map (64,128)
    # granularity so the carried arrays never grow and spill.
    jax.lax.fori_loop(0, nsub, run_block, 0)


def _label_components(x):
    """x: (bs, nh, 196) -> int16 labels (bs, nh, 196); 0 = background."""
    bs, nh, length = x.shape
    assert length == _H * _W
    n = bs * nh
    n_blocks = pl.cdiv(n, _MAPS_PER_BLOCK)
    # Batch several 32-map sub-blocks per grid step to amortize the fixed per-step
    # cost, but keep the grid >= 2 steps when possible so both v7x TCs get work.
    k_sub = max(1, min(_K_MAX, pl.cdiv(n_blocks, 2)))
    n_grid = pl.cdiv(n_blocks, k_sub)
    n_blocks_pad = n_grid * k_sub
    n_pad = n_blocks_pad * _MAPS_PER_BLOCK

    # Mask precomputed as int8: 4x fewer bytes than f32 through pad/pack and DMA.
    m = (x > 0).astype(jnp.int8).reshape(n, _H, _W)
    # One pad pass: zero border around every map + zero maps up to a grid multiple.
    mp = jnp.pad(m, ((0, n_pad - n), (1, _PH - _H - 1), (1, _PW - _W - 1)))
    # Pack 4 x 8 = 32 maps into each lane/sublane-dense (64, 128) sub-block.
    mp = mp.reshape(n_blocks_pad, _MAPS_SUB, _MAPS_LANE, _PH, _PW)
    mp = mp.transpose(0, 1, 3, 2, 4).reshape(n_blocks_pad, _BH, _BW)

    labels = pl.pallas_call(
        _cc_kernel,
        out_shape=jax.ShapeDtypeStruct((n_blocks_pad, _BH, _BW), jnp.int16),
        grid=(n_grid,),
        in_specs=[pl.BlockSpec((k_sub, _BH, _BW), lambda i: (i, 0, 0))],
        out_specs=pl.BlockSpec((k_sub, _BH, _BW), lambda i: (i, 0, 0)),
        compiler_params=pltpu.CompilerParams(dimension_semantics=("parallel",)),
    )(mp)

    # Unpack back to per-map layout (int16 = half the bytes of the old int32 path)
    # and strip borders / padded maps.
    lab = labels.reshape(n_blocks_pad, _MAPS_SUB, _PH, _MAPS_LANE, _PW)
    lab = lab.transpose(0, 1, 3, 2, 4).reshape(n_pad, _PH, _PW)
    return lab[:n, 1:1 + _H, 1:1 + _W].reshape(bs, nh, _H * _W)


_label_components_jit = jax.jit(_label_components)

_MAP_OFFSET = 512   # > max in-map label (239): makes labels globally unique on host


def ccomponents_forward(x):
    """Pallas/JAX equivalent of CComponents.forward.

    Returns (batch_idxs, head_idx, spatial_idx).  spatial_idx rows are the flattened
    196-element 0/1 masks of each connected component (int32 here; the torch version
    returns int64 since jax x64 is disabled by default).
    """
    bs, nh, _ = x.shape
    labels = np.asarray(jax.block_until_ready(_label_components_jit(x)))

    # TODO(synk): the number of components is data-dependent, so the per-component
    # gather/stack has a dynamic shape and is done on the host (vectorized numpy),
    # exactly like the original module drops to CPU/numpy.
    flat = labels.reshape(bs * nh, _H * _W).astype(np.int64)
    glab = np.where(
        flat > 0,
        flat + np.arange(bs * nh, dtype=np.int64)[:, None] * _MAP_OFFSET,
        0)
    uniq = np.unique(glab[glab > 0])     # ascending == (b, h, raster-first-pixel) order
    if uniq.size == 0:
        return (jnp.zeros((0,), jnp.int32), jnp.zeros((0,), jnp.int32),
                jnp.zeros((0, _H * _W), jnp.int32))
    map_of = uniq // _MAP_OFFSET
    batch_idx = (map_of // nh).astype(np.int32)
    head_idx = (map_of % nh).astype(np.int32)
    spatial = (glab[map_of] == uniq[:, None]).astype(np.int32)
    return jnp.asarray(batch_idx), jnp.asarray(head_idx), jnp.asarray(spatial)


def _reference_components(mask2d):
    """Pure-python 8-connectivity flood fill; components in raster-scan order."""
    H, W = mask2d.shape
    seen = np.zeros_like(mask2d, dtype=bool)
    comps = []
    for r in range(H):
        for c in range(W):
            if mask2d[r, c] and not seen[r, c]:
                stack = [(r, c)]
                seen[r, c] = True
                comp = set()
                while stack:
                    rr, cc = stack.pop()
                    comp.add(rr * W + cc)
                    for dr in (-1, 0, 1):
                        for dc in (-1, 0, 1):
                            nr, nc = rr + dr, cc + dc
                            if (0 <= nr < H and 0 <= nc < W and
                                    mask2d[nr, nc] and not seen[nr, nc]):
                                seen[nr, nc] = True
                                stack.append((nr, nc))
                comps.append(frozenset(comp))
    return comps


def _check_case(x):
    bs, nh, _ = x.shape
    batch_idxs, head_idx, spatial_idx = ccomponents_forward(x)
    jax.block_until_ready((batch_idxs, head_idx, spatial_idx))
    assert spatial_idx.shape[1] == _H * _W

    x_np = np.asarray(x)
    got = {}
    for b, h, m in zip(np.asarray(batch_idxs), np.asarray(head_idx),
                       np.asarray(spatial_idx)):
        got.setdefault((int(b), int(h)), []).append(
            frozenset(np.nonzero(m)[0].tolist()))
    for b in range(bs):
        for h in range(nh):
            ref = _reference_components(x_np[b, h].reshape(_H, _W) > 0)
            assert got.get((b, h), []) == ref, ("component mismatch", b, h)


if __name__ == "__main__":
    key = jax.random.PRNGKey(0)
    k1, k2 = jax.random.split(key)

    # Small case: 8 maps -> 1 packed sub-block, grid of 1.
    x_small = jax.random.normal(k1, (2, 4, _H * _W), dtype=jnp.float32)
    _check_case(x_small)

    # Larger case: 72 maps -> 3 sub-blocks, K=2 per step, grid of 2, with padding
    # (exercises the multi-sub-block fori_loop, padded maps, and both-TC grid).
    x_big = jax.random.normal(k2, (3, 24, _H * _W), dtype=jnp.float32)
    _check_case(x_big)

    print("KERNEL_OK")
</pallas_src>

<mosaic_0001>
module attributes {stable_mosaic.version = 11 : i64} {
  func.func @_cc_kernel(%arg0: i32, %arg1: memref<1x64x128xi8, #tpu.memory_space<vmem>>, %arg2: memref<1x64x128xi16, #tpu.memory_space<vmem>>) attributes {dimension_semantics = [#tpu.dimension_semantics<parallel>], iteration_bounds = array<i64: 1>, scalar_prefetch = 0 : i64, scratch_operands = 0 : i64, tpu.core_type = #tpu.core_type<tc>, window_params = [{transform_indices = @transform_0, window_bounds = array<i64: 1, 64, 128>}, {transform_indices = @transform_1, window_bounds = array<i64: 1, 64, 128>}]} {
    %0 = tpu.iota {dimensions = array<i32: 0>} : vector<64x128xi32>
    %1 = tpu.iota {dimensions = array<i32: 1>} : vector<64x128xi32>
    %c16_i32 = arith.constant 16 : i32
    %c0_i32 = arith.constant 0 : i32
    %2 = arith.cmpi eq, %c16_i32, %c0_i32 : i32
    %c1_i32 = arith.constant 1 : i32
    %3 = arith.select %2, %c1_i32, %c16_i32 : i32
    %4 = vector.broadcast %3 : i32 to vector<64x128xi32>
    %5 = arith.remsi %0, %4 : vector<64x128xi32>
    %c0_i32_0 = arith.constant 0 : i32
    %6 = vector.broadcast %c0_i32_0 : i32 to vector<64x128xi32>
    %7 = arith.cmpi ne, %5, %6 : vector<64x128xi32>
    %c0_i32_1 = arith.constant 0 : i32
    %8 = vector.broadcast %c0_i32_1 : i32 to vector<64x128xi32>
    %9 = arith.cmpi slt, %5, %8 : vector<64x128xi32>
    %c0_i32_2 = arith.constant 0 : i32
    %10 = arith.cmpi slt, %3, %c0_i32_2 : i32
    %11 = vector.broadcast %10 : i1 to vector<64x128xi1>
    %12 = vector.broadcast %11 : vector<64x128xi1> to vector<64x128xi1>
    %13 = arith.xori %9, %12 : vector<64x128xi1>
    %14 = arith.andi %13, %7 : vector<64x128xi1>
    %15 = vector.broadcast %3 : i32 to vector<64x128xi32>
    %16 = arith.addi %5, %15 : vector<64x128xi32>
    %17 = arith.select %14, %16, %5 : vector<64x128xi1>, vector<64x128xi32>
    %c16_i32_3 = arith.constant 16 : i32
    %18 = vector.broadcast %c16_i32_3 : i32 to vector<64x128xi32>
    %19 = arith.muli %17, %18 : vector<64x128xi32>
    %c16_i32_4 = arith.constant 16 : i32
    %c0_i32_5 = arith.constant 0 : i32
    %20 = arith.cmpi eq, %c16_i32_4, %c0_i32_5 : i32
    %c1_i32_6 = arith.constant 1 : i32
    %21 = arith.select %20, %c1_i32_6, %c16_i32_4 : i32
    %22 = vector.broadcast %21 : i32 to vector<64x128xi32>
    %23 = arith.remsi %1, %22 : vector<64x128xi32>
    %c0_i32_7 = arith.constant 0 : i32
    %24 = vector.broadcast %c0_i32_7 : i32 to vector<64x128xi32>
    %25 = arith.cmpi ne, %23, %24 : vector<64x128xi32>
    %c0_i32_8 = arith.constant 0 : i32
    %26 = vector.broadcast %c0_i32_8 : i32 to vector<64x128xi32>
    %27 = arith.cmpi slt, %23, %26 : vector<64x128xi32>
    %c0_i32_9 = arith.constant 0 : i32
    %28 = arith.cmpi slt, %21, %c0_i32_9 : i32
    %29 = vector.broadcast %28 : i1 to vector<64x128xi1>
    %30 = vector.broadcast %29 : vector<64x128xi1> to vector<64x128xi1>
    %31 = arith.xori %27, %30 : vector<64x128xi1>
    %32 = arith.andi %31, %25 : vector<64x128xi1>
    %33 = vector.broadcast %21 : i32 to vector<64x128xi32>
    %34 = arith.addi %23, %33 : vector<64x128xi32>
    %35 = arith.select %32, %34, %23 : vector<64x128xi1>, vector<64x128xi32>
    %36 = arith.addi %19, %35 : vector<64x128xi32>
    %c1_i32_10 = arith.constant 1 : i32
    %37 = vector.broadcast %c1_i32_10 : i32 to vector<64x128xi32>
    %38 = arith.addi %36, %37 : vector<64x128xi32>
    %c0_i32_11 = arith.constant 0 : i32
    %39 = arith.index_cast %c0_i32_11 : i32 to index
    %c0 = arith.constant 0 : index
    %c0_12 = arith.constant 0 : index
    %40 = vector.load %arg1[%39, %c0, %c0_12] : memref<1x64x128xi8, #tpu.memory_space<vmem>>, vector<1x64x128xi8>
    %41 = vector.shape_cast %40 : vector<1x64x128xi8> to vector<64x128xi8>
    %42 = arith.extsi %41 : vector<64x128xi8> to vector<64x128xi32>
    %c0_i32_13 = arith.constant 0 : i32
    %43 = vector.broadcast %c0_i32_13 : i32 to vector<64x128xi32>
    %44 = arith.cmpi sgt, %42, %43 : vector<64x128xi32>
    %c258_i32 = arith.constant 258 : i32
    %45 = vector.broadcast %c258_i32 : i32 to vector<64x128xi32>
    %46 = arith.select %44, %38, %45 : vector<64x128xi1>, vector<64x128xi32>
    %c0_i32_14 = arith.constant 0 : i32
    %true = arith.constant true
    %47:3 = scf.while (%arg3 = %c0_i32_14, %arg4 = %46, %arg5 = %true) : (i32, vector<64x128xi32>, i1) -> (i32, vector<64x128xi32>, i1) {
      %c196_i32 = arith.constant 196 : i32
      %55 = arith.cmpi slt, %arg3, %c196_i32 : i32
      %56 = arith.andi %55, %arg5 : i1
      scf.condition(%56) %arg3, %arg4, %arg5 : i32, vector<64x128xi32>, i1
    } do {
    ^bb0(%arg3: i32, %arg4: vector<64x128xi32>, %arg5: i1):
      %c1_i32_19 = arith.constant 1 : i32
      %55 = tpu.dynamic_rotate %arg4 by %c1_i32_19 dim 1 : vector<64x128xi32>, i32 -> vector<64x128xi32>
      %56 = arith.minsi %arg4, %55 : vector<64x128xi32>
      %c127_i32 = arith.constant 127 : i32
      %57 = tpu.dynamic_rotate %arg4 by %c127_i32 dim 1 : vector<64x128xi32>, i32 -> vector<64x128xi32>
      %58 = arith.minsi %56, %57 : vector<64x128xi32>
      %c1_i32_20 = arith.constant 1 : i32
      %59 = tpu.dynamic_rotate %58 by %c1_i32_20 dim 0 : vector<64x128xi32>, i32 -> vector<64x128xi32>
      %60 = arith.minsi %58, %59 : vector<64x128xi32>
      %c63_i32 = arith.constant 63 : i32
      %61 = tpu.dynamic_rotate %58 by %c63_i32 dim 0 : vector<64x128xi32>, i32 -> vector<64x128xi32>
      %62 = arith.minsi %60, %61 : vector<64x128xi32>
      %c258_i32_21 = arith.constant 258 : i32
      %63 = vector.broadcast %c258_i32_21 : i32 to vector<64x128xi32>
      %64 = arith.select %44, %62, %63 : vector<64x128xi1>, vector<64x128xi32>
      %c1_i32_22 = arith.constant 1 : i32
      %65 = tpu.dynamic_rotate %64 by %c1_i32_22 dim 1 : vector<64x128xi32>, i32 -> vector<64x128xi32>
      %66 = arith.minsi %64, %65 : vector<64x128xi32>
      %c127_i32_23 = arith.constant 127 : i32
      %67 = tpu.dynamic_rotate %64 by %c127_i32_23 dim 1 : vector<64x128xi32>, i32 -> vector<64x128xi32>
      %68 = arith.minsi %66, %67 : vector<64x128xi32>
      %c1_i32_24 = arith.constant 1 : i32
      %69 = tpu.dynamic_rotate %68 by %c1_i32_24 dim 0 : vector<64x128xi32>, i32 -> vector<64x128xi32>
      %70 = arith.minsi %68, %69 : vector<64x128xi32>
      %c63_i32_25 = arith.constant 63 : i32
      %71 = tpu.dynamic_rotate %68 by %c63_i32_25 dim 0 : vector<64x128xi32>, i32 -> vector<64x128xi32>
      %72 = arith.minsi %70, %71 : vector<64x128xi32>
      %c258_i32_26 = arith.constant 258 : i32
      %73 = vector.broadcast %c258_i32_26 : i32 to vector<64x128xi32>
      %74 = arith.select %44, %72, %73 : vector<64x128xi1>, vector<64x128xi32>
      %c1_i32_27 = arith.constant 1 : i32
      %75 = tpu.dynamic_rotate %74 by %c1_i32_27 dim 1 : vector<64x128xi32>, i32 -> vector<64x128xi32>
      %76 = arith.minsi %74, %75 : vector<64x128xi32>
      %c127_i32_28 = arith.constant 127 : i32
      %77 = tpu.dynamic_rotate %74 by %c127_i32_28 dim 1 : vector<64x128xi32>, i32 -> vector<64x128xi32>
      %78 = arith.minsi %76, %77 : vector<64x128xi32>
      %c1_i32_29 = arith.constant 1 : i32
      %79 = tpu.dynamic_rotate %78 by %c1_i32_29 dim 0 : vector<64x128xi32>, i32 -> vector<64x128xi32>
      %80 = arith.minsi %78, %79 : vector<64x128xi32>
      %c63_i32_30 = arith.constant 63 : i32
      %81 = tpu.dynamic_rotate %78 by %c63_i32_30 dim 0 : vector<64x128xi32>, i32 -> vector<64x128xi32>
      %82 = arith.minsi %80, %81 : vector<64x128xi32>
      %c258_i32_31 = arith.constant 258 : i32
      %83 = vector.broadcast %c258_i32_31 : i32 to vector<64x128xi32>
      %84 = arith.select %44, %82, %83 : vector<64x128xi1>, vector<64x128xi32>
      %c1_i32_32 = arith.constant 1 : i32
      %85 = tpu.dynamic_rotate %84 by %c1_i32_32 dim 1 : vector<64x128xi32>, i32 -> vector<64x128xi32>
      %86 = arith.minsi %84, %85 : vector<64x128xi32>
      %c127_i32_33 = arith.constant 127 : i32
      %87 = tpu.dynamic_rotate %84 by %c127_i32_33 dim 1 : vector<64x128xi32>, i32 -> vector<64x128xi32>
      %88 = arith.minsi %86, %87 : vector<64x128xi32>
      %c1_i32_34 = arith.constant 1 : i32
      %89 = tpu.dynamic_rotate %88 by %c1_i32_34 dim 0 : vector<64x128xi32>, i32 -> vector<64x128xi32>
      %90 = arith.minsi %88, %89 : vector<64x128xi32>
      %c63_i32_35 = arith.constant 63 : i32
      %91 = tpu.dynamic_rotate %88 by %c63_i32_35 dim 0 : vector<64x128xi32>, i32 -> vector<64x128xi32>
      %92 = arith.minsi %90, %91 : vector<64x128xi32>
      %c258_i32_36 = arith.constant 258 : i32
      %93 = vector.broadcast %c258_i32_36 : i32 to vector<64x128xi32>
      %94 = arith.select %44, %92, %93 : vector<64x128xi1>, vector<64x128xi32>
      %c1_i32_37 = arith.constant 1 : i32
      %95 = tpu.dynamic_rotate %94 by %c1_i32_37 dim 1 : vector<64x128xi32>, i32 -> vector<64x128xi32>
      %96 = arith.minsi %94, %95 : vector<64x128xi32>
      %c127_i32_38 = arith.constant 127 : i32
      %97 = tpu.dynamic_rotate %94 by %c127_i32_38 dim 1 : vector<64x128xi32>, i32 -> vector<64x128xi32>
      %98 = arith.minsi %96, %97 : vector<64x128xi32>
      %c1_i32_39 = arith.constant 1 : i32
      %99 = tpu.dynamic_rotate %98 by %c1_i32_39 dim 0 : vector<64x128xi32>, i32 -> vector<64x128xi32>
      %100 = arith.minsi %98, %99 : vector<64x128xi32>
      %c63_i32_40 = arith.constant 63 : i32
      %101 = tpu.dynamic_rotate %98 by %c63_i32_40 dim 0 : vector<64x128xi32>, i32 -> vector<64x128xi32>
      %102 = arith.minsi %100, %101 : vector<64x128xi32>
      %c258_i32_41 = arith.constant 258 : i32
      %103 = vector.broadcast %c258_i32_41 : i32 to vector<64x128xi32>
      %104 = arith.select %44, %102, %103 : vector<64x128xi1>, vector<64x128xi32>
      %c1_i32_42 = arith.constant 1 : i32
      %105 = tpu.dynamic_rotate %104 by %c1_i32_42 dim 1 : vector<64x128xi32>, i32 -> vector<64x128xi32>
      %106 = arith.minsi %104, %105 : vector<64x128xi32>
      %c127_i32_43 = arith.constant 127 : i32
      %107 = tpu.dynamic_rotate %104 by %c127_i32_43 dim 1 : vector<64x128xi32>, i32 -> vector<64x128xi32>
      %108 = arith.minsi %106, %107 : vector<64x128xi32>
      %c1_i32_44 = arith.constant 1 : i32
      %109 = tpu.dynamic_rotate %108 by %c1_i32_44 dim 0 : vector<64x128xi32>, i32 -> vector<64x128xi32>
      %110 = arith.minsi %108, %109 : vector<64x128xi32>
      %c63_i32_45 = arith.constant 63 : i32
      %111 = tpu.dynamic_rotate %108 by %c63_i32_45 dim 0 : vector<64x128xi32>, i32 -> vector<64x128xi32>
      %112 = arith.minsi %110, %111 : vector<64x128xi32>
      %c258_i32_46 = arith.constant 258 : i32
      %113 = vector.broadcast %c258_i32_46 : i32 to vector<64x128xi32>
      %114 = arith.select %44, %112, %113 : vector<64x128xi1>, vector<64x128xi32>
      %c1_i32_47 = arith.constant 1 : i32
      %115 = tpu.dynamic_rotate %114 by %c1_i32_47 dim 1 : vector<64x128xi32>, i32 -> vector<64x128xi32>
      %116 = arith.minsi %114, %115 : vector<64x128xi32>
      %c127_i32_48 = arith.constant 127 : i32
      %117 = tpu.dynamic_rotate %114 by %c127_i32_48 dim 1 : vector<64x128xi32>, i32 -> vector<64x128xi32>
      %118 = arith.minsi %116, %117 : vector<64x128xi32>
      %c1_i32_49 = arith.constant 1 : i32
      %119 = tpu.dynamic_rotate %118 by %c1_i32_49 dim 0 : vector<64x128xi32>, i32 -> vector<64x128xi32>
      %120 = arith.minsi %118, %119 : vector<64x128xi32>
      %c63_i32_50 = arith.constant 63 : i32
      %121 = tpu.dynamic_rotate %118 by %c63_i32_50 dim 0 : vector<64x128xi32>, i32 -> vector<64x128xi32>
      %122 = arith.minsi %120, %121 : vector<64x128xi32>
      %c258_i32_51 = arith.constant 258 : i32
      %123 = vector.broadcast %c258_i32_51 : i32 to vector<64x128xi32>
      %124 = arith.select %44, %122, %123 : vector<64x128xi1>, vector<64x128xi32>
      %c1_i32_52 = arith.constant 1 : i32
      %125 = tpu.dynamic_rotate %124 by %c1_i32_52 dim 1 : vector<64x128xi32>, i32 -> vector<64x128xi32>
      %126 = arith.minsi %124, %125 : vector<64x128xi32>
      %c127_i32_53 = arith.constant 127 : i32
      %127 = tpu.dynamic_rotate %124 by %c127_i32_53 dim 1 : vector<64x128xi32>, i32 -> vector<64x128xi32>
      %128 = arith.minsi %126, %127 : vector<64x128xi32>
      %c1_i32_54 = arith.constant 1 : i32
      %129 = tpu.dynamic_rotate %128 by %c1_i32_54 dim 0 : vector<64x128xi32>, i32 -> vector<64x128xi32>
      %130 = arith.minsi %128, %129 : vector<64x128xi32>
      %c63_i32_55 = arith.constant 63 : i32
      %131 = tpu.dynamic_rotate %128 by %c63_i32_55 dim 0 : vector<64x128xi32>, i32 -> vector<64x128xi32>
      %132 = arith.minsi %130, %131 : vector<64x128xi32>
      %c258_i32_56 = arith.constant 258 : i32
      %133 = vector.broadcast %c258_i32_56 : i32 to vector<64x128xi32>
      %134 = arith.select %44, %132, %133 : vector<64x128xi1>, vector<64x128xi32>
      %c1_i32_57 = arith.constant 1 : i32
      %135 = tpu.dynamic_rotate %134 by %c1_i32_57 dim 1 : vector<64x128xi32>, i32 -> vector<64x128xi32>
      %136 = arith.minsi %134, %135 : vector<64x128xi32>
      %c127_i32_58 = arith.constant 127 : i32
      %137 = tpu.dynamic_rotate %134 by %c127_i32_58 dim 1 : vector<64x128xi32>, i32 -> vector<64x128xi32>
      %138 = arith.minsi %136, %137 : vector<64x128xi32>
      %c1_i32_59 = arith.constant 1 : i32
      %139 = tpu.dynamic_rotate %138 by %c1_i32_59 dim 0 : vector<64x128xi32>, i32 -> vector<64x128xi32>
      %140 = arith.minsi %138, %139 : vector<64x128xi32>
      %c63_i32_60 = arith.constant 63 : i32
      %141 = tpu.dynamic_rotate %138 by %c63_i32_60 dim 0 : vector<64x128xi32>, i32 -> vector<64x128xi32>
      %142 = arith.minsi %140, %141 : vector<64x128xi32>
      %c258_i32_61 = arith.constant 258 : i32
      %143 = vector.broadcast %c258_i32_61 : i32 to vector<64x128xi32>
      %144 = arith.select %44, %142, %143 : vector<64x128xi1>, vector<64x128xi32>
      %c1_i32_62 = arith.constant 1 : i32
      %145 = tpu.dynamic_rotate %144 by %c1_i32_62 dim 1 : vector<64x128xi32>, i32 -> vector<64x128xi32>
      %146 = arith.minsi %144, %145 : vector<64x128xi32>
      %c127_i32_63 = arith.constant 127 : i32
      %147 = tpu.dynamic_rotate %144 by %c127_i32_63 dim 1 : vector<64x128xi32>, i32 -> vector<64x128xi32>
      %148 = arith.minsi %146, %147 : vector<64x128xi32>
      %c1_i32_64 = arith.constant 1 : i32
      %149 = tpu.dynamic_rotate %148 by %c1_i32_64 dim 0 : vector<64x128xi32>, i32 -> vector<64x128xi32>
      %150 = arith.minsi %148, %149 : vector<64x128xi32>
      %c63_i32_65 = arith.constant 63 : i32
      %151 = tpu.dynamic_rotate %148 by %c63_i32_65 dim 0 : vector<64x128xi32>, i32 -> vector<64x128xi32>
      %152 = arith.minsi %150, %151 : vector<64x128xi32>
      %c258_i32_66 = arith.constant 258 : i32
      %153 = vector.broadcast %c258_i32_66 : i32 to vector<64x128xi32>
      %154 = arith.select %44, %152, %153 : vector<64x128xi1>, vector<64x128xi32>
      %c1_i32_67 = arith.constant 1 : i32
      %155 = tpu.dynamic_rotate %154 by %c1_i32_67 dim 1 : vector<64x128xi32>, i32 -> vector<64x128xi32>
      %156 = arith.minsi %154, %155 : vector<64x128xi32>
      %c127_i32_68 = arith.constant 127 : i32
      %157 = tpu.dynamic_rotate %154 by %c127_i32_68 dim 1 : vector<64x128xi32>, i32 -> vector<64x128xi32>
      %158 = arith.minsi %156, %157 : vector<64x128xi32>
      %c1_i32_69 = arith.constant 1 : i32
      %159 = tpu.dynamic_rotate %158 by %c1_i32_69 dim 0 : vector<64x128xi32>, i32 -> vector<64x128xi32>
      %160 = arith.minsi %158, %159 : vector<64x128xi32>
      %c63_i32_70 = arith.constant 63 : i32
      %161 = tpu.dynamic_rotate %158 by %c63_i32_70 dim 0 : vector<64x128xi32>, i32 -> vector<64x128xi32>
      %162 = arith.minsi %160, %161 : vector<64x128xi32>
      %c258_i32_71 = arith.constant 258 : i32
      %163 = vector.broadcast %c258_i32_71 : i32 to vector<64x128xi32>
      %164 = arith.select %44, %162, %163 : vector<64x128xi1>, vector<64x128xi32>
      %c1_i32_72 = arith.constant 1 : i32
      %165 = tpu.dynamic_rotate %164 by %c1_i32_72 dim 1 : vector<64x128xi32>, i32 -> vector<64x128xi32>
      %166 = arith.minsi %164, %165 : vector<64x128xi32>
      %c127_i32_73 = arith.constant 127 : i32
      %167 = tpu.dynamic_rotate %164 by %c127_i32_73 dim 1 : vector<64x128xi32>, i32 -> vector<64x128xi32>
      %168 = arith.minsi %166, %167 : vector<64x128xi32>
      %c1_i32_74 = arith.constant 1 : i32
      %169 = tpu.dynamic_rotate %168 by %c1_i32_74 dim 0 : vector<64x128xi32>, i32 -> vector<64x128xi32>
      %170 = arith.minsi %168, %169 : vector<64x128xi32>
      %c63_i32_75 = arith.constant 63 : i32
      %171 = tpu.dynamic_rotate %168 by %c63_i32_75 dim 0 : vector<64x128xi32>, i32 -> vector<64x128xi32>
      %172 = arith.minsi %170, %171 : vector<64x128xi32>
      %c258_i32_76 = arith.constant 258 : i32
      %173 = vector.broadcast %c258_i32_76 : i32 to vector<64x128xi32>
      %174 = arith.select %44, %172, %173 : vector<64x128xi1>, vector<64x128xi32>
      %c1_i32_77 = arith.constant 1 : i32
      %175 = tpu.dynamic_rotate %174 by %c1_i32_77 dim 1 : vector<64x128xi32>, i32 -> vector<64x128xi32>
      %176 = arith.minsi %174, %175 : vector<64x128xi32>
      %c127_i32_78 = arith.constant 127 : i32
      %177 = tpu.dynamic_rotate %174 by %c127_i32_78 dim 1 : vector<64x128xi32>, i32 -> vector<64x128xi32>
      %178 = arith.minsi %176, %177 : vector<64x128xi32>
      %c1_i32_79 = arith.constant 1 : i32
      %179 = tpu.dynamic_rotate %178 by %c1_i32_79 dim 0 : vector<64x128xi32>, i32 -> vector<64x128xi32>
      %180 = arith.minsi %178, %179 : vector<64x128xi32>
      %c63_i32_80 = arith.constant 63 : i32
      %181 = tpu.dynamic_rotate %178 by %c63_i32_80 dim 0 : vector<64x128xi32>, i32 -> vector<64x128xi32>
      %182 = arith.minsi %180, %181 : vector<64x128xi32>
      %c258_i32_81 = arith.constant 258 : i32
      %183 = vector.broadcast %c258_i32_81 : i32 to vector<64x128xi32>
      %184 = arith.select %44, %182, %183 : vector<64x128xi1>, vector<64x128xi32>
      %c1_i32_82 = arith.constant 1 : i32
      %185 = tpu.dynamic_rotate %184 by %c1_i32_82 dim 1 : vector<64x128xi32>, i32 -> vector<64x128xi32>
      %186 = arith.minsi %184, %185 : vector<64x128xi32>
      %c127_i32_83 = arith.constant 127 : i32
      %187 = tpu.dynamic_rotate %184 by %c127_i32_83 dim 1 : vector<64x128xi32>, i32 -> vector<64x128xi32>
      %188 = arith.minsi %186, %187 : vector<64x128xi32>
      %c1_i32_84 = arith.constant 1 : i32
      %189 = tpu.dynamic_rotate %188 by %c1_i32_84 dim 0 : vector<64x128xi32>, i32 -> vector<64x128xi32>
      %190 = arith.minsi %188, %189 : vector<64x128xi32>
      %c63_i32_85 = arith.constant 63 : i32
      %191 = tpu.dynamic_rotate %188 by %c63_i32_85 dim 0 : vector<64x128xi32>, i32 -> vector<64x128xi32>
      %192 = arith.minsi %190, %191 : vector<64x128xi32>
      %c258_i32_86 = arith.constant 258 : i32
      %193 = vector.broadcast %c258_i32_86 : i32 to vector<64x128xi32>
      %194 = arith.select %44, %192, %193 : vector<64x128xi1>, vector<64x128xi32>
      %195 = arith.subi %arg4, %194 : vector<64x128xi32>
      %196 = vector.shape_cast %195 : vector<64x128xi32> to vector<1x64x128xi32>
      %cst = arith.constant dense<0> : vector<1xi32>
      %197 = vector.multi_reduction <add>, %196, %cst [1, 2] : vector<1x64x128xi32> to vector<1xi32>
      %198 = vector.shape_cast %197 : vector<1xi32> to vector<1x1x1xi32>
      %199 = vector.extract %198[0, 0, 0] : i32 from vector<1x1x1xi32>
      %c0_i32_87 = arith.constant 0 : i32
      %200 = arith.cmpi sgt, %199, %c0_i32_87 : i32
      %c14_i32 = arith.constant 14 : i32
      %201 = arith.addi %arg3, %c14_i32 : i32
      scf.yield %201, %194, %200 : i32, vector<64x128xi32>, i1
    }
    %c0_i32_15 = arith.constant 0 : i32
    %48 = vector.broadcast %c0_i32_15 : i32 to vector<64x128xi32>
    %49 = arith.select %44, %47#1, %48 : vector<64x128xi1>, vector<64x128xi32>
    %50 = arith.trunci %49 : vector<64x128xi32> to vector<64x128xi16>
    %51 = arith.index_cast %c0_i32_11 : i32 to index
    %c0_16 = arith.constant 0 : index
    %c0_17 = arith.constant 0 : index
    %52 = vector.load %arg2[%51, %c0_16, %c0_17] : memref<1x64x128xi16, #tpu.memory_space<vmem>>, vector<1x64x128xi16>
    %53 = vector.shape_cast %52 : vector<1x64x128xi16> to vector<64x128xi16>
    %54 = vector.shape_cast %50 : vector<64x128xi16> to vector<1x64x128xi16>
    tpu.vector_store %arg2[%51, %c0_16, %c0_17], %54 {strides = array<i32>} : memref<1x64x128xi16, #tpu.memory_space<vmem>>, vector<1x64x128xi16>,
    %c1_i32_18 = arith.constant 1 : i32
    return
  }
  func.func @transform_0(%arg0: i32) -> (i32, i32, i32) {
    %c0_i32 = arith.constant 0 : i32
    %c0_i32_0 = arith.constant 0 : i32
    %c0_i32_1 = arith.constant 0 : i32
    return %arg0, %c0_i32, %c0_i32_0 : i32, i32, i32
  }
  func.func @transform_1(%arg0: i32) -> (i32, i32, i32) {
    %c0_i32 = arith.constant 0 : i32
    %c0_i32_0 = arith.constant 0 : i32
    %c0_i32_1 = arith.constant 0 : i32
    return %arg0, %c0_i32, %c0_i32_0 : i32, i32, i32
  }
}

</mosaic_0001>

<bundles_post_ra>
// kernel: _label_components.1
= control target key start
LH: loop header
LB: loop body
LE: loop exit
PB: predicated region body
PF: predicated region fallthrough
CT: control target
= control target key end

     0   :  { %v8_v0 = vlaneseq  ;;  %v4010_v57 = vmov 0  ;;  %v4012_v58 = vmov 0  ;;  %v4014_v59 = vmov 0  ;;  %s3985_s0 = inlined_call_operand.vmem [shape: s8[1,64,128], index: 0, kind: input, shape index: {}]   ;;  %s3986_s1 = inlined_call_operand.vmem [shape: s16[1,64,128], index: 1, kind: output, shape index: {}]  }
   0x1   :  { %v151_v1 = vld [vmem:[%s3985_s0] sm:$0xff]  ;;  %v152_v2 = vld [vmem:[%s3985_s0 + $0x8] sm:$0xff]  ;;  %v4016_v60 = vmov 0  ;;  %s2434_s0 = smov 0  }
   0x2   :  { %v2360_v3 = vshrl.u32 %v8_v0, 7  ;;  %v18_v4 = vand.u32 127, %v8_v0  ;;  %v153_v5 = vunpack.c.0.s8 %v151_v1  ;;  %v154_v6 = vunpack.c.1.s8 %v151_v1 }
   0x3   :  { %v155_v7 = vunpack.c.2.s8 %v151_v1  ;;  %v156_v8 = vunpack.c.3.s8 %v151_v1  ;;  %v157_v9 = vunpack.c.0.s8 %v152_v2  ;;  %v158_v10 = vunpack.c.1.s8 %v152_v2 }
   0x4   :  { %v10_v11 = vadd.s32 8, %v2360_v3  ;;  %v11_v12 = vadd.s32 16, %v2360_v3  ;;  %v12_v13 = vadd.s32 24, %v2360_v3  ;;  %v13_v14 = vadd.s32 32, %v2360_v3 }
   0x5   :  { %v14_v15 = vadd.s32 40, %v2360_v3  ;;  %v15_v16 = vadd.s32 48, %v2360_v3  ;;  %v16_v17 = vadd.s32 56, %v2360_v3  ;;  %v23_v18 = vand.u32 15, %v2360_v3 }
   0x6   :  { %v30_v19 = vand.u32 15, %v10_v11  ;;  %v37_v20 = vand.u32 15, %v11_v12  ;;  %v44_v21 = vand.u32 15, %v12_v13  ;;  %v51_v22 = vand.u32 15, %v13_v14 }
   0x7   :  { %v58_v23 = vand.u32 15, %v14_v15  ;;  %v65_v24 = vand.u32 15, %v15_v16  ;;  %v72_v25 = vand.u32 15, %v16_v17  ;;  %v115_v26 = vmul.u32 16, %v23_v18 }
   0x8   :  { %v116_v27 = vmul.u32 16, %v30_v19  ;;  %v117_v28 = vmul.u32 16, %v37_v20  ;;  %v127_v29 = vand.u32 15, %v18_v4  ;;  %v159_v30 = vunpack.c.2.s8 %v152_v2 }
   0x9   :  { %v118_v31 = vmul.u32 16, %v44_v21  ;;  %v119_v32 = vmul.u32 16, %v51_v22  ;;  %v160_v33 = vunpack.c.3.s8 %v152_v2  ;;  %vm2370_vm0 = vcmp.gt.s32.totalorder %v153_v5, 0 }
   0xa   :  { %v120_v35 = vmul.u32 16, %v58_v23  ;;  %v121_v36 = vmul.u32 16, %v65_v24  ;;  %v135_v37 = vadd.s32 %v127_v29, %v115_v26  ;;  %v136_v38 = vadd.s32 %v127_v29, %v116_v27 }
   0xb   :  { %v122_v39 = vmul.u32 16, %v72_v25  ;;  %v137_v40 = vadd.s32 %v127_v29, %v117_v28  ;;  %v138_v41 = vadd.s32 %v127_v29, %v118_v31  ;;  %v139_v42 = vadd.s32 %v127_v29, %v119_v32 }
   0xc   :  { %v140_v43 = vadd.s32 %v127_v29, %v120_v35  ;;  %v141_v44 = vadd.s32 %v127_v29, %v121_v36  ;;  %v143_v45 = vadd.s32 1, %v135_v37  ;;  %v144_v46 = vadd.s32 1, %v136_v38 }
   0xd   :  { %v142_v47 = vadd.s32 %v127_v29, %v122_v39  ;;  %v145_v48 = vadd.s32 1, %v137_v40  ;;  %v146_v49 = vadd.s32 1, %v138_v41  ;;  %v147_v50 = vadd.s32 1, %v139_v42 }
   0xe   :  { %v148_v51 = vadd.s32 1, %v140_v43  ;;  %v149_v52 = vadd.s32 1, %v141_v44  ;;  %vm2374_vm1 = vcmp.gt.s32.totalorder %v154_v6, 0  ;;  %vm2378_vm2 = vcmp.gt.s32.totalorder %v155_v7, 0 }
   0xf   :  { %v150_v55 = vadd.s32 1, %v142_v47  ;;  %vm2382_vm3 = vcmp.gt.s32.totalorder %v156_v8, 0  ;;  %vm2386_vm4 = vcmp.gt.s32.totalorder %v157_v9, 0  ;;  %vm2390_vm5 = vcmp.gt.s32.totalorder %v158_v10, 0 }
  0x10   :  { %v4011_v57 = vsel %vm2386_vm4, 4294967295, %v4010_v57  ;;  %v4013_v58 = vsel %vm2390_vm5, 4294967295, %v4012_v58  ;;  %vm2394_vm6 = vcmp.gt.s32.totalorder %v159_v30, 0  ;;  %vm2398_vm7 = vcmp.gt.s32.totalorder %v160_v33, 0 }
  0x11   :  { %v4015_v59 = vsel %vm2394_vm6, 4294967295, %v4014_v59  ;;  %v4017_v60 = vsel %vm2398_vm7, 4294967295, %v4016_v60  ;;  %v169_v61 = vsel %vm2370_vm0, %v143_v45, 258   ;;  %v170_v62 = vsel %vm2374_vm1, %v144_v46, 258  }
  0x12   :  { %v171_v63 = vsel %vm2378_vm2, %v145_v48, 258   ;;  %v172_v0 = vsel %vm2382_vm3, %v146_v49, 258   ;;  %v173_v1 = vsel %vm2386_vm4, %v147_v50, 258   ;;  %v174_v2 = vsel %vm2390_vm5, %v148_v51, 258  }
  0x13   :  { %v175_v4 = vsel %vm2394_vm6, %v149_v52, 258   ;;  %v176_v5 = vsel %vm2398_vm7, %v150_v55, 258  }
  0x14 LB: > { %s2342_s10 = smov 1   ;;  %s2343_s11 = smov 127   ;;  %vm4026_vm4 = vcmp.lt.s32.totalorder %v2360_v3, 1  ;;  %vm4033_vm5 = vnez %v4013_v58  ;;  %vm4036_vm7 = vnez %v4017_v60  ;;  %s2340_s0 = sphi %s2434_s0, %s2134_s0   ;;  %v2336_v61 = vphi %v169_v61, %v4271_v61   ;;  %v2332_v62 = vphi %v170_v62, %v4270_v62   ;;  %v2328_v63 = vphi %v171_v63, %v4269_v63   ;;  %v2324_v0 = vphi %v172_v0, %v4268_v0   ;;  %v2320_v1 = vphi %v173_v1, %v4267_v1   ;;  %v2316_v2 = vphi %v174_v2, %v4266_v2   ;;  %v2312_v4 = vphi %v175_v4, %v4265_v4   ;;  %v2308_v5 = vphi %v176_v5, %v4264_v5  }
  0x15   : > { %193 = vrot.lane.b32.xlu0 %v2336_v61, %s2342_s10  ;;  %197 = vrot.lane.b32.xlu1 %v2328_v63, %s2342_s10  ;;  %s2134_s0 = sadd.s32 14, %s2340_s0  }
  0x16   : > { %p188_p1 = scmp.lt.s32.totalorder %s2134_s0, 196 }
  0x19   : > { %195 = vrot.lane.b32.xlu0 %v2332_v62, %s2342_s10  ;;  %199 = vrot.lane.b32.xlu1 %v2324_v0, %s2342_s10 }
  0x1d   : > { %201 = vrot.lane.b32.xlu0 %v2320_v1, %s2342_s10  ;;  %203 = vrot.lane.b32.xlu1 %v2316_v2, %s2342_s10 }
  0x21   : > { %205 = vrot.lane.b32.xlu0 %v2312_v4, %s2342_s10  ;;  %207 = vrot.lane.b32.xlu1 %v2308_v5, %s2342_s10 }
  0x25   : > { %225 = vrot.lane.b32.xlu0 %v2336_v61, %s2343_s11  ;;  %227 = vrot.lane.b32.xlu1 %v2332_v62, %s2343_s11 }
  0x29   : > { %229 = vrot.lane.b32.xlu0 %v2328_v63, %s2343_s11  ;;  %231 = vrot.lane.b32.xlu1 %v2324_v0, %s2343_s11 }
  0x2d   : > { %233 = vrot.lane.b32.xlu0 %v2320_v1, %s2343_s11  ;;  %235 = vrot.lane.b32.xlu1 %v2316_v2, %s2343_s11 }
  0x31   : > { %237 = vrot.lane.b32.xlu0 %v2312_v4, %s2343_s11  ;;  %239 = vrot.lane.b32.xlu1 %v2308_v5, %s2343_s11 }
  0x87   : > { %v194_v6 = vpop.permute.xlu0 %193  ;;  %v198_v7 = vpop.permute.xlu1 %197 }
  0x88   : > { %vm209_vm9 = vcmp.lt.s32.totalorder %v2336_v61, %v194_v6  ;;  %vm213_vm10 = vcmp.lt.s32.totalorder %v2328_v63, %v198_v7 }
  0x89   : > { %v210_v15 = vsel %vm209_vm9, %v2336_v61, %v194_v6  ;;  %v214_v20 = vsel %vm213_vm10, %v2328_v63, %v198_v7  ;;  %vm4018_vm10 = vcmp.lt.s32.totalorder %v2360_v3, 1 }
  0x8b   : > { %v196_v8 = vpop.permute.xlu0 %195  ;;  %v200_v9 = vpop.permute.xlu1 %199 }
  0x8c   : > { %vm211_vm8 = vcmp.lt.s32.totalorder %v2332_v62, %v196_v8  ;;  %vm215_vm11 = vcmp.lt.s32.totalorder %v2324_v0, %v200_v9 }
  0x8d   : > { %v212_v14 = vsel %vm211_vm8, %v2332_v62, %v196_v8  ;;  %v216_v21 = vsel %vm215_vm11, %v2324_v0, %v200_v9  ;;  %vm4019_vm11 = vmmov %vm4018_vm10 }
  0x8f   : > { %v202_v10 = vpop.permute.xlu0 %201  ;;  %v204_v11 = vpop.permute.xlu1 %203 }
  0x90   : > { %vm217_vm8 = vcmp.lt.s32.totalorder %v2320_v1, %v202_v10  ;;  %vm219_vm9 = vcmp.lt.s32.totalorder %v2316_v2, %v204_v11 }
  0x91   : > { %v218_v32 = vsel %vm217_vm8, %v2320_v1, %v202_v10  ;;  %v220_v33 = vsel %vm219_vm9, %v2316_v2, %v204_v11  ;;  %vm4021_vm9 = vcmp.lt.s32.totalorder %v2360_v3, 7 }
  0x93   : > { %v206_v12 = vpop.permute.xlu0 %205  ;;  %v208_v13 = vpop.permute.xlu1 %207 }
  0x94   : > { %vm223_vm14 = vcmp.lt.s32.totalorder %v2308_v5, %v208_v13 }
  0x95   : > { %v224_v42 = vsel %vm223_vm14, %v2308_v5, %v208_v13 }
  0x97   : > { %v226_v16 = vpop.permute.xlu0 %225  ;;  %v228_v17 = vpop.permute.xlu1 %227 }
  0x98   : > { %vm241_vm12 = vcmp.lt.s32.totalorder %v210_v15, %v226_v16  ;;  %vm243_vm13 = vcmp.lt.s32.totalorder %v212_v14, %v228_v17 }
  0x99   : > { %v2501_v18 = vsel %vm241_vm12, %v210_v15, %v226_v16  ;;  %v244_v19 = vsel %vm243_vm13, %v212_v14, %v228_v17  ;;  %vm221_vm13 = vcmp.lt.s32.totalorder %v2312_v4, %v206_v12 }
  0x9a   : > { %v257_v22 = vrot.slane %v2501_v18, 7  ;;  %v258_v23 = vrot.slane %v244_v19, 7  ;;  %v290_v28 = vrot.slane %v2501_v18, 1  ;;  %v291_v29 = vrot.slane %v244_v19, 1 }
  0x9b   : > { %v230_v24 = vpop.permute.xlu0 %229  ;;  %v232_v25 = vpop.permute.xlu1 %231  ;;  %v222_v41 = vsel %vm221_vm13, %v2312_v4, %v206_v12 }
  0x9c   : > { %vm245_vm12 = vcmp.lt.s32.totalorder %v214_v20, %v230_v24  ;;  %vm247_vm6 = vcmp.lt.s32.totalorder %v216_v21, %v232_v25  ;;  %v272_v35 = vsel %vm4018_vm10, %v257_v22, %v258_v23  ;;  %v305_v47 = vsel %vm4021_vm9, %v290_v28, %v291_v29 }
  0x9d   : > { %v246_v26 = vsel %vm245_vm12, %v214_v20, %v230_v24  ;;  %v248_v27 = vsel %vm247_vm6, %v216_v21, %v232_v25  ;;  %vm4020_vm6 = vmmov %vm4018_vm10  ;;  %vm276_vm8 = vcmp.lt.s32.totalorder %v244_v19, %v272_v35 }
  0x9e   : > { %v259_v30 = vrot.slane %v246_v26, 7  ;;  %v260_v31 = vrot.slane %v248_v27, 7  ;;  %v292_v36 = vrot.slane %v246_v26, 1  ;;  %v293_v48 = vrot.slane %v248_v27, 1  ;;  %vm4022_vm14 = vmmov %vm4020_vm6 }
  0x9f   : > { %v234_v37 = vpop.permute.xlu0 %233  ;;  %v236_v38 = vpop.permute.xlu1 %235  ;;  %v277_v9 = vsel %vm276_vm8, %v244_v19, %v272_v35 }
  0xa0   : > { %v271_v39 = vsel %vm4019_vm11, %v258_v23, %v259_v30  ;;  %v270_v40 = vsel %vm4020_vm6, %v259_v30, %v260_v31  ;;  %vm249_vm12 = vcmp.lt.s32.totalorder %v218_v32, %v234_v37  ;;  %vm251_vm15 = vcmp.lt.s32.totalorder %v220_v33, %v236_v38  ;;  %vm4023_vm6 = vmmov %vm4021_vm9 }
  0xa1   : > { %v2529_v43 = vsel %vm249_vm12, %v218_v32, %v234_v37  ;;  %v252_v44 = vsel %vm251_vm15, %v220_v33, %v236_v38  ;;  %vm280_vm11 = vcmp.lt.s32.totalorder %v248_v27, %v270_v40  ;;  %v304_v55 = vsel %vm4023_vm6, %v291_v29, %v292_v36  ;;  %vm4024_vm10 = vmmov %vm4023_vm6 }
  0xa2   : > { %v261_v45 = vrot.slane %v2529_v43, 7  ;;  %v262_v46 = vrot.slane %v252_v44, 7  ;;  %v294_v49 = vrot.slane %v2529_v43, 1  ;;  %v295_v6 = vrot.slane %v252_v44, 1 }
  0xa3   : > { %v238_v50 = vpop.permute.xlu0 %237  ;;  %v240_v51 = vpop.permute.xlu1 %239  ;;  %v281_v13 = vsel %vm280_vm11, %v248_v27, %v270_v40  ;;  %vm309_vm9 = vcmp.lt.s32.totalorder %v277_v9, %v304_v55  ;;  %vm4028_vm11 = vmmov %vm4023_vm6 }
  0xa4   : > { %v268_v52 = vsel %vm4022_vm14, %v261_v45, %v262_v46  ;;  %vm253_vm15 = vcmp.lt.s32.totalorder %v222_v41, %v238_v50  ;;  %vm255_vm13 = vcmp.lt.s32.totalorder %v224_v42, %v240_v51  ;;  %v302_v14 = vsel %vm4024_vm10, %v293_v48, %v294_v49 }
  0xa5   : > { %v254_v7 = vsel %vm253_vm15, %v222_v41, %v238_v50  ;;  %v256_v8 = vsel %vm255_vm13, %v224_v42, %v240_v51  ;;  %vm284_vm12 = vcmp.lt.s32.totalorder %v252_v44, %v268_v52  ;;  %vm4025_vm14 = vcmp.lt.s32.totalorder %v246_v26, %v271_v39  ;;  %vm4027_vm15 = vmmov %vm4026_vm4 }
  0xa6   : > { %v263_v10 = vrot.slane %v254_v7, 7  ;;  %v296_v11 = vrot.slane %v254_v7, 1  ;;  %v264_v12 = vrot.slane %v256_v8, 7  ;;  %v279_v15 = vsel %vm4025_vm14, %v246_v26, %v271_v39  ;;  %vm4030_vm10 = vmmov %vm4027_vm15 }
  0xa7   : > { %v269_v16 = vsel %vm4026_vm4, %v260_v31, %v261_v45  ;;  %v310_v20 = vsel %vm309_vm9, %v277_v9, %v304_v55  ;;  %vm313_vm8 = vcmp.lt.s32.totalorder %v281_v13, %v302_v14  ;;  %v303_v23 = vsel %vm4028_vm11, %v292_v36, %v293_v48  ;;  %vm4029_vm4 = vmmov %vm4023_vm6 }
  0xa8   : > { %v266_v17 = vsel %vm4027_vm15, %v263_v10, %v264_v12  ;;  %v2552_v19 = vsel %vm2374_vm1, %v310_v20, 258  ;;  %v314_v21 = vsel %vm313_vm8, %v281_v13, %v302_v14  ;;  %v297_v24 = vrot.slane %v256_v8, 1  ;;  %vm4031_vm15 = vmmov %vm4030_vm10 }
  0xa9   : > { %vm288_vm13 = vcmp.lt.s32.totalorder %v256_v8, %v266_v17  ;;  %333 = vrot.lane.b32.xlu1 %v2552_v19, %s2342_s10  ;;  %v285_v25 = vsel %vm284_vm12, %v252_v44, %v268_v52  ;;  %v300_v26 = vsel %vm4029_vm4, %v295_v6, %v296_v11  ;;  %v273_v27 = vsel %vm4030_vm10, %v264_v12, %v257_v22  ;;  %vm4032_vm11 = vmmov %vm4029_vm4 }
  0xaa   : > { %vm282_vm6 = vcmp.lt.s32.totalorder %v2529_v43, %v269_v16  ;;  %v326_v29 = vsel %vm2382_vm3, %v314_v21, 258  ;;  %vm317_vm9 = vcmp.lt.s32.totalorder %v285_v25, %v300_v26  ;;  %vm274_vm14 = vcmp.lt.s32.totalorder %v2501_v18, %v273_v27  ;;  %vm4034_vm10 = vmmov %vm4032_vm11 }
  0xab   : > { %v267_v30 = vsel %vm4031_vm15, %v262_v46, %v263_v10  ;;  %v318_v31 = vsel %vm317_vm9, %v285_v25, %v300_v26  ;;  %v275_v32 = vsel %vm274_vm14, %v2501_v18, %v273_v27  ;;  %v289_v33 = vsel %vm288_vm13, %v256_v8, %v266_v17 }
  0xac   : > { %vm307_vm12 = vcmp.lt.s32.totalorder %v275_v32, %v305_v47  ;;  %vm311_vm8 = vcmp.lt.s32.totalorder %v279_v15, %v303_v23  ;;  %v306_v35 = vsel %vm4032_vm11, %v297_v24, %v290_v28  ;;  %v283_v36 = vsel %vm282_vm6, %v2529_v43, %v269_v16  ;;  %vm4035_vm6 = vmmov %vm4034_vm10 }
  0xad   : > { %337 = vrot.lane.b32.xlu1 %v326_v29, %s2342_s10  ;;  %v308_v22 = vsel %vm307_vm12, %v275_v32, %v305_v47  ;;  %vm286_vm4 = vcmp.lt.s32.totalorder %v254_v7, %v267_v30  ;;  %v328_v37 = vsel %vm4033_vm5, %v318_v31, 258  ;;  %vm321_vm13 = vcmp.lt.s32.totalorder %v289_v33, %v306_v35 }
  0xae   : > { %v323_v38 = vsel %vm2370_vm0, %v308_v22, 258  ;;  %v312_v39 = vsel %vm311_vm8, %v279_v15, %v303_v23  ;;  %v301_v40 = vsel %vm4034_vm10, %v294_v49, %v295_v6  ;;  %v322_v18 = vsel %vm321_vm13, %v289_v33, %v306_v35 }
  0xaf   : > { %331 = vrot.lane.b32.xlu0 %v323_v38, %s2342_s10  ;;  %vm315_vm9 = vcmp.lt.s32.totalorder %v283_v36, %v301_v40  ;;  %v287_v28 = vsel %vm286_vm4, %v254_v7, %v267_v30  ;;  %v325_v41 = vsel %vm2378_vm2, %v312_v39, 258  ;;  %v299_v43 = vsel %vm4035_vm6, %v296_v11, %v297_v24 }
  0xb0   : > { %v316_v42 = vsel %vm315_vm9, %v283_v36, %v301_v40  ;;  %v330_v44 = vsel %vm4036_vm7, %v322_v18, 258  ;;  %vm319_vm14 = vcmp.lt.s32.totalorder %v287_v28, %v299_v43  ;;  %vm4037_vm15 = vnez %v4011_v57 }
  0xb1   : > { %341 = vrot.lane.b32.xlu1 %v328_v37, %s2342_s10  ;;  %v327_v45 = vsel %vm4037_vm15, %v316_v42, 258  ;;  %v320_v46 = vsel %vm319_vm14, %v287_v28, %v299_v43  ;;  %vm4038_vm12 = vnez %v4015_v59 }
  0xb2   : > { %v329_v47 = vsel %vm4038_vm12, %v320_v46, 258 }
  0xb3   : > { %335 = vrot.lane.b32.xlu0 %v325_v41, %s2342_s10 }
  0xb5   : > { %345 = vrot.lane.b32.xlu1 %v330_v44, %s2342_s10 }
  0xb7   : > { %339 = vrot.lane.b32.xlu0 %v327_v45, %s2342_s10 }
  0xb9   : > { %365 = vrot.lane.b32.xlu1 %v2552_v19, %s2343_s11 }
  0xbb   : > { %343 = vrot.lane.b32.xlu0 %v329_v47, %s2342_s10 }
  0xbd   : > { %369 = vrot.lane.b32.xlu1 %v326_v29, %s2343_s11 }
  0xbf   : > { %363 = vrot.lane.b32.xlu0 %v323_v38, %s2343_s11 }
  0xc1   : > { %373 = vrot.lane.b32.xlu1 %v328_v37, %s2343_s11 }
  0xc3   : > { %367 = vrot.lane.b32.xlu0 %v325_v41, %s2343_s11 }
  0xc5   : > { %377 = vrot.lane.b32.xlu1 %v330_v44, %s2343_s11 }
  0xc7   : > { %371 = vrot.lane.b32.xlu0 %v327_v45, %s2343_s11 }
  0xcb   : > { %375 = vrot.lane.b32.xlu0 %v329_v47, %s2343_s11 }
 0x11b   : > { %v334_v48 = vpop.permute.xlu1 %333 }
 0x11c   : > { %vm349_vm8 = vcmp.lt.s32.totalorder %v2552_v19, %v334_v48 }
 0x11d   : > { %v350_v8 = vsel %vm349_vm8, %v2552_v19, %v334_v48 }
 0x11f   : > { %v338_v49 = vpop.permute.xlu1 %337 }
 0x120   : > { %vm353_vm11 = vcmp.lt.s32.totalorder %v326_v29, %v338_v49 }
 0x121   : > { %v332_v50 = vpop.permute.xlu0 %331  ;;  %v354_v11 = vsel %vm353_vm11, %v326_v29, %v338_v49 }
 0x122   : > { %vm347_vm13 = vcmp.lt.s32.totalorder %v323_v38, %v332_v50 }
 0x123   : > { %v342_v51 = vpop.permute.xlu1 %341  ;;  %v348_v13 = vsel %vm347_vm13, %v323_v38, %v332_v50 }
 0x124   : > { %vm357_vm10 = vcmp.lt.s32.totalorder %v328_v37, %v342_v51 }
 0x125   : > { %v336_v52 = vpop.permute.xlu0 %335  ;;  %v358_v15 = vsel %vm357_vm10, %v328_v37, %v342_v51 }
 0x126   : > { %vm351_vm14 = vcmp.lt.s32.totalorder %v325_v41, %v336_v52 }
 0x127   : > { %v346_v55 = vpop.permute.xlu1 %345  ;;  %v352_v24 = vsel %vm351_vm14, %v325_v41, %v336_v52 }
 0x128   : > { %vm361_vm6 = vcmp.lt.s32.totalorder %v330_v44, %v346_v55 }
 0x129   : > { %v340_v6 = vpop.permute.xlu0 %339  ;;  %v362_v23 = vsel %vm361_vm6, %v330_v44, %v346_v55 }
 0x12a   : > { %vm355_vm12 = vcmp.lt.s32.totalorder %v327_v45, %v340_v6 }
 0x12b   : > { %v366_v7 = vpop.permute.xlu1 %365  ;;  %v356_v25 = vsel %vm355_vm12, %v327_v45, %v340_v6 }
 0x12c   : > { %vm381_vm4 = vcmp.lt.s32.totalorder %v350_v8, %v366_v7 }
 0x12d   : > { %v344_v9 = vpop.permute.xlu0 %343  ;;  %v382_v12 = vsel %vm381_vm4, %v350_v8, %v366_v7  ;;  %vm4039_vm4 = vcmp.lt.s32.totalorder %v2360_v3, 1 }
 0x12e   : > { %v396_v16 = vrot.slane %v382_v12, 7  ;;  %vm359_vm8 = vcmp.lt.s32.totalorder %v329_v47, %v344_v9  ;;  %v428_v29 = vrot.slane %v382_v12, 1  ;;  %vm4041_vm12 = vmmov %vm4039_vm4 }
 0x12f   : > { %v370_v10 = vpop.permute.xlu1 %369  ;;  %v360_v33 = vsel %vm359_vm8, %v329_v47, %v344_v9  ;;  %vm4043_vm14 = vmmov %vm4039_vm4 }
 0x130   : > { %vm385_vm9 = vcmp.lt.s32.totalorder %v354_v11, %v370_v10 }
 0x131   : > { %v364_v14 = vpop.permute.xlu0 %363  ;;  %v386_v19 = vsel %vm385_vm9, %v354_v11, %v370_v10 }
 0x132   : > { %vm379_vm7 = vcmp.lt.s32.totalorder %v348_v13, %v364_v14  ;;  %v398_v32 = vrot.slane %v386_v19, 7  ;;  %v430_v36 = vrot.slane %v386_v19, 1 }
 0x133   : > { %v374_v17 = vpop.permute.xlu1 %373  ;;  %v2611_v20 = vsel %vm379_vm7, %v348_v13, %v364_v14 }
 0x134   : > { %vm389_vm15 = vcmp.lt.s32.totalorder %v358_v15, %v374_v17  ;;  %v395_v21 = vrot.slane %v2611_v20, 7  ;;  %v427_v26 = vrot.slane %v2611_v20, 1 }
 0x135   : > { %v368_v27 = vpop.permute.xlu0 %367  ;;  %v2615_v30 = vsel %vm389_vm15, %v358_v15, %v374_v17  ;;  %vm4040_vm15 = vcmp.lt.s32.totalorder %v2360_v3, 7 }
 0x136   : > { %vm383_vm11 = vcmp.lt.s32.totalorder %v352_v24, %v368_v27  ;;  %v409_v31 = vsel %vm4039_vm4, %v395_v21, %v396_v16  ;;  %v400_v39 = vrot.slane %v2615_v30, 7  ;;  %v432_v40 = vrot.slane %v2615_v30, 1  ;;  %vm4042_vm6 = vmmov %vm4040_vm15 }
 0x137   : > { %v378_v22 = vpop.permute.xlu1 %377  ;;  %v384_v35 = vsel %vm383_vm11, %v352_v24, %v368_v27  ;;  %vm413_vm7 = vcmp.lt.s32.totalorder %v382_v12, %v409_v31  ;;  %v441_v41 = vsel %vm4040_vm15, %v427_v26, %v428_v29  ;;  %vm4044_vm11 = vmmov %vm4039_vm4 }
 0x138   : > { %vm393_vm13 = vcmp.lt.s32.totalorder %v362_v23, %v378_v22  ;;  %v397_v37 = vrot.slane %v384_v35, 7  ;;  %v429_v38 = vrot.slane %v384_v35, 1  ;;  %v414_v44 = vsel %vm413_vm7, %v382_v12, %v409_v31  ;;  %vm4045_vm7 = vmmov %vm4044_vm11 }
 0x139   : > { %v2621_v18 = vsel %vm393_vm13, %v362_v23, %v378_v22  ;;  %v372_v28 = vpop.permute.xlu0 %371 }
 0x13a   : > { %v402_v42 = vrot.slane %v2621_v18, 7  ;;  %v408_v43 = vsel %vm4041_vm12, %v396_v16, %v397_v37  ;;  %vm387_vm10 = vcmp.lt.s32.totalorder %v356_v25, %v372_v28  ;;  %v440_v46 = vsel %vm4042_vm6, %v428_v29, %v429_v38 }
 0x13b   : > { %vm415_vm9 = vcmp.lt.s32.totalorder %v384_v35, %v408_v43  ;;  %v388_v45 = vsel %vm387_vm10, %v356_v25, %v372_v28  ;;  %v407_v47 = vsel %vm4043_vm14, %v397_v37, %v398_v32  ;;  %vm445_vm8 = vcmp.lt.s32.totalorder %v414_v44, %v440_v46 }
 0x13c   : > { %v399_v48 = vrot.slane %v388_v45, 7  ;;  %v431_v49 = vrot.slane %v388_v45, 1  ;;  %v410_v50 = vsel %vm4044_vm11, %v402_v42, %v395_v21  ;;  %v446_v52 = vsel %vm445_vm8, %v414_v44, %v440_v46  ;;  %vm4048_vm8 = vmmov %vm4045_vm7 }
 0x13d   : > { %v376_v51 = vpop.permute.xlu0 %375  ;;  %vm411_vm4 = vcmp.lt.s32.totalorder %v2611_v20, %v410_v50  ;;  %vm417_vm13 = vcmp.lt.s32.totalorder %v386_v19, %v407_v47  ;;  %v416_v55 = vsel %vm415_vm9, %v384_v35, %v408_v43  ;;  %v2641_v7 = vsel %vm2374_vm1, %v446_v52, 258  ;;  %vm4046_vm9 = vmmov %vm4042_vm6 }
 0x13e   : > { %v406_v6 = vsel %vm4045_vm7, %v398_v32, %v399_v48  ;;  %vm391_vm15 = vcmp.lt.s32.totalorder %v360_v33, %v376_v51  ;;  %v412_v8 = vsel %vm411_vm4, %v2611_v20, %v410_v50  ;;  %469 = vrot.lane.b32.xlu1 %v2641_v7, %s2342_s10  ;;  %v418_v10 = vsel %vm417_vm13, %v386_v19, %v407_v47  ;;  %vm4047_vm14 = vmmov %vm4046_vm9 }
 0x13f   : > { %vm419_vm12 = vcmp.lt.s32.totalorder %v388_v45, %v406_v6  ;;  %v392_v9 = vsel %vm391_vm15, %v360_v33, %v376_v51  ;;  %vm443_vm10 = vcmp.lt.s32.totalorder %v412_v8, %v441_v41  ;;  %v438_v14 = vsel %vm4046_vm9, %v430_v36, %v431_v49  ;;  %vm4049_vm11 = vmmov %vm4045_vm7 }
 0x140   : > { %v401_v11 = vrot.slane %v392_v9, 7  ;;  %v433_v12 = vrot.slane %v392_v9, 1  ;;  %v444_v13 = vsel %vm443_vm10, %v412_v8, %v441_v41  ;;  %vm449_vm6 = vcmp.lt.s32.totalorder %v418_v10, %v438_v14  ;;  %vm4050_vm15 = vmmov %vm4046_vm9 }
 0x141   : > { %v2650_v15 = vsel %vm2370_vm0, %v444_v13, 258  ;;  %v439_v16 = vsel %vm4047_vm14, %v429_v38, %v430_v36  ;;  %v405_v17 = vsel %vm4048_vm8, %v399_v48, %v400_v39  ;;  %v450_v21 = vsel %vm449_vm6, %v418_v10, %v438_v14  ;;  %vm4051_vm10 = vmmov %vm4046_vm9 }
 0x142   : > { %v404_v19 = vsel %vm4049_vm11, %v400_v39, %v401_v11  ;;  %467 = vrot.lane.b32.xlu0 %v2650_v15, %s2342_s10  ;;  %vm447_vm4 = vcmp.lt.s32.totalorder %v416_v55, %v439_v16  ;;  %vm421_vm13 = vcmp.lt.s32.totalorder %v2615_v30, %v405_v17  ;;  %v434_v23 = vrot.slane %v2621_v18, 1  ;;  %vm4052_vm14 = vmmov %vm4051_vm10 }
 0x143   : > { %vm423_vm7 = vcmp.lt.s32.totalorder %v392_v9, %v404_v19  ;;  %v462_v24 = vsel %vm2382_vm3, %v450_v21, 258  ;;  %v448_v25 = vsel %vm447_vm4, %v416_v55, %v439_v16  ;;  %v422_v27 = vsel %vm421_vm13, %v2615_v30, %v405_v17  ;;  %vm4053_vm4 = vmmov %vm4051_vm10 }
 0x144   : > { %473 = vrot.lane.b32.xlu1 %v462_v24, %s2342_s10  ;;  %v436_v29 = vsel %vm4050_vm15, %v432_v40, %v433_v12  ;;  %v420_v31 = vsel %vm419_vm12, %v388_v45, %v406_v6  ;;  %v437_v32 = vsel %vm4051_vm10, %v431_v49, %v432_v40  ;;  %v461_v33 = vsel %vm2378_vm2, %v448_v25, 258 }
 0x145   : > { %vm453_vm9 = vcmp.lt.s32.totalorder %v422_v27, %v436_v29  ;;  %vm451_vm6 = vcmp.lt.s32.totalorder %v420_v31, %v437_v32  ;;  %v424_v22 = vsel %vm423_vm7, %v392_v9, %v404_v19  ;;  %v435_v30 = vsel %vm4052_vm14, %v433_v12, %v434_v23 }
 0x146   : > { %471 = vrot.lane.b32.xlu0 %v461_v33, %s2342_s10  ;;  %v454_v35 = vsel %vm453_vm9, %v422_v27, %v436_v29  ;;  %v452_v36 = vsel %vm451_vm6, %v420_v31, %v437_v32  ;;  %v403_v37 = vsel %vm4048_vm8, %v401_v11, %v402_v42  ;;  %vm455_vm12 = vcmp.lt.s32.totalorder %v424_v22, %v435_v30 }
 0x147   : > { %v464_v38 = vsel %vm4033_vm5, %v454_v35, 258  ;;  %vm425_vm11 = vcmp.lt.s32.totalorder %v2621_v18, %v403_v37  ;;  %v442_v40 = vsel %vm4053_vm4, %v434_v23, %v427_v26  ;;  %vm4054_vm13 = vnez %v4011_v57 }
 0x148   : > { %477 = vrot.lane.b32.xlu1 %v464_v38, %s2342_s10  ;;  %v426_v39 = vsel %vm425_vm11, %v2621_v18, %v403_v37  ;;  %v463_v28 = vsel %vm4054_vm13, %v452_v36, 258  ;;  %v456_v41 = vsel %vm455_vm12, %v424_v22, %v435_v30  ;;  %vm4055_vm15 = vnez %v4017_v60 }
 0x149   : > { %vm457_vm7 = vcmp.lt.s32.totalorder %v426_v39, %v442_v40  ;;  %vm4056_vm10 = vnez %v4015_v59 }
 0x14a   : > { %475 = vrot.lane.b32.xlu0 %v463_v28, %s2342_s10  ;;  %v458_v42 = vsel %vm457_vm7, %v426_v39, %v442_v40  ;;  %v465_v18 = vsel %vm4056_vm10, %v456_v41, 258 }
 0x14b   : > { %v466_v43 = vsel %vm4055_vm15, %v458_v42, 258 }
 0x14c   : > { %481 = vrot.lane.b32.xlu1 %v466_v43, %s2342_s10 }
 0x14e   : > { %479 = vrot.lane.b32.xlu0 %v465_v18, %s2342_s10 }
 0x150   : > { %501 = vrot.lane.b32.xlu1 %v2641_v7, %s2343_s11 }
 0x152   : > { %499 = vrot.lane.b32.xlu0 %v2650_v15, %s2343_s11 }
 0x154   : > { %505 = vrot.lane.b32.xlu1 %v462_v24, %s2343_s11 }
 0x156   : > { %503 = vrot.lane.b32.xlu0 %v461_v33, %s2343_s11 }
 0x158   : > { %509 = vrot.lane.b32.xlu1 %v464_v38, %s2343_s11 }
 0x15a   : > { %507 = vrot.lane.b32.xlu0 %v463_v28, %s2343_s11 }
 0x15c   : > { %513 = vrot.lane.b32.xlu1 %v466_v43, %s2343_s11 }
 0x15e   : > { %511 = vrot.lane.b32.xlu0 %v465_v18, %s2343_s11 }
 0x1b0   : > { %v470_v20 = vpop.permute.xlu1 %469 }
 0x1b1   : > { %vm485_vm9 = vcmp.lt.s32.totalorder %v2641_v7, %v470_v20 }
 0x1b2   : > { %v486_v50 = vsel %vm485_vm9, %v2641_v7, %v470_v20 }
 0x1b4   : > { %v468_v26 = vpop.permute.xlu0 %467 }
 0x1b5   : > { %vm483_vm6 = vcmp.lt.s32.totalorder %v2650_v15, %v468_v26 }
 0x1b6   : > { %v474_v44 = vpop.permute.xlu1 %473  ;;  %v484_v52 = vsel %vm483_vm6, %v2650_v15, %v468_v26 }
 0x1b7   : > { %vm489_vm14 = vcmp.lt.s32.totalorder %v462_v24, %v474_v44 }
 0x1b8   : > { %v472_v45 = vpop.permute.xlu0 %471  ;;  %v490_v9 = vsel %vm489_vm14, %v462_v24, %v474_v44 }
 0x1b9   : > { %vm487_vm12 = vcmp.lt.s32.totalorder %v461_v33, %v472_v45 }
 0x1ba   : > { %v478_v46 = vpop.permute.xlu1 %477  ;;  %v488_v12 = vsel %vm487_vm12, %v461_v33, %v472_v45 }
 0x1bb   : > { %vm493_vm7 = vcmp.lt.s32.totalorder %v464_v38, %v478_v46 }
 0x1bc   : > { %v476_v47 = vpop.permute.xlu0 %475  ;;  %v494_v19 = vsel %vm493_vm7, %v464_v38, %v478_v46 }
 0x1bd   : > { %vm491_vm4 = vcmp.lt.s32.totalorder %v463_v28, %v476_v47 }
 0x1be   : > { %v482_v48 = vpop.permute.xlu1 %481  ;;  %v492_v17 = vsel %vm491_vm4, %v463_v28, %v476_v47 }
 0x1bf   : > { %vm497_vm10 = vcmp.lt.s32.totalorder %v466_v43, %v482_v48 }
 0x1c0   : > { %v480_v49 = vpop.permute.xlu0 %479  ;;  %v498_v29 = vsel %vm497_vm10, %v466_v43, %v482_v48 }
 0x1c1   : > { %vm495_vm6 = vcmp.lt.s32.totalorder %v465_v18, %v480_v49 }
 0x1c2   : > { %v502_v51 = vpop.permute.xlu1 %501  ;;  %v496_v27 = vsel %vm495_vm6, %v465_v18, %v480_v49 }
 0x1c3   : > { %vm517_vm8 = vcmp.lt.s32.totalorder %v486_v50, %v502_v51 }
 0x1c4   : > { %v500_v55 = vpop.permute.xlu0 %499  ;;  %v2710_v6 = vsel %vm517_vm8, %v486_v50, %v502_v51  ;;  %vm4057_vm8 = vcmp.lt.s32.totalorder %v2360_v3, 1 }
 0x1c5   : > { %vm515_vm11 = vcmp.lt.s32.totalorder %v484_v52, %v500_v55  ;;  %v532_v8 = vrot.slane %v2710_v6, 7  ;;  %v564_v31 = vrot.slane %v2710_v6, 1 }
 0x1c6   : > { %v2713_v10 = vsel %vm515_vm11, %v484_v52, %v500_v55  ;;  %v506_v11 = vpop.permute.xlu1 %505  ;;  %vm4058_vm11 = vmmov %vm4057_vm8 }
 0x1c7   : > { %v531_v7 = vrot.slane %v2713_v10, 7  ;;  %vm521_vm9 = vcmp.lt.s32.totalorder %v490_v9, %v506_v11  ;;  %v563_v30 = vrot.slane %v2713_v10, 1 }
 0x1c8   : > { %v504_v13 = vpop.permute.xlu0 %503  ;;  %v2716_v14 = vsel %vm521_vm9, %v490_v9, %v506_v11  ;;  %vm4060_vm9 = vcmp.lt.s32.totalorder %v2360_v3, 7 }
 0x1c9   : > { %v545_v15 = vsel %vm4057_vm8, %v531_v7, %v532_v8  ;;  %vm519_vm13 = vcmp.lt.s32.totalorder %v488_v12, %v504_v13  ;;  %v534_v16 = vrot.slane %v2716_v14, 7  ;;  %v566_v42 = vrot.slane %v2716_v14, 1 }
 0x1ca   : > { %v2721_v21 = vsel %vm519_vm13, %v488_v12, %v504_v13  ;;  %v510_v23 = vpop.permute.xlu1 %509  ;;  %vm549_vm14 = vcmp.lt.s32.totalorder %v2710_v6, %v545_v15  ;;  %vm4059_vm13 = vmmov %vm4057_vm8 }
 0x1cb   : > { %v533_v24 = vrot.slane %v2721_v21, 7  ;;  %v565_v25 = vrot.slane %v2721_v21, 1  ;;  %vm525_vm12 = vcmp.lt.s32.totalorder %v494_v19, %v510_v23  ;;  %v550_v39 = vsel %vm549_vm14, %v2710_v6, %v545_v15 }
 0x1cc   : > { %v508_v32 = vpop.permute.xlu0 %507  ;;  %v2728_v33 = vsel %vm525_vm12, %v494_v19, %v510_v23  ;;  %vm4061_vm12 = vmmov %vm4058_vm11 }
 0x1cd   : > { %v544_v22 = vsel %vm4058_vm11, %v532_v8, %v533_v24  ;;  %v543_v35 = vsel %vm4059_vm13, %v533_v24, %v534_v16  ;;  %vm523_vm4 = vcmp.lt.s32.totalorder %v492_v17, %v508_v32  ;;  %v536_v36 = vrot.slane %v2728_v33, 7  ;;  %vm4062_vm14 = vmmov %vm4061_vm12 }
 0x1ce   : > { %vm553_vm7 = vcmp.lt.s32.totalorder %v2716_v14, %v543_v35  ;;  %v524_v37 = vsel %vm523_vm4, %v492_v17, %v508_v32  ;;  %v514_v38 = vpop.permute.xlu1 %513  ;;  %v576_v41 = vsel %vm4060_vm9, %v564_v31, %v565_v25  ;;  %vm551_vm6 = vcmp.lt.s32.totalorder %v2721_v21, %v544_v22  ;;  %vm4063_vm4 = vmmov %vm4060_vm9 }
 0x1cf   : > { %v535_v40 = vrot.slane %v524_v37, 7  ;;  %v567_v28 = vrot.slane %v524_v37, 1  ;;  %vm529_vm10 = vcmp.lt.s32.totalorder %v498_v29, %v514_v38  ;;  %vm581_vm8 = vcmp.lt.s32.totalorder %v550_v39, %v576_v41  ;;  %vm4064_vm9 = vmmov %vm4061_vm12 }
 0x1d0   : > { %v512_v43 = vpop.permute.xlu0 %511  ;;  %v530_v18 = vsel %vm529_vm10, %v498_v29, %v514_v38  ;;  %v568_v26 = vrot.slane %v2728_v33, 1  ;;  %v554_v47 = vsel %vm553_vm7, %v2716_v14, %v543_v35  ;;  %v582_v50 = vsel %vm581_vm8, %v550_v39, %v576_v41  ;;  %vm4066_vm7 = vmmov %vm4063_vm4 }
 0x1d1   : > { %v541_v20 = vsel %vm4061_vm12, %v535_v40, %v536_v36  ;;  %vm527_vm11 = vcmp.lt.s32.totalorder %v496_v27, %v512_v43  ;;  %v538_v44 = vrot.slane %v530_v18, 7  ;;  %v542_v45 = vsel %vm4062_vm14, %v534_v16, %v535_v40  ;;  %vm4065_vm12 = vmmov %vm4064_vm9 }
 0x1d2   : > { %vm557_vm13 = vcmp.lt.s32.totalorder %v2728_v33, %v541_v20  ;;  %v528_v46 = vsel %vm527_vm11, %v496_v27, %v512_v43  ;;  %v574_v51 = vsel %vm4063_vm4, %v566_v42, %v567_v28  ;;  %v570_v52 = vrot.slane %v530_v18, 1 }
 0x1d3   : > { %v537_v48 = vrot.slane %v528_v46, 7  ;;  %v569_v49 = vrot.slane %v528_v46, 1  ;;  %v2757_v55 = vsel %vm2374_vm1, %v582_v50, 258  ;;  %vm585_vm10 = vcmp.lt.s32.totalorder %v554_v47, %v574_v51 }
 0x1d4   : > { %v546_v6 = vsel %vm4064_vm9, %v538_v44, %v531_v7  ;;  %605 = vrot.lane.b32.xlu1 %v2757_v55, %s2342_s10  ;;  %v586_v9 = vsel %vm585_vm10, %v554_v47, %v574_v51  ;;  %v558_v11 = vsel %vm557_vm13, %v2728_v33, %v541_v20  ;;  %v552_v7 = vsel %vm551_vm6, %v2721_v21, %v544_v22  ;;  %vm4067_vm13 = vmmov %vm4064_vm9 }
 0x1d5   : > { %v539_v8 = vsel %vm4065_vm12, %v537_v48, %v538_v44  ;;  %v572_v12 = vsel %vm4066_vm7, %v568_v26, %v569_v49  ;;  %v2770_v13 = vsel %vm2382_vm3, %v586_v9, 258  ;;  %vm555_vm14 = vcmp.lt.s32.totalorder %v524_v37, %v542_v45  ;;  %vm4068_vm10 = vmmov %vm4066_vm7 }
 0x1d6   : > { %vm561_vm8 = vcmp.lt.s32.totalorder %v530_v18, %v539_v8  ;;  %vm589_vm11 = vcmp.lt.s32.totalorder %v558_v11, %v572_v12  ;;  %vm547_vm4 = vcmp.lt.s32.totalorder %v2713_v10, %v546_v6  ;;  %v540_v16 = vsel %vm4067_vm13, %v536_v36, %v537_v48  ;;  %vm4069_vm9 = vmmov %vm4066_vm7 }
 0x1d7   : > { %v590_v14 = vsel %vm589_vm11, %v558_v11, %v572_v12  ;;  %v562_v15 = vsel %vm561_vm8, %v530_v18, %v539_v8  ;;  %v548_v17 = vsel %vm547_vm4, %v2713_v10, %v546_v6  ;;  %v577_v19 = vsel %vm4068_vm10, %v563_v30, %v564_v31  ;;  %vm4070_vm12 = vmmov %vm4066_vm7 }
 0x1d8   : > { %v575_v23 = vsel %vm4069_vm9, %v565_v25, %v566_v42  ;;  %609 = vrot.lane.b32.xlu1 %v2770_v13, %s2342_s10  ;;  %vm579_vm6 = vcmp.lt.s32.totalorder %v548_v17, %v577_v19  ;;  %v578_v21 = vsel %vm4070_vm12, %v570_v52, %v563_v30  ;;  %v600_v24 = vsel %vm4033_vm5, %v590_v14, 258  ;;  %vm4071_vm4 = vmmov %vm4069_vm9 }
 0x1d9   : > { %vm583_vm7 = vcmp.lt.s32.totalorder %v552_v7, %v575_v23  ;;  %v580_v27 = vsel %vm579_vm6, %v548_v17, %v577_v19  ;;  %vm593_vm8 = vcmp.lt.s32.totalorder %v562_v15, %v578_v21  ;;  %v556_v10 = vsel %vm555_vm14, %v524_v37, %v542_v45  ;;  %vm4072_vm14 = vmmov %vm4071_vm4 }
 0x1da   : > { %vm559_vm11 = vcmp.lt.s32.totalorder %v528_v46, %v540_v16  ;;  %v595_v29 = vsel %vm2370_vm0, %v580_v27, 258  ;;  %v584_v25 = vsel %vm583_vm7, %v552_v7, %v575_v23  ;;  %v573_v31 = vsel %vm4071_vm4, %v567_v28, %v568_v26 }
 0x1db   : > { %603 = vrot.lane.b32.xlu0 %v595_v29, %s2342_s10  ;;  %v594_v32 = vsel %vm593_vm8, %v562_v15, %v578_v21  ;;  %vm587_vm13 = vcmp.lt.s32.totalorder %v556_v10, %v573_v31  ;;  %v560_v33 = vsel %vm559_vm11, %v528_v46, %v540_v16  ;;  %v597_v22 = vsel %vm2378_vm2, %v584_v25, 258 }
 0x1dc   : > { %613 = vrot.lane.b32.xlu1 %v600_v24, %s2342_s10  ;;  %v602_v35 = vsel %vm4055_vm15, %v594_v32, 258  ;;  %v588_v36 = vsel %vm587_vm13, %v556_v10, %v573_v31  ;;  %v571_v30 = vsel %vm4072_vm14, %v569_v49, %v570_v52  ;;  %vm4073_vm9 = vnez %v4011_v57 }
 0x1dd   : > { %vm591_vm10 = vcmp.lt.s32.totalorder %v560_v33, %v571_v30  ;;  %v599_v37 = vsel %vm4073_vm9, %v588_v36, 258  ;;  %vm4074_vm6 = vnez %v4015_v59 }
 0x1de   : > { %v592_v38 = vsel %vm591_vm10, %v560_v33, %v571_v30 }
 0x1df   : > { %607 = vrot.lane.b32.xlu0 %v597_v22, %s2342_s10  ;;  %v601_v39 = vsel %vm4074_vm6, %v592_v38, 258 }
 0x1e0   : > { %617 = vrot.lane.b32.xlu1 %v602_v35, %s2342_s10 }
 0x1e3   : > { %611 = vrot.lane.b32.xlu0 %v599_v37, %s2342_s10 }
 0x1e4   : > { %637 = vrot.lane.b32.xlu1 %v2757_v55, %s2343_s11 }
 0x1e7   : > { %615 = vrot.lane.b32.xlu0 %v601_v39, %s2342_s10 }
 0x1e8   : > { %641 = vrot.lane.b32.xlu1 %v2770_v13, %s2343_s11 }
 0x1eb   : > { %635 = vrot.lane.b32.xlu0 %v595_v29, %s2343_s11 }
 0x1ec   : > { %645 = vrot.lane.b32.xlu1 %v600_v24, %s2343_s11 }
 0x1ef   : > { %639 = vrot.lane.b32.xlu0 %v597_v22, %s2343_s11 }
 0x1f0   : > { %649 = vrot.lane.b32.xlu1 %v602_v35, %s2343_s11 }
 0x1f3   : > { %643 = vrot.lane.b32.xlu0 %v599_v37, %s2343_s11 }
 0x1f7   : > { %647 = vrot.lane.b32.xlu0 %v601_v39, %s2343_s11 }
 0x246   : > { %v606_v40 = vpop.permute.xlu1 %605 }
 0x247   : > { %vm621_vm12 = vcmp.lt.s32.totalorder %v2757_v55, %v606_v40 }
 0x248   : > { %v622_v44 = vsel %vm621_vm12, %v2757_v55, %v606_v40 }
 0x24a   : > { %v610_v28 = vpop.permute.xlu1 %609 }
 0x24b   : > { %vm625_vm7 = vcmp.lt.s32.totalorder %v2770_v13, %v610_v28 }
 0x24c   : > { %v626_v47 = vsel %vm625_vm7, %v2770_v13, %v610_v28 }
 0x24d   : > { %v604_v41 = vpop.permute.xlu0 %603 }
 0x24e   : > { %v614_v42 = vpop.permute.xlu1 %613  ;;  %vm619_vm8 = vcmp.lt.s32.totalorder %v595_v29, %v604_v41 }
 0x24f   : > { %vm629_vm4 = vcmp.lt.s32.totalorder %v600_v24, %v614_v42  ;;  %v620_v48 = vsel %vm619_vm8, %v595_v29, %v604_v41 }
 0x250   : > { %v630_v51 = vsel %vm629_vm4, %v600_v24, %v614_v42 }
 0x251   : > { %v608_v43 = vpop.permute.xlu0 %607 }
 0x252   : > { %v618_v18 = vpop.permute.xlu1 %617  ;;  %vm623_vm13 = vcmp.lt.s32.totalorder %v597_v22, %v608_v43 }
 0x253   : > { %vm633_vm10 = vcmp.lt.s32.totalorder %v602_v35, %v618_v18  ;;  %v624_v6 = vsel %vm623_vm13, %v597_v22, %v608_v43 }
 0x254   : > { %v634_v9 = vsel %vm633_vm10, %v602_v35, %v618_v18 }
 0x255   : > { %v612_v20 = vpop.permute.xlu0 %611 }
 0x256   : > { %v638_v26 = vpop.permute.xlu1 %637  ;;  %vm627_vm6 = vcmp.lt.s32.totalorder %v599_v37, %v612_v20 }
 0x257   : > { %vm653_vm11 = vcmp.lt.s32.totalorder %v622_v44, %v638_v26  ;;  %v628_v14 = vsel %vm627_vm6, %v599_v37, %v612_v20 }
 0x258   : > { %v654_v49 = vsel %vm653_vm11, %v622_v44, %v638_v26 }
 0x259   : > { %v616_v45 = vpop.permute.xlu0 %615  ;;  %v668_v11 = vrot.slane %v654_v49, 7  ;;  %v700_v7 = vrot.slane %v654_v49, 1 }
 0x25a   : > { %v642_v46 = vpop.permute.xlu1 %641  ;;  %vm631_vm15 = vcmp.lt.s32.totalorder %v601_v39, %v616_v45 }
 0x25b   : > { %vm657_vm14 = vcmp.lt.s32.totalorder %v626_v47, %v642_v46  ;;  %v632_v15 = vsel %vm631_vm15, %v601_v39, %v616_v45  ;;  %vm4076_vm15 = vcmp.lt.s32.totalorder %v2360_v3, 7 }
 0x25c   : > { %v2823_v55 = vsel %vm657_vm14, %v626_v47, %v642_v46  ;;  %vm4078_vm13 = vmmov %vm4076_vm15 }
 0x25d   : > { %v636_v50 = vpop.permute.xlu0 %635  ;;  %v670_v19 = vrot.slane %v2823_v55, 7  ;;  %v702_v23 = vrot.slane %v2823_v55, 1 }
 0x25e   : > { %v646_v52 = vpop.permute.xlu1 %645  ;;  %vm651_vm9 = vcmp.lt.s32.totalorder %v620_v48, %v636_v50 }
 0x25f   : > { %vm661_vm12 = vcmp.lt.s32.totalorder %v630_v51, %v646_v52  ;;  %v2825_v8 = vsel %vm651_vm9, %v620_v48, %v636_v50  ;;  %vm4075_vm9 = vcmp.lt.s32.totalorder %v2360_v3, 1 }
 0x260   : > { %v2827_v12 = vsel %vm661_vm12, %v630_v51, %v646_v52  ;;  %v667_v13 = vrot.slane %v2825_v8, 7  ;;  %v699_v16 = vrot.slane %v2825_v8, 1  ;;  %vm4077_vm6 = vmmov %vm4075_vm9 }
 0x261   : > { %v640_v17 = vpop.permute.xlu0 %639  ;;  %v672_v27 = vrot.slane %v2827_v12, 7  ;;  %v704_v29 = vrot.slane %v2827_v12, 1  ;;  %vm4079_vm14 = vmmov %vm4077_vm6 }
 0x262   : > { %v650_v21 = vpop.permute.xlu1 %649  ;;  %vm655_vm7 = vcmp.lt.s32.totalorder %v624_v6, %v640_v17  ;;  %v681_v24 = vsel %vm4075_vm9, %v667_v13, %v668_v11  ;;  %v713_v30 = vsel %vm4076_vm15, %v699_v16, %v700_v7 }
 0x263   : > { %vm665_vm8 = vcmp.lt.s32.totalorder %v634_v9, %v650_v21  ;;  %v656_v10 = vsel %vm655_vm7, %v624_v6, %v640_v17  ;;  %vm685_vm11 = vcmp.lt.s32.totalorder %v654_v49, %v681_v24  ;;  %vm4080_vm7 = vmmov %vm4077_vm6 }
 0x264   : > { %v2837_v25 = vsel %vm665_vm8, %v634_v9, %v650_v21  ;;  %v669_v31 = vrot.slane %v656_v10, 7  ;;  %v701_v32 = vrot.slane %v656_v10, 1  ;;  %v686_v36 = vsel %vm685_vm11, %v654_v49, %v681_v24  ;;  %vm4081_vm11 = vmmov %vm4077_vm6 }
 0x265   : > { %v674_v33 = vrot.slane %v2837_v25, 7  ;;  %v706_v22 = vrot.slane %v2837_v25, 1  ;;  %v644_v35 = vpop.permute.xlu0 %643 }
 0x266   : > { %v680_v37 = vsel %vm4077_vm6, %v668_v11, %v669_v31  ;;  %vm659_vm4 = vcmp.lt.s32.totalorder %v628_v14, %v644_v35  ;;  %v712_v38 = vsel %vm4078_vm13, %v700_v7, %v701_v32  ;;  %v679_v39 = vsel %vm4079_vm14, %v669_v31, %v670_v19 }
 0x267   : > { %vm687_vm10 = vcmp.lt.s32.totalorder %v656_v10, %v680_v37  ;;  %v660_v40 = vsel %vm659_vm4, %v628_v14, %v644_v35  ;;  %vm717_vm12 = vcmp.lt.s32.totalorder %v686_v36, %v712_v38  ;;  %v682_v28 = vsel %vm4080_vm7, %v674_v33, %v667_v13 }
 0x268   : > { %v671_v41 = vrot.slane %v660_v40, 7  ;;  %v703_v42 = vrot.slane %v660_v40, 1  ;;  %v718_v43 = vsel %vm717_vm12, %v686_v36, %v712_v38  ;;  %vm683_vm9 = vcmp.lt.s32.totalorder %v2825_v8, %v682_v28  ;;  %vm4083_vm12 = vmmov %vm4080_vm7 }
 0x269   : > { %v648_v18 = vpop.permute.xlu0 %647  ;;  %v2856_v20 = vsel %vm2374_vm1, %v718_v43, 258  ;;  %v684_v26 = vsel %vm683_vm9, %v2825_v8, %v682_v28  ;;  %vm689_vm8 = vcmp.lt.s32.totalorder %v2823_v55, %v679_v39  ;;  %v688_v44 = vsel %vm687_vm10, %v656_v10, %v680_v37  ;;  %vm4082_vm10 = vmmov %vm4078_vm13 }
 0x26a   : > { %v678_v45 = vsel %vm4081_vm11, %v670_v19, %v671_v41  ;;  %vm663_vm15 = vcmp.lt.s32.totalorder %v632_v15, %v648_v18  ;;  %741 = vrot.lane.b32.xlu1 %v2856_v20, %s2342_s10  ;;  %vm715_vm6 = vcmp.lt.s32.totalorder %v684_v26, %v713_v30  ;;  %v690_v46 = vsel %vm689_vm8, %v2823_v55, %v679_v39 }
 0x26b   : > { %vm691_vm4 = vcmp.lt.s32.totalorder %v660_v40, %v678_v45  ;;  %v664_v47 = vsel %vm663_vm15, %v632_v15, %v648_v18  ;;  %v716_v48 = vsel %vm715_vm6, %v684_v26, %v713_v30  ;;  %v710_v49 = vsel %vm4078_vm13, %v702_v23, %v703_v42  ;;  %vm4084_vm15 = vmmov %vm4082_vm10 }
 0x26c   : > { %v673_v50 = vrot.slane %v664_v47, 7  ;;  %v705_v51 = vrot.slane %v664_v47, 1  ;;  %v2869_v52 = vsel %vm2370_vm0, %v716_v48, 258  ;;  %vm721_vm14 = vcmp.lt.s32.totalorder %v690_v46, %v710_v49 }
 0x26d   : > { %739 = vrot.lane.b32.xlu0 %v2869_v52, %s2342_s10  ;;  %v722_v6 = vsel %vm721_vm14, %v690_v46, %v710_v49  ;;  %v711_v55 = vsel %vm4082_vm10, %v701_v32, %v702_v23  ;;  %v677_v9 = vsel %vm4083_vm12, %v671_v41, %v672_v27  ;;  %v692_v11 = vsel %vm691_vm4, %v660_v40, %v678_v45  ;;  %vm4085_vm4 = vmmov %vm4082_vm10 }
 0x26e   : > { %v676_v13 = vsel %vm4080_vm7, %v672_v27, %v673_v50  ;;  %v734_v7 = vsel %vm2382_vm3, %v722_v6, 258  ;;  %vm719_vm9 = vcmp.lt.s32.totalorder %v688_v44, %v711_v55  ;;  %vm693_vm8 = vcmp.lt.s32.totalorder %v2827_v12, %v677_v9  ;;  %vm4086_vm14 = vmmov %vm4085_vm4 }
 0x26f   : > { %vm695_vm11 = vcmp.lt.s32.totalorder %v664_v47, %v676_v13  ;;  %745 = vrot.lane.b32.xlu1 %v734_v7, %s2342_s10  ;;  %v720_v14 = vsel %vm719_vm9, %v688_v44, %v711_v55  ;;  %v694_v15 = vsel %vm693_vm8, %v2827_v12, %v677_v9  ;;  %v708_v17 = vsel %vm4084_vm15, %v704_v29, %v705_v51  ;;  %vm4087_vm10 = vmmov %vm4080_vm7 }
 0x270   : > { %v733_v19 = vsel %vm2378_vm2, %v720_v14, 258  ;;  %vm725_vm6 = vcmp.lt.s32.totalorder %v694_v15, %v708_v17  ;;  %v709_v23 = vsel %vm4085_vm4, %v703_v42, %v704_v29  ;;  %v696_v21 = vsel %vm695_vm11, %v664_v47, %v676_v13  ;;  %vm4088_vm9 = vmmov %vm4085_vm4 }
 0x271   : > { %743 = vrot.lane.b32.xlu0 %v733_v19, %s2342_s10  ;;  %v726_v24 = vsel %vm725_vm6, %v694_v15, %v708_v17  ;;  %vm723_vm13 = vcmp.lt.s32.totalorder %v692_v11, %v709_v23  ;;  %v707_v12 = vsel %vm4086_vm14, %v705_v51, %v706_v22  ;;  %v675_v27 = vsel %vm4087_vm10, %v673_v50, %v674_v33 }
 0x272   : > { %v736_v10 = vsel %vm4033_vm5, %v726_v24, 258  ;;  %v724_v31 = vsel %vm723_vm13, %v692_v11, %v709_v23  ;;  %vm727_vm12 = vcmp.lt.s32.totalorder %v696_v21, %v707_v12  ;;  %vm697_vm7 = vcmp.lt.s32.totalorder %v2837_v25, %v675_v27 }
 0x273   : > { %749 = vrot.lane.b32.xlu1 %v736_v10, %s2342_s10  ;;  %v698_v29 = vsel %vm697_vm7, %v2837_v25, %v675_v27  ;;  %v714_v32 = vsel %vm4088_vm9, %v706_v22, %v699_v16  ;;  %vm4089_vm8 = vnez %v4011_v57  ;;  %v728_v35 = vsel %vm727_vm12, %v696_v21, %v707_v12 }
 0x274   : > { %v735_v33 = vsel %vm4089_vm8, %v724_v31, 258  ;;  %vm729_vm11 = vcmp.lt.s32.totalorder %v698_v29, %v714_v32  ;;  %vm4090_vm15 = vnez %v4017_v60  ;;  %vm4091_vm6 = vnez %v4015_v59 }
 0x275   : > { %747 = vrot.lane.b32.xlu0 %v735_v33, %s2342_s10  ;;  %v730_v36 = vsel %vm729_vm11, %v698_v29, %v714_v32  ;;  %v737_v8 = vsel %vm4091_vm6, %v728_v35, 258 }
 0x276   : > { %v738_v30 = vsel %vm4090_vm15, %v730_v36, 258 }
 0x277   : > { %753 = vrot.lane.b32.xlu1 %v738_v30, %s2342_s10 }
 0x279   : > { %751 = vrot.lane.b32.xlu0 %v737_v8, %s2342_s10 }
 0x27b   : > { %773 = vrot.lane.b32.xlu1 %v2856_v20, %s2343_s11 }
 0x27d   : > { %771 = vrot.lane.b32.xlu0 %v2869_v52, %s2343_s11 }
 0x27f   : > { %777 = vrot.lane.b32.xlu1 %v734_v7, %s2343_s11 }
 0x281   : > { %775 = vrot.lane.b32.xlu0 %v733_v19, %s2343_s11 }
 0x283   : > { %781 = vrot.lane.b32.xlu1 %v736_v10, %s2343_s11 }
 0x285   : > { %779 = vrot.lane.b32.xlu0 %v735_v33, %s2343_s11 }
 0x287   : > { %785 = vrot.lane.b32.xlu1 %v738_v30, %s2343_s11 }
 0x289   : > { %783 = vrot.lane.b32.xlu0 %v737_v8, %s2343_s11 }
 0x2dc   : > { %v742_v16 = vpop.permute.xlu1 %741 }
 0x2dd   : > { %vm757_vm4 = vcmp.lt.s32.totalorder %v2856_v20, %v742_v16 }
 0x2de   : > { %v758_v41 = vsel %vm757_vm4, %v2856_v20, %v742_v16 }
 0x2df   : > { %v740_v25 = vpop.permute.xlu0 %739 }
 0x2e0   : > { %vm755_vm13 = vcmp.lt.s32.totalorder %v2869_v52, %v740_v25 }
 0x2e1   : > { %v746_v22 = vpop.permute.xlu1 %745  ;;  %v756_v43 = vsel %vm755_vm13, %v2869_v52, %v740_v25 }
 0x2e2   : > { %vm761_vm14 = vcmp.lt.s32.totalorder %v734_v7, %v746_v22 }
 0x2e3   : > { %v744_v37 = vpop.permute.xlu0 %743  ;;  %v762_v45 = vsel %vm761_vm14, %v734_v7, %v746_v22 }
 0x2e4   : > { %vm759_vm12 = vcmp.lt.s32.totalorder %v733_v19, %v744_v37 }
 0x2e5   : > { %v750_v38 = vpop.permute.xlu1 %749  ;;  %v760_v48 = vsel %vm759_vm12, %v733_v19, %v744_v37 }
 0x2e6   : > { %vm765_vm11 = vcmp.lt.s32.totalorder %v736_v10, %v750_v38 }
 0x2e7   : > { %v748_v39 = vpop.permute.xlu0 %747  ;;  %v766_v55 = vsel %vm765_vm11, %v736_v10, %v750_v38 }
 0x2e8   : > { %vm763_vm9 = vcmp.lt.s32.totalorder %v735_v33, %v748_v39 }
 0x2e9   : > { %v754_v40 = vpop.permute.xlu1 %753  ;;  %v764_v6 = vsel %vm763_vm9, %v735_v33, %v748_v39 }
 0x2ea   : > { %vm769_vm6 = vcmp.lt.s32.totalorder %v738_v30, %v754_v40 }
 0x2eb   : > { %v752_v28 = vpop.permute.xlu0 %751  ;;  %v770_v15 = vsel %vm769_vm6, %v738_v30, %v754_v40 }
 0x2ec   : > { %vm767_vm13 = vcmp.lt.s32.totalorder %v737_v8, %v752_v28 }
 0x2ed   : > { %v774_v42 = vpop.permute.xlu1 %773  ;;  %v768_v14 = vsel %vm767_vm13, %v737_v8, %v752_v28 }
 0x2ee   : > { %vm789_vm10 = vcmp.lt.s32.totalorder %v758_v41, %v774_v42 }
 0x2ef   : > { %v772_v18 = vpop.permute.xlu0 %771  ;;  %v2931_v26 = vsel %vm789_vm10, %v758_v41, %v774_v42  ;;  %vm4092_vm10 = vcmp.lt.s32.totalorder %v2360_v3, 1 }
 0x2f0   : > { %vm787_vm7 = vcmp.lt.s32.totalorder %v756_v43, %v772_v18  ;;  %v804_v44 = vrot.slane %v2931_v26, 7  ;;  %v836_v17 = vrot.slane %v2931_v26, 1 }
 0x2f1   : > { %v2934_v46 = vsel %vm787_vm7, %v756_v43, %v772_v18  ;;  %v778_v47 = vpop.permute.xlu1 %777  ;;  %vm4093_vm7 = vmmov %vm4092_vm10 }
 0x2f2   : > { %v803_v20 = vrot.slane %v2934_v46, 7  ;;  %vm793_vm4 = vcmp.lt.s32.totalorder %v762_v45, %v778_v47  ;;  %v835_v27 = vrot.slane %v2934_v46, 1 }
 0x2f3   : > { %v776_v49 = vpop.permute.xlu0 %775  ;;  %v2937_v50 = vsel %vm793_vm4, %v762_v45, %v778_v47  ;;  %vm4095_vm4 = vcmp.lt.s32.totalorder %v2360_v3, 7 }
 0x2f4   : > { %v817_v51 = vsel %vm4092_vm10, %v803_v20, %v804_v44  ;;  %vm791_vm8 = vcmp.lt.s32.totalorder %v760_v48, %v776_v49  ;;  %v806_v52 = vrot.slane %v2937_v50, 7  ;;  %v838_v36 = vrot.slane %v2937_v50, 1 }
 0x2f5   : > { %v2942_v9 = vsel %vm791_vm8, %v760_v48, %v776_v49  ;;  %v782_v11 = vpop.permute.xlu1 %781  ;;  %vm821_vm14 = vcmp.lt.s32.totalorder %v2931_v26, %v817_v51  ;;  %vm4094_vm8 = vmmov %vm4093_vm7 }
 0x2f6   : > { %v805_v13 = vrot.slane %v2942_v9, 7  ;;  %v837_v7 = vrot.slane %v2942_v9, 1  ;;  %vm797_vm12 = vcmp.lt.s32.totalorder %v766_v55, %v782_v11  ;;  %v822_v29 = vsel %vm821_vm14, %v2931_v26, %v817_v51  ;;  %vm4097_vm14 = vmmov %vm4094_vm8 }
 0x2f7   : > { %v780_v19 = vpop.permute.xlu0 %779  ;;  %v2949_v23 = vsel %vm797_vm12, %v766_v55, %v782_v11  ;;  %vm4096_vm12 = vmmov %vm4093_vm7 }
 0x2f8   : > { %v816_v21 = vsel %vm4093_vm7, %v804_v44, %v805_v13  ;;  %v815_v24 = vsel %vm4094_vm8, %v805_v13, %v806_v52  ;;  %vm795_vm9 = vcmp.lt.s32.totalorder %v764_v6, %v780_v19  ;;  %v808_v12 = vrot.slane %v2949_v23, 7 }
 0x2f9   : > { %vm825_vm11 = vcmp.lt.s32.totalorder %v2937_v50, %v815_v24  ;;  %v796_v10 = vsel %vm795_vm9, %v764_v6, %v780_v19  ;;  %v786_v31 = vpop.permute.xlu1 %785  ;;  %v848_v35 = vsel %vm4095_vm4, %v836_v17, %v837_v7  ;;  %vm823_vm13 = vcmp.lt.s32.totalorder %v2942_v9, %v816_v21  ;;  %vm4098_vm9 = vmmov %vm4095_vm4 }
 0x2fa   : > { %v807_v32 = vrot.slane %v796_v10, 7  ;;  %v839_v33 = vrot.slane %v796_v10, 1  ;;  %vm801_vm6 = vcmp.lt.s32.totalorder %v770_v15, %v786_v31  ;;  %vm853_vm10 = vcmp.lt.s32.totalorder %v822_v29, %v848_v35  ;;  %vm4099_vm4 = vmmov %vm4096_vm12 }
 0x2fb   : > { %v784_v30 = vpop.permute.xlu0 %783  ;;  %v802_v8 = vsel %vm801_vm6, %v770_v15, %v786_v31  ;;  %v840_v25 = vrot.slane %v2949_v23, 1  ;;  %v826_v39 = vsel %vm825_vm11, %v2937_v50, %v815_v24  ;;  %v854_v41 = vsel %vm853_vm10, %v822_v29, %v848_v35  ;;  %vm4101_vm11 = vmmov %vm4098_vm9 }
 0x2fc   : > { %v813_v16 = vsel %vm4096_vm12, %v807_v32, %v808_v12  ;;  %vm799_vm7 = vcmp.lt.s32.totalorder %v768_v14, %v784_v30  ;;  %v810_v22 = vrot.slane %v802_v8, 7  ;;  %v814_v37 = vsel %vm4097_vm14, %v806_v52, %v807_v32  ;;  %vm4100_vm12 = vmmov %vm4099_vm4 }
 0x2fd   : > { %vm829_vm8 = vcmp.lt.s32.totalorder %v2949_v23, %v813_v16  ;;  %v800_v38 = vsel %vm799_vm7, %v768_v14, %v784_v30  ;;  %v846_v42 = vsel %vm4098_vm9, %v838_v36, %v839_v33  ;;  %v842_v43 = vrot.slane %v802_v8, 1 }
 0x2fe   : > { %v809_v40 = vrot.slane %v800_v38, 7  ;;  %v841_v28 = vrot.slane %v800_v38, 1  ;;  %v2978_v18 = vsel %vm2374_vm1, %v854_v41, 258  ;;  %vm857_vm6 = vcmp.lt.s32.totalorder %v826_v39, %v846_v42 }
 0x2ff   : > { %v818_v26 = vsel %vm4099_vm4, %v810_v22, %v803_v20  ;;  %877 = vrot.lane.b32.xlu1 %v2978_v18, %s2342_s10  ;;  %v858_v45 = vsel %vm857_vm6, %v826_v39, %v846_v42  ;;  %v830_v47 = vsel %vm829_vm8, %v2949_v23, %v813_v16  ;;  %v824_v20 = vsel %vm823_vm13, %v2942_v9, %v816_v21  ;;  %vm4102_vm8 = vmmov %vm4099_vm4 }
 0x300   : > { %v811_v44 = vsel %vm4100_vm12, %v809_v40, %v810_v22  ;;  %v844_v48 = vsel %vm4101_vm11, %v840_v25, %v841_v28  ;;  %v2991_v49 = vsel %vm2382_vm3, %v858_v45, 258  ;;  %vm827_vm14 = vcmp.lt.s32.totalorder %v796_v10, %v814_v37  ;;  %vm4103_vm6 = vmmov %vm4101_vm11 }
 0x301   : > { %vm833_vm10 = vcmp.lt.s32.totalorder %v802_v8, %v811_v44  ;;  %vm861_vm7 = vcmp.lt.s32.totalorder %v830_v47, %v844_v48  ;;  %vm819_vm9 = vcmp.lt.s32.totalorder %v2934_v46, %v818_v26  ;;  %v812_v52 = vsel %vm4102_vm8, %v808_v12, %v809_v40  ;;  %vm4104_vm4 = vmmov %vm4103_vm6 }
 0x302   : > { %v862_v50 = vsel %vm861_vm7, %v830_v47, %v844_v48  ;;  %v834_v51 = vsel %vm833_vm10, %v802_v8, %v811_v44  ;;  %v820_v6 = vsel %vm819_vm9, %v2934_v46, %v818_v26  ;;  %v849_v55 = vsel %vm4103_vm6, %v835_v27, %v836_v17  ;;  %vm4105_vm12 = vmmov %vm4104_vm4 }
 0x303   : > { %v847_v11 = vsel %vm4104_vm4, %v837_v7, %v838_v36  ;;  %881 = vrot.lane.b32.xlu1 %v2991_v49, %s2342_s10  ;;  %vm851_vm13 = vcmp.lt.s32.totalorder %v820_v6, %v849_v55  ;;  %v850_v9 = vsel %vm4105_vm12, %v842_v43, %v835_v27  ;;  %v872_v13 = vsel %vm4033_vm5, %v862_v50, 258  ;;  %vm4106_vm9 = vmmov %vm4104_vm4 }
 0x304   : > { %vm855_vm11 = vcmp.lt.s32.totalorder %v824_v20, %v847_v11  ;;  %v852_v14 = vsel %vm851_vm13, %v820_v6, %v849_v55  ;;  %vm865_vm10 = vcmp.lt.s32.totalorder %v834_v51, %v850_v9  ;;  %v828_v46 = vsel %vm827_vm14, %v796_v10, %v814_v37  ;;  %vm4107_vm14 = vmmov %vm4104_vm4 }
 0x305   : > { %vm831_vm7 = vcmp.lt.s32.totalorder %v800_v38, %v812_v52  ;;  %v867_v15 = vsel %vm2370_vm0, %v852_v14, 258  ;;  %v856_v7 = vsel %vm855_vm11, %v824_v20, %v847_v11  ;;  %v845_v17 = vsel %vm4106_vm9, %v839_v33, %v840_v25 }
 0x306   : > { %875 = vrot.lane.b32.xlu0 %v867_v15, %s2342_s10  ;;  %v866_v19 = vsel %vm865_vm10, %v834_v51, %v850_v9  ;;  %vm859_vm8 = vcmp.lt.s32.totalorder %v828_v46, %v845_v17  ;;  %v832_v23 = vsel %vm831_vm7, %v800_v38, %v812_v52  ;;  %v869_v21 = vsel %vm2378_vm2, %v856_v7, 258 }
 0x307   : > { %885 = vrot.lane.b32.xlu1 %v872_v13, %s2342_s10  ;;  %v874_v24 = vsel %vm4090_vm15, %v866_v19, 258  ;;  %v860_v12 = vsel %vm859_vm8, %v828_v46, %v845_v17  ;;  %v843_v27 = vsel %vm4107_vm14, %v841_v28, %v842_v43  ;;  %vm4108_vm4 = vnez %v4011_v57 }
 0x308   : > { %vm863_vm6 = vcmp.lt.s32.totalorder %v832_v23, %v843_v27  ;;  %v871_v10 = vsel %vm4108_vm4, %v860_v12, 258  ;;  %vm4109_vm13 = vnez %v4015_v59 }
 0x309   : > { %v864_v31 = vsel %vm863_vm6, %v832_v23, %v843_v27 }
 0x30a   : > { %879 = vrot.lane.b32.xlu0 %v869_v21, %s2342_s10  ;;  %v873_v29 = vsel %vm4109_vm13, %v864_v31, 258 }
 0x30b   : > { %889 = vrot.lane.b32.xlu1 %v874_v24, %s2342_s10 }
 0x30e   : > { %883 = vrot.lane.b32.xlu0 %v871_v10, %s2342_s10 }
 0x30f   : > { %909 = vrot.lane.b32.xlu1 %v2978_v18, %s2343_s11 }
 0x312   : > { %887 = vrot.lane.b32.xlu0 %v873_v29, %s2342_s10 }
 0x313   : > { %913 = vrot.lane.b32.xlu1 %v2991_v49, %s2343_s11 }
 0x316   : > { %907 = vrot.lane.b32.xlu0 %v867_v15, %s2343_s11 }
 0x317   : > { %917 = vrot.lane.b32.xlu1 %v872_v13, %s2343_s11 }
 0x31a   : > { %911 = vrot.lane.b32.xlu0 %v869_v21, %s2343_s11 }
 0x31b   : > { %921 = vrot.lane.b32.xlu1 %v874_v24, %s2343_s11 }
 0x31e   : > { %915 = vrot.lane.b32.xlu0 %v871_v10, %s2343_s11 }
 0x322   : > { %919 = vrot.lane.b32.xlu0 %v873_v29, %s2343_s11 }
 0x371   : > { %v878_v32 = vpop.permute.xlu1 %877 }
 0x372   : > { %vm893_vm12 = vcmp.lt.s32.totalorder %v2978_v18, %v878_v32 }
 0x373   : > { %v894_v22 = vsel %vm893_vm12, %v2978_v18, %v878_v32 }
 0x375   : > { %v882_v33 = vpop.permute.xlu1 %881 }
 0x376   : > { %vm897_vm11 = vcmp.lt.s32.totalorder %v2991_v49, %v882_v33 }
 0x377   : > { %v898_v39 = vsel %vm897_vm11, %v2991_v49, %v882_v33 }
 0x378   : > { %v876_v35 = vpop.permute.xlu0 %875 }
 0x379   : > { %v886_v36 = vpop.permute.xlu1 %885  ;;  %vm891_vm10 = vcmp.lt.s32.totalorder %v867_v15, %v876_v35 }
 0x37a   : > { %vm901_vm9 = vcmp.lt.s32.totalorder %v872_v13, %v886_v36  ;;  %v892_v40 = vsel %vm891_vm10, %v867_v15, %v876_v35 }
 0x37b   : > { %v902_v42 = vsel %vm901_vm9, %v872_v13, %v886_v36 }
 0x37c   : > { %v880_v30 = vpop.permute.xlu0 %879 }
 0x37d   : > { %v890_v8 = vpop.permute.xlu1 %889  ;;  %vm895_vm8 = vcmp.lt.s32.totalorder %v869_v21, %v880_v30 }
 0x37e   : > { %vm905_vm6 = vcmp.lt.s32.totalorder %v874_v24, %v890_v8  ;;  %v896_v26 = vsel %vm895_vm8, %v869_v21, %v880_v30 }
 0x37f   : > { %v906_v45 = vsel %vm905_vm6, %v874_v24, %v890_v8 }
 0x380   : > { %v884_v16 = vpop.permute.xlu0 %883 }
 0x381   : > { %v910_v25 = vpop.permute.xlu1 %909  ;;  %vm899_vm13 = vcmp.lt.s32.totalorder %v871_v10, %v884_v16 }
 0x382   : > { %vm925_vm7 = vcmp.lt.s32.totalorder %v894_v22, %v910_v25  ;;  %v900_v50 = vsel %vm899_vm13, %v871_v10, %v884_v16 }
 0x383   : > { %v926_v28 = vsel %vm925_vm7, %v894_v22, %v910_v25 }
 0x384   : > { %v888_v37 = vpop.permute.xlu0 %887  ;;  %v940_v47 = vrot.slane %v926_v28, 7  ;;  %v972_v20 = vrot.slane %v926_v28, 1 }
 0x385   : > { %v914_v38 = vpop.permute.xlu1 %913  ;;  %vm903_vm15 = vcmp.lt.s32.totalorder %v873_v29, %v888_v37 }
 0x386   : > { %vm929_vm14 = vcmp.lt.s32.totalorder %v898_v39, %v914_v38  ;;  %v904_v51 = vsel %vm903_vm15, %v873_v29, %v888_v37  ;;  %vm4111_vm15 = vcmp.lt.s32.totalorder %v2360_v3, 7 }
 0x387   : > { %v3044_v18 = vsel %vm929_vm14, %v898_v39, %v914_v38  ;;  %vm4113_vm8 = vmmov %vm4111_vm15 }
 0x388   : > { %v908_v41 = vpop.permute.xlu0 %907  ;;  %v942_v55 = vrot.slane %v3044_v18, 7  ;;  %v974_v11 = vrot.slane %v3044_v18, 1 }
 0x389   : > { %v918_v43 = vpop.permute.xlu1 %917  ;;  %vm923_vm4 = vcmp.lt.s32.totalorder %v892_v40, %v908_v41 }
 0x38a   : > { %vm933_vm12 = vcmp.lt.s32.totalorder %v902_v42, %v918_v43  ;;  %v3046_v44 = vsel %vm923_vm4, %v892_v40, %v908_v41  ;;  %vm4110_vm4 = vcmp.lt.s32.totalorder %v2360_v3, 1 }
 0x38b   : > { %v3048_v48 = vsel %vm933_vm12, %v902_v42, %v918_v43  ;;  %v939_v49 = vrot.slane %v3046_v44, 7  ;;  %v971_v52 = vrot.slane %v3046_v44, 1  ;;  %vm4112_vm13 = vmmov %vm4110_vm4 }
 0x38c   : > { %v912_v6 = vpop.permute.xlu0 %911  ;;  %v944_v14 = vrot.slane %v3048_v48, 7  ;;  %v976_v15 = vrot.slane %v3048_v48, 1  ;;  %vm4114_vm14 = vmmov %vm4110_vm4 }
 0x38d   : > { %v922_v9 = vpop.permute.xlu1 %921  ;;  %vm927_vm11 = vcmp.lt.s32.totalorder %v896_v26, %v912_v6  ;;  %v953_v13 = vsel %vm4110_vm4, %v939_v49, %v940_v47  ;;  %v985_v27 = vsel %vm4111_vm15, %v971_v52, %v972_v20 }
 0x38e   : > { %vm937_vm10 = vcmp.lt.s32.totalorder %v906_v45, %v922_v9  ;;  %v928_v46 = vsel %vm927_vm11, %v896_v26, %v912_v6  ;;  %vm957_vm7 = vcmp.lt.s32.totalorder %v926_v28, %v953_v13  ;;  %vm4115_vm11 = vmmov %vm4110_vm4 }
 0x38f   : > { %v3058_v7 = vsel %vm937_vm10, %v906_v45, %v922_v9  ;;  %v941_v17 = vrot.slane %v928_v46, 7  ;;  %v973_v19 = vrot.slane %v928_v46, 1  ;;  %v958_v12 = vsel %vm957_vm7, %v926_v28, %v953_v13  ;;  %vm4116_vm7 = vmmov %vm4115_vm11 }
 0x390   : > { %v946_v23 = vrot.slane %v3058_v7, 7  ;;  %v978_v21 = vrot.slane %v3058_v7, 1  ;;  %v916_v24 = vpop.permute.xlu0 %915 }
 0x391   : > { %v952_v10 = vsel %vm4112_vm13, %v940_v47, %v941_v17  ;;  %vm931_vm9 = vcmp.lt.s32.totalorder %v900_v50, %v916_v24  ;;  %v984_v31 = vsel %vm4113_vm8, %v972_v20, %v973_v19  ;;  %v951_v29 = vsel %vm4114_vm14, %v941_v17, %v942_v55 }
 0x392   : > { %vm959_vm6 = vcmp.lt.s32.totalorder %v928_v46, %v952_v10  ;;  %v932_v32 = vsel %vm931_vm9, %v900_v50, %v916_v24  ;;  %vm989_vm12 = vcmp.lt.s32.totalorder %v958_v12, %v984_v31  ;;  %v954_v33 = vsel %vm4115_vm11, %v946_v23, %v939_v49  ;;  %vm4119_vm11 = vmmov %vm4116_vm7 }
 0x393   : > { %v943_v35 = vrot.slane %v932_v32, 7  ;;  %v975_v36 = vrot.slane %v932_v32, 1  ;;  %v990_v30 = vsel %vm989_vm12, %v958_v12, %v984_v31  ;;  %vm955_vm4 = vcmp.lt.s32.totalorder %v3046_v44, %v954_v33  ;;  %vm4118_vm12 = vmmov %vm4116_vm7 }
 0x394   : > { %v920_v8 = vpop.permute.xlu0 %919  ;;  %v3077_v16 = vsel %vm2374_vm1, %v990_v30, 258  ;;  %v956_v25 = vsel %vm955_vm4, %v3046_v44, %v954_v33  ;;  %vm961_vm10 = vcmp.lt.s32.totalorder %v3044_v18, %v951_v29  ;;  %v960_v22 = vsel %vm959_vm6, %v928_v46, %v952_v10  ;;  %vm4117_vm6 = vmmov %vm4113_vm8 }
 0x395   : > { %v950_v37 = vsel %vm4116_vm7, %v942_v55, %v943_v35  ;;  %vm935_vm15 = vcmp.lt.s32.totalorder %v904_v51, %v920_v8  ;;  %1013 = vrot.lane.b32.xlu1 %v3077_v16, %s2342_s10  ;;  %vm987_vm13 = vcmp.lt.s32.totalorder %v956_v25, %v985_v27  ;;  %v962_v38 = vsel %vm961_vm10, %v3044_v18, %v951_v29 }
 0x396   : > { %vm963_vm9 = vcmp.lt.s32.totalorder %v932_v32, %v950_v37  ;;  %v936_v39 = vsel %vm935_vm15, %v904_v51, %v920_v8  ;;  %v988_v40 = vsel %vm987_vm13, %v956_v25, %v985_v27  ;;  %v982_v28 = vsel %vm4113_vm8, %v974_v11, %v975_v36  ;;  %vm4120_vm15 = vmmov %vm4117_vm6 }
 0x397   : > { %v945_v41 = vrot.slane %v936_v39, 7  ;;  %v977_v42 = vrot.slane %v936_v39, 1  ;;  %v3090_v43 = vsel %vm2370_vm0, %v988_v40, 258  ;;  %vm993_vm14 = vcmp.lt.s32.totalorder %v962_v38, %v982_v28 }
 0x398   : > { %1011 = vrot.lane.b32.xlu0 %v3090_v43, %s2342_s10  ;;  %v994_v26 = vsel %vm993_vm14, %v962_v38, %v982_v28  ;;  %v983_v18 = vsel %vm4117_vm6, %v973_v19, %v974_v11  ;;  %v949_v45 = vsel %vm4118_vm12, %v943_v35, %v944_v14  ;;  %v964_v47 = vsel %vm963_vm9, %v932_v32, %v950_v37  ;;  %vm4121_vm9 = vmmov %vm4117_vm6 }
 0x399   : > { %v948_v49 = vsel %vm4119_vm11, %v944_v14, %v945_v41  ;;  %v1006_v20 = vsel %vm2382_vm3, %v994_v26, 258  ;;  %vm991_vm4 = vcmp.lt.s32.totalorder %v960_v22, %v983_v18  ;;  %vm965_vm10 = vcmp.lt.s32.totalorder %v3048_v48, %v949_v45  ;;  %vm4122_vm14 = vmmov %vm4117_vm6 }
 0x39a   : > { %vm967_vm7 = vcmp.lt.s32.totalorder %v936_v39, %v948_v49  ;;  %1017 = vrot.lane.b32.xlu1 %v1006_v20, %s2342_s10  ;;  %v992_v50 = vsel %vm991_vm4, %v960_v22, %v983_v18  ;;  %v966_v51 = vsel %vm965_vm10, %v3048_v48, %v949_v45  ;;  %v980_v6 = vsel %vm4120_vm15, %v976_v15, %v977_v42  ;;  %vm4123_vm6 = vmmov %vm4119_vm11 }
 0x39b   : > { %v1005_v55 = vsel %vm2378_vm2, %v992_v50, 258  ;;  %vm997_vm13 = vcmp.lt.s32.totalorder %v966_v51, %v980_v6  ;;  %v981_v11 = vsel %vm4121_vm9, %v975_v36, %v976_v15  ;;  %v968_v9 = vsel %vm967_vm7, %v936_v39, %v948_v49  ;;  %vm4124_vm4 = vmmov %vm4121_vm9 }
 0x39c   : > { %1015 = vrot.lane.b32.xlu0 %v1005_v55, %s2342_s10  ;;  %v998_v13 = vsel %vm997_vm13, %v966_v51, %v980_v6  ;;  %vm995_vm8 = vcmp.lt.s32.totalorder %v964_v47, %v981_v11  ;;  %v979_v48 = vsel %vm4122_vm14, %v977_v42, %v978_v21  ;;  %v947_v14 = vsel %vm4123_vm6, %v945_v41, %v946_v23 }
 0x39d   : > { %v1008_v46 = vsel %vm4033_vm5, %v998_v13, 258  ;;  %v996_v17 = vsel %vm995_vm8, %v964_v47, %v981_v11  ;;  %vm999_vm12 = vcmp.lt.s32.totalorder %v968_v9, %v979_v48  ;;  %vm969_vm11 = vcmp.lt.s32.totalorder %v3058_v7, %v947_v14 }
 0x39e   : > { %1021 = vrot.lane.b32.xlu1 %v1008_v46, %s2342_s10  ;;  %v970_v15 = vsel %vm969_vm11, %v3058_v7, %v947_v14  ;;  %v986_v19 = vsel %vm4124_vm4, %v978_v21, %v971_v52  ;;  %vm4125_vm10 = vnez %v4011_v57  ;;  %v1000_v24 = vsel %vm999_vm12, %v968_v9, %v979_v48 }
 0x39f   : > { %v1007_v23 = vsel %vm4125_vm10, %v996_v17, 258  ;;  %vm1001_vm7 = vcmp.lt.s32.totalorder %v970_v15, %v986_v19  ;;  %vm4126_vm15 = vnez %v4017_v60  ;;  %vm4127_vm13 = vnez %v4015_v59 }
 0x3a0   : > { %1019 = vrot.lane.b32.xlu0 %v1007_v23, %s2342_s10  ;;  %v1002_v12 = vsel %vm1001_vm7, %v970_v15, %v986_v19  ;;  %v1009_v44 = vsel %vm4127_vm13, %v1000_v24, 258 }
 0x3a1   : > { %v1010_v27 = vsel %vm4126_vm15, %v1002_v12, 258 }
 0x3a2   : > { %1025 = vrot.lane.b32.xlu1 %v1010_v27, %s2342_s10 }
 0x3a4   : > { %1023 = vrot.lane.b32.xlu0 %v1009_v44, %s2342_s10 }
 0x3a6   : > { %1045 = vrot.lane.b32.xlu1 %v3077_v16, %s2343_s11 }
 0x3a8   : > { %1043 = vrot.lane.b32.xlu0 %v3090_v43, %s2343_s11 }
 0x3aa   : > { %1049 = vrot.lane.b32.xlu1 %v1006_v20, %s2343_s11 }
 0x3ac   : > { %1047 = vrot.lane.b32.xlu0 %v1005_v55, %s2343_s11 }
 0x3ae   : > { %1053 = vrot.lane.b32.xlu1 %v1008_v46, %s2343_s11 }
 0x3b0   : > { %1051 = vrot.lane.b32.xlu0 %v1007_v23, %s2343_s11 }
 0x3b2   : > { %1057 = vrot.lane.b32.xlu1 %v1010_v27, %s2343_s11 }
 0x3b4   : > { %1055 = vrot.lane.b32.xlu0 %v1009_v44, %s2343_s11 }
 0x407   : > { %v1014_v52 = vpop.permute.xlu1 %1013 }
 0x408   : > { %vm1029_vm9 = vcmp.lt.s32.totalorder %v3077_v16, %v1014_v52 }
 0x409   : > { %v1030_v35 = vsel %vm1029_vm9, %v3077_v16, %v1014_v52 }
 0x40a   : > { %v1012_v7 = vpop.permute.xlu0 %1011 }
 0x40b   : > { %vm1027_vm8 = vcmp.lt.s32.totalorder %v3090_v43, %v1012_v7 }
 0x40c   : > { %v1018_v21 = vpop.permute.xlu1 %1017  ;;  %v1028_v30 = vsel %vm1027_vm8, %v3090_v43, %v1012_v7 }
 0x40d   : > { %vm1033_vm14 = vcmp.lt.s32.totalorder %v1006_v20, %v1018_v21 }
 0x40e   : > { %v1016_v10 = vpop.permute.xlu0 %1015  ;;  %v1034_v37 = vsel %vm1033_vm14, %v1006_v20, %v1018_v21 }
 0x40f   : > { %vm1031_vm12 = vcmp.lt.s32.totalorder %v1005_v55, %v1016_v10 }
 0x410   : > { %v1022_v31 = vpop.permute.xlu1 %1021  ;;  %v1032_v40 = vsel %vm1031_vm12, %v1005_v55, %v1016_v10 }
 0x411   : > { %vm1037_vm7 = vcmp.lt.s32.totalorder %v1008_v46, %v1022_v31 }
 0x412   : > { %v1020_v29 = vpop.permute.xlu0 %1019  ;;  %v1038_v18 = vsel %vm1037_vm7, %v1008_v46, %v1022_v31 }
 0x413   : > { %vm1035_vm4 = vcmp.lt.s32.totalorder %v1007_v23, %v1020_v29 }
 0x414   : > { %v1026_v32 = vpop.permute.xlu1 %1025  ;;  %v1036_v26 = vsel %vm1035_vm4, %v1007_v23, %v1020_v29 }
 0x415   : > { %vm1041_vm13 = vcmp.lt.s32.totalorder %v1010_v27, %v1026_v32 }
 0x416   : > { %v1024_v33 = vpop.permute.xlu0 %1023  ;;  %v1042_v51 = vsel %vm1041_vm13, %v1010_v27, %v1026_v32 }
 0x417   : > { %vm1039_vm8 = vcmp.lt.s32.totalorder %v1009_v44, %v1024_v33 }
 0x418   : > { %v1046_v36 = vpop.permute.xlu1 %1045  ;;  %v1040_v50 = vsel %vm1039_vm8, %v1009_v44, %v1024_v33 }
 0x419   : > { %vm1061_vm6 = vcmp.lt.s32.totalorder %v1030_v35, %v1046_v36 }
 0x41a   : > { %v1044_v8 = vpop.permute.xlu0 %1043  ;;  %v3152_v25 = vsel %vm1061_vm6, %v1030_v35, %v1046_v36  ;;  %vm4128_vm6 = vcmp.lt.s32.totalorder %v2360_v3, 1 }
 0x41b   : > { %vm1059_vm11 = vcmp.lt.s32.totalorder %v1028_v30, %v1044_v8  ;;  %v1076_v22 = vrot.slane %v3152_v25, 7  ;;  %v1108_v6 = vrot.slane %v3152_v25, 1 }
 0x41c   : > { %v3155_v38 = vsel %vm1059_vm11, %v1028_v30, %v1044_v8  ;;  %v1050_v39 = vpop.permute.xlu1 %1049  ;;  %vm4129_vm11 = vmmov %vm4128_vm6 }
 0x41d   : > { %v1075_v16 = vrot.slane %v3155_v38, 7  ;;  %vm1065_vm9 = vcmp.lt.s32.totalorder %v1034_v37, %v1050_v39  ;;  %v1107_v14 = vrot.slane %v3155_v38, 1 }
 0x41e   : > { %v1048_v28 = vpop.permute.xlu0 %1047  ;;  %v3158_v41 = vsel %vm1065_vm9, %v1034_v37, %v1050_v39  ;;  %vm4131_vm9 = vcmp.lt.s32.totalorder %v2360_v3, 7 }
 0x41f   : > { %v1089_v42 = vsel %vm4128_vm6, %v1075_v16, %v1076_v22  ;;  %vm1063_vm10 = vcmp.lt.s32.totalorder %v1032_v40, %v1048_v28  ;;  %v1078_v43 = vrot.slane %v3158_v41, 7  ;;  %v1110_v12 = vrot.slane %v3158_v41, 1 }
 0x420   : > { %v3163_v45 = vsel %vm1063_vm10, %v1032_v40, %v1048_v28  ;;  %v1054_v47 = vpop.permute.xlu1 %1053  ;;  %vm1093_vm14 = vcmp.lt.s32.totalorder %v3152_v25, %v1089_v42  ;;  %vm4130_vm10 = vmmov %vm4128_vm6 }
 0x421   : > { %v1077_v49 = vrot.slane %v3163_v45, 7  ;;  %v1109_v20 = vrot.slane %v3163_v45, 1  ;;  %vm1069_vm12 = vcmp.lt.s32.totalorder %v1038_v18, %v1054_v47  ;;  %v1094_v15 = vsel %vm1093_vm14, %v3152_v25, %v1089_v42  ;;  %vm4133_vm14 = vmmov %vm4130_vm10 }
 0x422   : > { %v1052_v55 = vpop.permute.xlu0 %1051  ;;  %v3170_v11 = vsel %vm1069_vm12, %v1038_v18, %v1054_v47  ;;  %vm4132_vm12 = vmmov %vm4130_vm10 }
 0x423   : > { %v1088_v9 = vsel %vm4129_vm11, %v1076_v22, %v1077_v49  ;;  %v1087_v13 = vsel %vm4130_vm10, %v1077_v49, %v1078_v43  ;;  %vm1067_vm4 = vcmp.lt.s32.totalorder %v1036_v26, %v1052_v55  ;;  %v1080_v48 = vrot.slane %v3170_v11, 7 }
 0x424   : > { %vm1097_vm7 = vcmp.lt.s32.totalorder %v3158_v41, %v1087_v13  ;;  %v1068_v46 = vsel %vm1067_vm4, %v1036_v26, %v1052_v55  ;;  %v1058_v17 = vpop.permute.xlu1 %1057  ;;  %v1120_v24 = vsel %vm4131_vm9, %v1108_v6, %v1109_v20  ;;  %vm1095_vm8 = vcmp.lt.s32.totalorder %v3163_v45, %v1088_v9  ;;  %vm4134_vm4 = vmmov %vm4131_vm9 }
 0x425   : > { %v1079_v19 = vrot.slane %v1068_v46, 7  ;;  %v1111_v23 = vrot.slane %v1068_v46, 1  ;;  %vm1073_vm13 = vcmp.lt.s32.totalorder %v1042_v51, %v1058_v17  ;;  %vm1125_vm6 = vcmp.lt.s32.totalorder %v1094_v15, %v1120_v24  ;;  %vm4135_vm9 = vmmov %vm4132_vm12 }
 0x426   : > { %v1056_v27 = vpop.permute.xlu0 %1055  ;;  %v1074_v44 = vsel %vm1073_vm13, %v1042_v51, %v1058_v17  ;;  %v1112_v7 = vrot.slane %v3170_v11, 1  ;;  %v1098_v29 = vsel %vm1097_vm7, %v3158_v41, %v1087_v13  ;;  %v1126_v35 = vsel %vm1125_vm6, %v1094_v15, %v1120_v24  ;;  %vm4137_vm7 = vmmov %vm4134_vm4 }
 0x427   : > { %v1085_v52 = vsel %vm4132_vm12, %v1079_v19, %v1080_v48  ;;  %vm1071_vm11 = vcmp.lt.s32.totalorder %v1040_v50, %v1056_v27  ;;  %v1082_v21 = vrot.slane %v1074_v44, 7  ;;  %v1086_v10 = vsel %vm4133_vm14, %v1078_v43, %v1079_v19  ;;  %vm4136_vm12 = vmmov %vm4135_vm9 }
 0x428   : > { %vm1101_vm10 = vcmp.lt.s32.totalorder %v3170_v11, %v1085_v52  ;;  %v1072_v31 = vsel %vm1071_vm11, %v1040_v50, %v1056_v27  ;;  %v1118_v36 = vsel %vm4134_vm4, %v1110_v12, %v1111_v23  ;;  %v1114_v30 = vrot.slane %v1074_v44, 1 }
 0x429   : > { %v1081_v32 = vrot.slane %v1072_v31, 7  ;;  %v1113_v33 = vrot.slane %v1072_v31, 1  ;;  %v3199_v8 = vsel %vm2374_vm1, %v1126_v35, 258  ;;  %vm1129_vm13 = vcmp.lt.s32.totalorder %v1098_v29, %v1118_v36 }
 0x42a   : > { %v1090_v25 = vsel %vm4135_vm9, %v1082_v21, %v1075_v16  ;;  %1149 = vrot.lane.b32.xlu1 %v3199_v8, %s2342_s10  ;;  %v1130_v37 = vsel %vm1129_vm13, %v1098_v29, %v1118_v36  ;;  %v1102_v39 = vsel %vm1101_vm10, %v3170_v11, %v1085_v52  ;;  %v1096_v16 = vsel %vm1095_vm8, %v3163_v45, %v1088_v9  ;;  %vm4138_vm10 = vmmov %vm4135_vm9 }
 0x42b   : > { %v1083_v22 = vsel %vm4136_vm12, %v1081_v32, %v1082_v21  ;;  %v1116_v40 = vsel %vm4137_vm7, %v1112_v7, %v1113_v33  ;;  %v3212_v28 = vsel %vm2382_vm3, %v1130_v37, 258  ;;  %vm1099_vm14 = vcmp.lt.s32.totalorder %v1068_v46, %v1086_v10  ;;  %vm4139_vm13 = vmmov %vm4137_vm7 }
 0x42c   : > { %vm1105_vm6 = vcmp.lt.s32.totalorder %v1074_v44, %v1083_v22  ;;  %vm1133_vm11 = vcmp.lt.s32.totalorder %v1102_v39, %v1116_v40  ;;  %vm1091_vm4 = vcmp.lt.s32.totalorder %v3155_v38, %v1090_v25  ;;  %v1084_v43 = vsel %vm4138_vm10, %v1080_v48, %v1081_v32  ;;  %vm4140_vm9 = vmmov %vm4137_vm7 }
 0x42d   : > { %v1134_v41 = vsel %vm1133_vm11, %v1102_v39, %v1116_v40  ;;  %v1106_v42 = vsel %vm1105_vm6, %v1074_v44, %v1083_v22  ;;  %v1092_v26 = vsel %vm1091_vm4, %v3155_v38, %v1090_v25  ;;  %v1121_v18 = vsel %vm4139_vm13, %v1107_v14, %v1108_v6  ;;  %vm4141_vm12 = vmmov %vm4137_vm7 }
 0x42e   : > { %v1119_v47 = vsel %vm4140_vm9, %v1109_v20, %v1110_v12  ;;  %1153 = vrot.lane.b32.xlu1 %v3212_v28, %s2342_s10  ;;  %vm1123_vm8 = vcmp.lt.s32.totalorder %v1092_v26, %v1121_v18  ;;  %v1122_v45 = vsel %vm4141_vm12, %v1114_v30, %v1107_v14  ;;  %v1144_v49 = vsel %vm4033_vm5, %v1134_v41, 258  ;;  %vm4142_vm4 = vmmov %vm4140_vm9 }
 0x42f   : > { %vm1127_vm7 = vcmp.lt.s32.totalorder %v1096_v16, %v1119_v47  ;;  %v1124_v50 = vsel %vm1123_vm8, %v1092_v26, %v1121_v18  ;;  %vm1137_vm6 = vcmp.lt.s32.totalorder %v1106_v42, %v1122_v45  ;;  %v1100_v38 = vsel %vm1099_vm14, %v1068_v46, %v1086_v10  ;;  %vm4143_vm14 = vmmov %vm4142_vm4 }
 0x430   : > { %vm1103_vm11 = vcmp.lt.s32.totalorder %v1072_v31, %v1084_v43  ;;  %v1139_v51 = vsel %vm2370_vm0, %v1124_v50, 258  ;;  %v1128_v20 = vsel %vm1127_vm7, %v1096_v16, %v1119_v47  ;;  %v1117_v6 = vsel %vm4142_vm4, %v1111_v23, %v1112_v7 }
 0x431   : > { %1147 = vrot.lane.b32.xlu0 %v1139_v51, %s2342_s10  ;;  %v1138_v55 = vsel %vm1137_vm6, %v1106_v42, %v1122_v45  ;;  %vm1131_vm10 = vcmp.lt.s32.totalorder %v1100_v38, %v1117_v6  ;;  %v1104_v11 = vsel %vm1103_vm11, %v1072_v31, %v1084_v43  ;;  %v1141_v9 = vsel %vm2378_vm2, %v1128_v20, 258 }
 0x432   : > { %1157 = vrot.lane.b32.xlu1 %v1144_v49, %s2342_s10  ;;  %v1146_v13 = vsel %vm4126_vm15, %v1138_v55, 258  ;;  %v1132_v48 = vsel %vm1131_vm10, %v1100_v38, %v1117_v6  ;;  %v1115_v14 = vsel %vm4143_vm14, %v1113_v33, %v1114_v30  ;;  %vm4144_vm9 = vnez %v4011_v57 }
 0x433   : > { %vm1135_vm13 = vcmp.lt.s32.totalorder %v1104_v11, %v1115_v14  ;;  %v1143_v46 = vsel %vm4144_vm9, %v1132_v48, 258  ;;  %vm4145_vm8 = vnez %v4015_v59 }
 0x434   : > { %v1136_v17 = vsel %vm1135_vm13, %v1104_v11, %v1115_v14 }
 0x435   : > { %1151 = vrot.lane.b32.xlu0 %v1141_v9, %s2342_s10  ;;  %v1145_v15 = vsel %vm4145_vm8, %v1136_v17, 258 }
 0x436   : > { %1161 = vrot.lane.b32.xlu1 %v1146_v13, %s2342_s10 }
 0x439   : > { %1155 = vrot.lane.b32.xlu0 %v1143_v46, %s2342_s10 }
 0x43a   : > { %1181 = vrot.lane.b32.xlu1 %v3199_v8, %s2343_s11 }
 0x43d   : > { %1159 = vrot.lane.b32.xlu0 %v1145_v15, %s2342_s10 }
 0x43e   : > { %1185 = vrot.lane.b32.xlu1 %v3212_v28, %s2343_s11 }
 0x441   : > { %1179 = vrot.lane.b32.xlu0 %v1139_v51, %s2343_s11 }
 0x442   : > { %1189 = vrot.lane.b32.xlu1 %v1144_v49, %s2343_s11 }
 0x445   : > { %1183 = vrot.lane.b32.xlu0 %v1141_v9, %s2343_s11 }
 0x446   : > { %1193 = vrot.lane.b32.xlu1 %v1146_v13, %s2343_s11 }
 0x449   : > { %1187 = vrot.lane.b32.xlu0 %v1143_v46, %s2343_s11 }
 0x44d   : > { %1191 = vrot.lane.b32.xlu0 %v1145_v15, %s2343_s11 }
 0x49c   : > { %v1150_v19 = vpop.permute.xlu1 %1149 }
 0x49d   : > { %vm1165_vm12 = vcmp.lt.s32.totalorder %v3199_v8, %v1150_v19 }
 0x49e   : > { %v1166_v21 = vsel %vm1165_vm12, %v3199_v8, %v1150_v19 }
 0x4a0   : > { %v1154_v23 = vpop.permute.xlu1 %1153 }
 0x4a1   : > { %vm1169_vm7 = vcmp.lt.s32.totalorder %v3212_v28, %v1154_v23 }
 0x4a2   : > { %v1170_v29 = vsel %vm1169_vm7, %v3212_v28, %v1154_v23 }
 0x4a3   : > { %v1148_v24 = vpop.permute.xlu0 %1147 }
 0x4a4   : > { %v1158_v12 = vpop.permute.xlu1 %1157  ;;  %vm1163_vm6 = vcmp.lt.s32.totalorder %v1139_v51, %v1148_v24 }
 0x4a5   : > { %vm1173_vm4 = vcmp.lt.s32.totalorder %v1144_v49, %v1158_v12  ;;  %v1164_v32 = vsel %vm1163_vm6, %v1139_v51, %v1148_v24 }
 0x4a6   : > { %v1174_v36 = vsel %vm1173_vm4, %v1144_v49, %v1158_v12 }
 0x4a7   : > { %v1152_v27 = vpop.permute.xlu0 %1151 }
 0x4a8   : > { %v1162_v44 = vpop.permute.xlu1 %1161  ;;  %vm1167_vm10 = vcmp.lt.s32.totalorder %v1141_v9, %v1152_v27 }
 0x4a9   : > { %vm1177_vm13 = vcmp.lt.s32.totalorder %v1146_v13, %v1162_v44  ;;  %v1168_v25 = vsel %vm1167_vm10, %v1141_v9, %v1152_v27 }
 0x4aa   : > { %v1178_v37 = vsel %vm1177_vm13, %v1146_v13, %v1162_v44 }
 0x4ab   : > { %v1156_v52 = vpop.permute.xlu0 %1155 }
 0x4ac   : > { %v1182_v7 = vpop.permute.xlu1 %1181  ;;  %vm1171_vm8 = vcmp.lt.s32.totalorder %v1143_v46, %v1156_v52 }
 0x4ad   : > { %vm1197_vm11 = vcmp.lt.s32.totalorder %v1166_v21, %v1182_v7  ;;  %v1172_v41 = vsel %vm1171_vm8, %v1143_v46, %v1156_v52 }
 0x4ae   : > { %v1198_v33 = vsel %vm1197_vm11, %v1166_v21, %v1182_v7 }
 0x4af   : > { %v1160_v10 = vpop.permute.xlu0 %1159  ;;  %v1212_v39 = vrot.slane %v1198_v33, 7  ;;  %v1244_v16 = vrot.slane %v1198_v33, 1 }
 0x4b0   : > { %v1186_v31 = vpop.permute.xlu1 %1185  ;;  %vm1175_vm15 = vcmp.lt.s32.totalorder %v1145_v15, %v1160_v10 }
 0x4b1   : > { %vm1201_vm14 = vcmp.lt.s32.totalorder %v1170_v29, %v1186_v31  ;;  %v1176_v42 = vsel %vm1175_vm15, %v1145_v15, %v1160_v10  ;;  %vm4147_vm15 = vcmp.lt.s32.totalorder %v2360_v3, 7 }
 0x4b2   : > { %v3265_v8 = vsel %vm1201_vm14, %v1170_v29, %v1186_v31  ;;  %vm4149_vm10 = vmmov %vm4147_vm15 }
 0x4b3   : > { %v1180_v35 = vpop.permute.xlu0 %1179  ;;  %v1214_v18 = vrot.slane %v3265_v8, 7  ;;  %v1246_v47 = vrot.slane %v3265_v8, 1 }
 0x4b4   : > { %v1190_v30 = vpop.permute.xlu1 %1189  ;;  %vm1195_vm9 = vcmp.lt.s32.totalorder %v1164_v32, %v1180_v35 }
 0x4b5   : > { %vm1205_vm12 = vcmp.lt.s32.totalorder %v1174_v36, %v1190_v30  ;;  %v3267_v22 = vsel %vm1195_vm9, %v1164_v32, %v1180_v35  ;;  %vm4146_vm9 = vcmp.lt.s32.totalorder %v2360_v3, 1 }
 0x4b6   : > { %v3269_v40 = vsel %vm1205_vm12, %v1174_v36, %v1190_v30  ;;  %v1211_v28 = vrot.slane %v3267_v22, 7  ;;  %v1243_v43 = vrot.slane %v3267_v22, 1  ;;  %vm4148_vm8 = vmmov %vm4146_vm9 }
 0x4b7   : > { %v1184_v26 = vpop.permute.xlu0 %1183  ;;  %v1216_v50 = vrot.slane %v3269_v40, 7  ;;  %v1248_v51 = vrot.slane %v3269_v40, 1  ;;  %vm4150_vm14 = vmmov %vm4148_vm8 }
 0x4b8   : > { %v1194_v45 = vpop.permute.xlu1 %1193  ;;  %vm1199_vm7 = vcmp.lt.s32.totalorder %v1168_v25, %v1184_v26  ;;  %v1225_v49 = vsel %vm4146_vm9, %v1211_v28, %v1212_v39  ;;  %v1257_v14 = vsel %vm4147_vm15, %v1243_v43, %v1244_v16 }
 0x4b9   : > { %vm1209_vm6 = vcmp.lt.s32.totalorder %v1178_v37, %v1194_v45  ;;  %v1200_v38 = vsel %vm1199_vm7, %v1168_v25, %v1184_v26  ;;  %vm1229_vm11 = vcmp.lt.s32.totalorder %v1198_v33, %v1225_v49  ;;  %vm4151_vm7 = vmmov %vm4148_vm8 }
 0x4ba   : > { %v3279_v20 = vsel %vm1209_vm6, %v1178_v37, %v1194_v45  ;;  %v1213_v6 = vrot.slane %v1200_v38, 7  ;;  %v1245_v55 = vrot.slane %v1200_v38, 1  ;;  %v1230_v48 = vsel %vm1229_vm11, %v1198_v33, %v1225_v49  ;;  %vm4152_vm11 = vmmov %vm4151_vm7 }
 0x4bb   : > { %v1218_v11 = vrot.slane %v3279_v20, 7  ;;  %v1250_v9 = vrot.slane %v3279_v20, 1  ;;  %v1188_v13 = vpop.permute.xlu0 %1187 }
 0x4bc   : > { %v1224_v46 = vsel %vm4148_vm8, %v1212_v39, %v1213_v6  ;;  %vm1203_vm4 = vcmp.lt.s32.totalorder %v1172_v41, %v1188_v13  ;;  %v1256_v17 = vsel %vm4149_vm10, %v1244_v16, %v1245_v55  ;;  %v1223_v15 = vsel %vm4150_vm14, %v1213_v6, %v1214_v18 }
 0x4bd   : > { %vm1231_vm13 = vcmp.lt.s32.totalorder %v1200_v38, %v1224_v46  ;;  %v1204_v19 = vsel %vm1203_vm4, %v1172_v41, %v1188_v13  ;;  %vm1261_vm12 = vcmp.lt.s32.totalorder %v1230_v48, %v1256_v17  ;;  %v1226_v23 = vsel %vm4151_vm7, %v1218_v11, %v1211_v28 }
 0x4be   : > { %v1215_v24 = vrot.slane %v1204_v19, 7  ;;  %v1247_v12 = vrot.slane %v1204_v19, 1  ;;  %v1262_v27 = vsel %vm1261_vm12, %v1230_v48, %v1256_v17  ;;  %vm1227_vm9 = vcmp.lt.s32.totalorder %v3267_v22, %v1226_v23  ;;  %vm4154_vm12 = vmmov %vm4151_vm7 }
 0x4bf   : > { %v1192_v44 = vpop.permute.xlu0 %1191  ;;  %v3298_v52 = vsel %vm2374_vm1, %v1262_v27, 258  ;;  %v1228_v7 = vsel %vm1227_vm9, %v3267_v22, %v1226_v23  ;;  %vm1233_vm6 = vcmp.lt.s32.totalorder %v3265_v8, %v1223_v15  ;;  %v1232_v21 = vsel %vm1231_vm13, %v1200_v38, %v1224_v46  ;;  %vm4153_vm13 = vmmov %vm4149_vm10 }
 0x4c0   : > { %v1222_v10 = vsel %vm4152_vm11, %v1214_v18, %v1215_v24  ;;  %vm1207_vm15 = vcmp.lt.s32.totalorder %v1176_v42, %v1192_v44  ;;  %1285 = vrot.lane.b32.xlu1 %v3298_v52, %s2342_s10  ;;  %vm1259_vm8 = vcmp.lt.s32.totalorder %v1228_v7, %v1257_v14  ;;  %v1234_v31 = vsel %vm1233_vm6, %v3265_v8, %v1223_v15 }
 0x4c1   : > { %vm1235_vm4 = vcmp.lt.s32.totalorder %v1204_v19, %v1222_v10  ;;  %v1208_v29 = vsel %vm1207_vm15, %v1176_v42, %v1192_v44  ;;  %v1260_v32 = vsel %vm1259_vm8, %v1228_v7, %v1257_v14  ;;  %v1254_v33 = vsel %vm4149_vm10, %v1246_v47, %v1247_v12  ;;  %vm4155_vm15 = vmmov %vm4149_vm10 }
 0x4c2   : > { %v1217_v35 = vrot.slane %v1208_v29, 7  ;;  %v1249_v36 = vrot.slane %v1208_v29, 1  ;;  %v3311_v30 = vsel %vm2370_vm0, %v1260_v32, 258  ;;  %vm1265_vm14 = vcmp.lt.s32.totalorder %v1234_v31, %v1254_v33 }
 0x4c3   : > { %1283 = vrot.lane.b32.xlu0 %v3311_v30, %s2342_s10  ;;  %v1266_v25 = vsel %vm1265_vm14, %v1234_v31, %v1254_v33  ;;  %v1255_v8 = vsel %vm4153_vm13, %v1245_v55, %v1246_v47  ;;  %v1221_v37 = vsel %vm4154_vm12, %v1215_v24, %v1216_v50  ;;  %v1236_v39 = vsel %vm1235_vm4, %v1204_v19, %v1222_v10  ;;  %vm4156_vm4 = vmmov %vm4149_vm10 }
 0x4c4   : > { %v1220_v28 = vsel %vm4151_vm7, %v1216_v50, %v1217_v35  ;;  %v1278_v16 = vsel %vm2382_vm3, %v1266_v25, 258  ;;  %vm1263_vm9 = vcmp.lt.s32.totalorder %v1232_v21, %v1255_v8  ;;  %vm1237_vm6 = vcmp.lt.s32.totalorder %v3269_v40, %v1221_v37  ;;  %vm4157_vm14 = vmmov %vm4156_vm4 }
 0x4c5   : > { %vm1239_vm11 = vcmp.lt.s32.totalorder %v1208_v29, %v1220_v28  ;;  %1289 = vrot.lane.b32.xlu1 %v1278_v16, %s2342_s10  ;;  %v1264_v41 = vsel %vm1263_vm9, %v1232_v21, %v1255_v8  ;;  %v1238_v42 = vsel %vm1237_vm6, %v3269_v40, %v1221_v37  ;;  %v1252_v26 = vsel %vm4155_vm15, %v1248_v51, %v1249_v36  ;;  %vm4158_vm13 = vmmov %vm4151_vm7 }
 0x4c6   : > { %v1277_v18 = vsel %vm2378_vm2, %v1264_v41, 258  ;;  %vm1269_vm8 = vcmp.lt.s32.totalorder %v1238_v42, %v1252_v26  ;;  %v1253_v47 = vsel %vm4156_vm4, %v1247_v12, %v1248_v51  ;;  %v1240_v45 = vsel %vm1239_vm11, %v1208_v29, %v1220_v28  ;;  %vm4159_vm9 = vmmov %vm4156_vm4 }
 0x4c7   : > { %1287 = vrot.lane.b32.xlu0 %v1277_v18, %s2342_s10  ;;  %v1270_v49 = vsel %vm1269_vm8, %v1238_v42, %v1252_v26  ;;  %vm1267_vm10 = vcmp.lt.s32.totalorder %v1236_v39, %v1253_v47  ;;  %v1251_v40 = vsel %vm4157_vm14, %v1249_v36, %v1250_v9  ;;  %v1219_v50 = vsel %vm4158_vm13, %v1217_v35, %v1218_v11 }
 0x4c8   : > { %v1280_v38 = vsel %vm4033_vm5, %v1270_v49, 258  ;;  %v1268_v6 = vsel %vm1267_vm10, %v1236_v39, %v1253_v47  ;;  %vm1271_vm12 = vcmp.lt.s32.totalorder %v1240_v45, %v1251_v40  ;;  %vm1241_vm7 = vcmp.lt.s32.totalorder %v3279_v20, %v1219_v50 }
 0x4c9   : > { %1293 = vrot.lane.b32.xlu1 %v1280_v38, %s2342_s10  ;;  %v1242_v51 = vsel %vm1241_vm7, %v3279_v20, %v1219_v50  ;;  %v1258_v55 = vsel %vm4159_vm9, %v1250_v9, %v1243_v43  ;;  %vm4160_vm6 = vnez %v4011_v57  ;;  %v1272_v13 = vsel %vm1271_vm12, %v1240_v45, %v1251_v40 }
 0x4ca   : > { %v1279_v11 = vsel %vm4160_vm6, %v1268_v6, 258  ;;  %vm1273_vm11 = vcmp.lt.s32.totalorder %v1242_v51, %v1258_v55  ;;  %vm4161_vm15 = vnez %v4017_v60  ;;  %vm4162_vm8 = vnez %v4015_v59 }
 0x4cb   : > { %1291 = vrot.lane.b32.xlu0 %v1279_v11, %s2342_s10  ;;  %v1274_v48 = vsel %vm1273_vm11, %v1242_v51, %v1258_v55  ;;  %v1281_v22 = vsel %vm4162_vm8, %v1272_v13, 258 }
 0x4cc   : > { %v3355_v14 = vsel %vm4161_vm15, %v1274_v48, 258 }
 0x4cd   : > { %1297 = vrot.lane.b32.xlu1 %v3355_v14, %s2342_s10 }
 0x4cf   : > { %1295 = vrot.lane.b32.xlu0 %v1281_v22, %s2342_s10 }
 0x4d1   : > { %1317 = vrot.lane.b32.xlu1 %v3298_v52, %s2343_s11 }
 0x4d3   : > { %1315 = vrot.lane.b32.xlu0 %v3311_v30, %s2343_s11 }
 0x4d5   : > { %1321 = vrot.lane.b32.xlu1 %v1278_v16, %s2343_s11 }
 0x4d7   : > { %1319 = vrot.lane.b32.xlu0 %v1277_v18, %s2343_s11 }
 0x4d9   : > { %1325 = vrot.lane.b32.xlu1 %v1280_v38, %s2343_s11 }
 0x4db   : > { %1323 = vrot.lane.b32.xlu0 %v1279_v11, %s2343_s11 }
 0x4dd   : > { %1329 = vrot.lane.b32.xlu1 %v3355_v14, %s2343_s11 }
 0x4df   : > { %1327 = vrot.lane.b32.xlu0 %v1281_v22, %s2343_s11 }
 0x532   : > { %v1286_v43 = vpop.permute.xlu1 %1285 }
 0x533   : > { %vm1301_vm4 = vcmp.lt.s32.totalorder %v3298_v52, %v1286_v43 }
 0x534   : > { %v1302_v24 = vsel %vm1301_vm4, %v3298_v52, %v1286_v43 }
 0x535   : > { %v1284_v20 = vpop.permute.xlu0 %1283 }
 0x536   : > { %vm1299_vm10 = vcmp.lt.s32.totalorder %v3311_v30, %v1284_v20 }
 0x537   : > { %v1290_v9 = vpop.permute.xlu1 %1289  ;;  %v1300_v27 = vsel %vm1299_vm10, %v3311_v30, %v1284_v20 }
 0x538   : > { %vm1305_vm14 = vcmp.lt.s32.totalorder %v1278_v16, %v1290_v9 }
 0x539   : > { %v1288_v46 = vpop.permute.xlu0 %1287  ;;  %v1306_v21 = vsel %vm1305_vm14, %v1278_v16, %v1290_v9 }
 0x53a   : > { %vm1303_vm12 = vcmp.lt.s32.totalorder %v1277_v18, %v1288_v46 }
 0x53b   : > { %v1294_v17 = vpop.permute.xlu1 %1293  ;;  %v1304_v29 = vsel %vm1303_vm12, %v1277_v18, %v1288_v46  ;;  %vm4163_vm12 = vcmp.lt.s32.totalorder %v2360_v3, 1 }
 0x53c   : > { %vm1309_vm11 = vcmp.lt.s32.totalorder %v1280_v38, %v1294_v17 }
 0x53d   : > { %v1292_v15 = vpop.permute.xlu0 %1291  ;;  %v1310_v25 = vsel %vm1309_vm11, %v1280_v38, %v1294_v17 }
 0x53e   : > { %vm1307_vm9 = vcmp.lt.s32.totalorder %v1279_v11, %v1292_v15 }
 0x53f   : > { %v1298_v19 = vpop.permute.xlu1 %1297  ;;  %v1308_v30 = vsel %vm1307_vm9, %v1279_v11, %v1292_v15 }
 0x540   : > { %vm1313_vm14 = vcmp.lt.s32.totalorder %v3355_v14, %v1298_v19 }
 0x541   : > { %v1296_v23 = vpop.permute.xlu0 %1295  ;;  %v1314_v40 = vsel %vm1313_vm14, %v3355_v14, %v1298_v19 }
 0x542   : > { %vm1311_vm10 = vcmp.lt.s32.totalorder %v1281_v22, %v1296_v23 }
 0x543   : > { %v1318_v12 = vpop.permute.xlu1 %1317  ;;  %v1312_v49 = vsel %vm1311_vm10, %v1281_v22, %v1296_v23  ;;  %vm4166_vm10 = vcmp.lt.s32.totalorder %v2360_v3, 7 }
 0x544   : > { %vm1333_vm13 = vcmp.lt.s32.totalorder %v1302_v24, %v1318_v12 }
 0x545   : > { %v1316_v44 = vpop.permute.xlu0 %1315  ;;  %v1334_v7 = vsel %vm1333_vm13, %v1302_v24, %v1318_v12 }
 0x546   : > { %vm1331_vm7 = vcmp.lt.s32.totalorder %v1300_v27, %v1316_v44  ;;  %v1348_v52 = vrot.slane %v1334_v7, 7  ;;  %v1380_v41 = vrot.slane %v1334_v7, 1 }
 0x547   : > { %v3377_v10 = vsel %vm1331_vm7, %v1300_v27, %v1316_v44  ;;  %v1322_v31 = vpop.permute.xlu1 %1321 }
 0x548   : > { %vm1337_vm8 = vcmp.lt.s32.totalorder %v1306_v21, %v1322_v31  ;;  %v1347_v32 = vrot.slane %v3377_v10, 7  ;;  %v1379_v28 = vrot.slane %v3377_v10, 1 }
 0x549   : > { %v1320_v33 = vpop.permute.xlu0 %1319  ;;  %v3380_v35 = vsel %vm1337_vm8, %v1306_v21, %v1322_v31  ;;  %vm4164_vm8 = vmmov %vm4163_vm12 }
 0x54a   : > { %vm1335_vm4 = vcmp.lt.s32.totalorder %v1304_v29, %v1320_v33  ;;  %v1350_v36 = vrot.slane %v3380_v35, 7  ;;  %v1361_v16 = vsel %vm4163_vm12, %v1347_v32, %v1348_v52  ;;  %vm4165_vm11 = vmmov %vm4164_vm8  ;;  %v1382_v51 = vrot.slane %v3380_v35, 1 }
 0x54b   : > { %v1336_v8 = vsel %vm1335_vm4, %v1304_v29, %v1320_v33  ;;  %v1326_v37 = vpop.permute.xlu1 %1325  ;;  %vm1365_vm9 = vcmp.lt.s32.totalorder %v1334_v7, %v1361_v16  ;;  %v1393_v48 = vsel %vm4166_vm10, %v1379_v28, %v1380_v41  ;;  %vm4167_vm14 = vmmov %vm4164_vm8 }
 0x54c   : > { %v1349_v39 = vrot.slane %v1336_v8, 7  ;;  %vm1341_vm13 = vcmp.lt.s32.totalorder %v1310_v25, %v1326_v37  ;;  %v1381_v18 = vrot.slane %v1336_v8, 1  ;;  %v1366_v20 = vsel %vm1365_vm9, %v1334_v7, %v1361_v16  ;;  %vm4170_vm9 = vmmov %vm4165_vm11 }
 0x54d   : > { %v1324_v42 = vpop.permute.xlu0 %1323  ;;  %v3387_v26 = vsel %vm1341_vm13, %v1310_v25, %v1326_v37 }
 0x54e   : > { %v1359_v47 = vsel %vm4164_vm8, %v1349_v39, %v1350_v36  ;;  %vm1339_vm7 = vcmp.lt.s32.totalorder %v1308_v30, %v1324_v42  ;;  %v1352_v45 = vrot.slane %v3387_v26, 7  ;;  %v1360_v6 = vsel %vm4165_vm11, %v1348_v52, %v1349_v39  ;;  %vm4168_vm8 = vmmov %vm4166_vm10 }
 0x54f   : > { %v1340_v50 = vsel %vm1339_vm7, %v1308_v30, %v1324_v42  ;;  %v1330_v38 = vpop.permute.xlu1 %1329  ;;  %vm1369_vm4 = vcmp.lt.s32.totalorder %v3380_v35, %v1359_v47  ;;  %v1392_v43 = vsel %vm4168_vm8, %v1380_v41, %v1381_v18  ;;  %vm1367_vm7 = vcmp.lt.s32.totalorder %v1336_v8, %v1360_v6 }
 0x550   : > { %v1351_v55 = vrot.slane %v1340_v50, 7  ;;  %v1383_v11 = vrot.slane %v1340_v50, 1  ;;  %vm1345_vm13 = vcmp.lt.s32.totalorder %v1314_v40, %v1330_v38  ;;  %v1370_v17 = vsel %vm1369_vm4, %v3380_v35, %v1359_v47  ;;  %vm4171_vm4 = vmmov %vm4170_vm9 }
 0x551   : > { %v1328_v13 = vpop.permute.xlu0 %1327  ;;  %v1346_v22 = vsel %vm1345_vm13, %v1314_v40, %v1330_v38  ;;  %v1384_v15 = vrot.slane %v3387_v26, 1  ;;  %vm4169_vm13 = vmmov %vm4168_vm8  ;;  %v1368_v21 = vsel %vm1367_vm7, %v1336_v8, %v1360_v6 }
 0x552   : > { %v1357_v14 = vsel %vm4167_vm14, %v1351_v55, %v1352_v45  ;;  %vm1343_vm12 = vcmp.lt.s32.totalorder %v1312_v49, %v1328_v13  ;;  %v1354_v46 = vrot.slane %v1346_v22, 7  ;;  %v1358_v24 = vsel %vm4165_vm11, %v1350_v36, %v1351_v55  ;;  %vm4172_vm11 = vmmov %vm4169_vm13 }
 0x553   : > { %v1344_v9 = vsel %vm1343_vm12, %v1312_v49, %v1328_v13  ;;  %vm1373_vm10 = vcmp.lt.s32.totalorder %v3387_v26, %v1357_v14  ;;  %vm1397_vm14 = vcmp.lt.s32.totalorder %v1366_v20, %v1392_v43  ;;  %v1390_v12 = vsel %vm4169_vm13, %v1382_v51, %v1383_v11 }
 0x554   : > { %v1353_v19 = vrot.slane %v1344_v9, 7  ;;  %v1385_v23 = vrot.slane %v1344_v9, 1  ;;  %v1398_v44 = vsel %vm1397_vm14, %v1366_v20, %v1392_v43  ;;  %vm1401_vm12 = vcmp.lt.s32.totalorder %v1370_v17, %v1390_v12  ;;  %vm4173_vm14 = vmmov %vm4172_vm11 }
 0x555   : > { %v1362_v7 = vsel %vm4171_vm4, %v1354_v46, %v1347_v32  ;;  %v1412_v31 = vsel %vm2374_vm1, %v1398_v44, 258  ;;  %v1402_v29 = vsel %vm1401_vm12, %v1370_v17, %v1390_v12  ;;  %v1374_v52 = vsel %vm1373_vm10, %v3387_v26, %v1357_v14  ;;  %vm4174_vm12 = vmmov %vm4171_vm4 }
 0x556   : > { %v1355_v27 = vsel %vm4170_vm9, %v1353_v19, %v1354_v46  ;;  %v1386_v33 = vrot.slane %v1346_v22, 1  ;;  %1421 = vrot.lane.b32.xlu1 %v1412_v31, %s2342_s10  ;;  %v1388_v35 = vsel %vm4172_vm11, %v1384_v15, %v1385_v23  ;;  %v1391_v36 = vsel %vm4173_vm14, %v1381_v18, %v1382_v51 }
 0x557   : > { %vm1377_vm8 = vcmp.lt.s32.totalorder %v1346_v22, %v1355_v27  ;;  %vm1371_vm13 = vcmp.lt.s32.totalorder %v1340_v50, %v1358_v24  ;;  %v1414_v32 = vsel %vm2382_vm3, %v1402_v29, 258  ;;  %vm1405_vm7 = vcmp.lt.s32.totalorder %v1374_v52, %v1388_v35 }
 0x558   : > { %vm1363_vm9 = vcmp.lt.s32.totalorder %v3377_v10, %v1362_v7  ;;  %v1356_v30 = vsel %vm4174_vm12, %v1352_v45, %v1353_v19  ;;  %v1378_v25 = vsel %vm1377_vm8, %v1346_v22, %v1355_v27  ;;  %v1406_v8 = vsel %vm1405_vm7, %v1374_v52, %v1388_v35 }
 0x559   : > { %v1364_v37 = vsel %vm1363_vm9, %v3377_v10, %v1362_v7  ;;  %vm1399_vm4 = vcmp.lt.s32.totalorder %v1368_v21, %v1391_v36  ;;  %v1372_v39 = vsel %vm1371_vm13, %v1340_v50, %v1358_v24  ;;  %v1394_v41 = vsel %vm4172_vm11, %v1386_v33, %v1379_v28  ;;  %vm4175_vm13 = vmmov %vm4172_vm11 }
 0x55a   : > { %vm1395_vm10 = vcmp.lt.s32.totalorder %v1364_v37, %v1393_v48  ;;  %1425 = vrot.lane.b32.xlu1 %v1414_v32, %s2342_s10  ;;  %vm1375_vm14 = vcmp.lt.s32.totalorder %v1344_v9, %v1356_v30  ;;  %v1416_v42 = vsel %vm4033_vm5, %v1406_v8, 258  ;;  %vm1409_vm8 = vcmp.lt.s32.totalorder %v1378_v25, %v1394_v41  ;;  %vm4176_vm9 = vmmov %vm4172_vm11 }
 0x55b   : > { %v1396_v16 = vsel %vm1395_vm10, %v1364_v37, %v1393_v48  ;;  %v1400_v18 = vsel %vm1399_vm4, %v1368_v21, %v1391_v36  ;;  %v1389_v47 = vsel %vm4175_vm13, %v1383_v11, %v1384_v15  ;;  %v1376_v45 = vsel %vm1375_vm14, %v1344_v9, %v1356_v30 }
 0x55c   : > { %v1411_v26 = vsel %vm2370_vm0, %v1396_v16, 258  ;;  %vm1403_vm7 = vcmp.lt.s32.totalorder %v1372_v39, %v1389_v47  ;;  %v1410_v10 = vsel %vm1409_vm8, %v1378_v25, %v1394_v41  ;;  %v1413_v28 = vsel %vm2378_vm2, %v1400_v18, 258 }
 0x55d   : > { %1419 = vrot.lane.b32.xlu0 %v1411_v26, %s2342_s10  ;;  %v1404_v49 = vsel %vm1403_vm7, %v1372_v39, %v1389_v47  ;;  %v1387_v40 = vsel %vm4176_vm9, %v1385_v23, %v1386_v33  ;;  %v1418_v50 = vsel %vm4161_vm15, %v1410_v10, 258  ;;  %vm4177_vm10 = vnez %v4015_v59 }
 0x55e   : > { %1429 = vrot.lane.b32.xlu1 %v1416_v42, %s2342_s10  ;;  %vm1407_vm12 = vcmp.lt.s32.totalorder %v1376_v45, %v1387_v40  ;;  %v1415_v38 = vsel %vm4160_vm6, %v1404_v49, 258 }
 0x55f   : > { %v1408_v6 = vsel %vm1407_vm12, %v1376_v45, %v1387_v40 }
 0x560   : > { %v1417_v51 = vsel %vm4177_vm10, %v1408_v6, 258 }
 0x561   : > { %1423 = vrot.lane.b32.xlu0 %v1413_v28, %s2342_s10 }
 0x562   : > { %1433 = vrot.lane.b32.xlu1 %v1418_v50, %s2342_s10 }
 0x565   : > { %1427 = vrot.lane.b32.xlu0 %v1415_v38, %s2342_s10 }
 0x566   : > { %1453 = vrot.lane.b32.xlu1 %v1412_v31, %s2343_s11 }
 0x569   : > { %1431 = vrot.lane.b32.xlu0 %v1417_v51, %s2342_s10 }
 0x56a   : > { %1457 = vrot.lane.b32.xlu1 %v1414_v32, %s2343_s11 }
 0x56d   : > { %1451 = vrot.lane.b32.xlu0 %v1411_v26, %s2343_s11 }
 0x56e   : > { %1461 = vrot.lane.b32.xlu1 %v1416_v42, %s2343_s11 }
 0x571   : > { %1455 = vrot.lane.b32.xlu0 %v1413_v28, %s2343_s11 }
 0x572   : > { %1465 = vrot.lane.b32.xlu1 %v1418_v50, %s2343_s11 }
 0x575   : > { %1459 = vrot.lane.b32.xlu0 %v1415_v38, %s2343_s11 }
 0x579   : > { %1463 = vrot.lane.b32.xlu0 %v1417_v51, %s2343_s11 }
 0x5c8   : > { %v1422_v55 = vpop.permute.xlu1 %1421 }
 0x5c9   : > { %vm1437_vm4 = vcmp.lt.s32.totalorder %v1412_v31, %v1422_v55 }
 0x5ca   : > { %v1438_v9 = vsel %vm1437_vm4, %v1412_v31, %v1422_v55 }
 0x5cc   : > { %v1426_v11 = vpop.permute.xlu1 %1425 }
 0x5cd   : > { %vm1441_vm11 = vcmp.lt.s32.totalorder %v1414_v32, %v1426_v11 }
 0x5ce   : > { %v1442_v15 = vsel %vm1441_vm11, %v1414_v32, %v1426_v11 }
 0x5cf   : > { %v1420_v13 = vpop.permute.xlu0 %1419 }
 0x5d0   : > { %v1430_v48 = vpop.permute.xlu1 %1429  ;;  %vm1435_vm8 = vcmp.lt.s32.totalorder %v1411_v26, %v1420_v13 }
 0x5d1   : > { %vm1445_vm13 = vcmp.lt.s32.totalorder %v1416_v42, %v1430_v48  ;;  %v1436_v23 = vsel %vm1435_vm8, %v1411_v26, %v1420_v13 }
 0x5d2   : > { %v1446_v12 = vsel %vm1445_vm13, %v1416_v42, %v1430_v48 }
 0x5d3   : > { %v1424_v14 = vpop.permute.xlu0 %1423 }
 0x5d4   : > { %v1434_v22 = vpop.permute.xlu1 %1433  ;;  %vm1439_vm12 = vcmp.lt.s32.totalorder %v1413_v28, %v1424_v14 }
 0x5d5   : > { %vm1449_vm9 = vcmp.lt.s32.totalorder %v1418_v50, %v1434_v22  ;;  %v1440_v52 = vsel %vm1439_vm12, %v1413_v28, %v1424_v14 }
 0x5d6   : > { %v1450_v29 = vsel %vm1449_vm9, %v1418_v50, %v1434_v22 }
 0x5d7   : > { %v1428_v43 = vpop.permute.xlu0 %1427 }
 0x5d8   : > { %v1454_v20 = vpop.permute.xlu1 %1453  ;;  %vm1443_vm10 = vcmp.lt.s32.totalorder %v1415_v38, %v1428_v43 }
 0x5d9   : > { %vm1469_vm14 = vcmp.lt.s32.totalorder %v1438_v9, %v1454_v20  ;;  %v1444_v33 = vsel %vm1443_vm10, %v1415_v38, %v1428_v43 }
 0x5da   : > { %v1470_v19 = vsel %vm1469_vm14, %v1438_v9, %v1454_v20  ;;  %vm4178_vm14 = vcmp.lt.s32.totalorder %v2360_v3, 1 }
 0x5db   : > { %v1432_v46 = vpop.permute.xlu0 %1431  ;;  %v1484_v27 = vrot.slane %v1470_v19, 7  ;;  %v1516_v36 = vrot.slane %v1470_v19, 1 }
 0x5dc   : > { %v1458_v17 = vpop.permute.xlu1 %1457  ;;  %vm1447_vm4 = vcmp.lt.s32.totalorder %v1417_v51, %v1432_v46 }
 0x5dd   : > { %vm1473_vm7 = vcmp.lt.s32.totalorder %v1442_v15, %v1458_v17  ;;  %v1448_v8 = vsel %vm1447_vm4, %v1417_v51, %v1432_v46 }
 0x5de   : > { %v1474_v21 = vsel %vm1473_vm7, %v1442_v15, %v1458_v17  ;;  %vm4180_vm7 = vcmp.lt.s32.totalorder %v2360_v3, 7 }
 0x5df   : > { %v1452_v24 = vpop.permute.xlu0 %1451  ;;  %v1486_v25 = vrot.slane %v1474_v21, 7  ;;  %v1518_v26 = vrot.slane %v1474_v21, 1  ;;  %vm4182_vm4 = vmmov %vm4180_vm7 }
 0x5e0   : > { %vm1467_vm15 = vcmp.lt.s32.totalorder %v1436_v23, %v1452_v24  ;;  %v1462_v44 = vpop.permute.xlu1 %1461 }
 0x5e1   : > { %v3465_v7 = vsel %vm1467_vm15, %v1436_v23, %v1452_v24  ;;  %vm1477_vm6 = vcmp.lt.s32.totalorder %v1446_v12, %v1462_v44 }
 0x5e2   : > { %v1483_v31 = vrot.slane %v3465_v7, 7  ;;  %v3468_v32 = vsel %vm1477_vm6, %v1446_v12, %v1462_v44  ;;  %v1515_v16 = vrot.slane %v3465_v7, 1  ;;  %vm4179_vm6 = vmmov %vm4178_vm14 }
 0x5e3   : > { %v1456_v35 = vpop.permute.xlu0 %1455  ;;  %v1488_v18 = vrot.slane %v3468_v32, 7  ;;  %v1520_v47 = vrot.slane %v3468_v32, 1  ;;  %vm4181_vm9 = vmmov %vm4179_vm6 }
 0x5e4   : > { %vm1471_vm11 = vcmp.lt.s32.totalorder %v1440_v52, %v1456_v35  ;;  %v1497_v30 = vsel %vm4178_vm14, %v1483_v31, %v1484_v27  ;;  %v1466_v37 = vpop.permute.xlu1 %1465  ;;  %v1529_v11 = vsel %vm4182_vm4, %v1515_v16, %v1516_v36 }
 0x5e5   : > { %v1472_v39 = vsel %vm1471_vm11, %v1440_v52, %v1456_v35  ;;  %vm1501_vm15 = vcmp.lt.s32.totalorder %v1470_v19, %v1497_v30  ;;  %vm1481_vm8 = vcmp.lt.s32.totalorder %v1450_v29, %v1466_v37  ;;  %vm4183_vm11 = vmmov %vm4179_vm6 }
 0x5e6   : > { %v1485_v41 = vrot.slane %v1472_v39, 7  ;;  %v1517_v42 = vrot.slane %v1472_v39, 1  ;;  %v3475_v45 = vsel %vm1481_vm8, %v1450_v29, %v1466_v37  ;;  %v1502_v40 = vsel %vm1501_vm15, %v1470_v19, %v1497_v30  ;;  %vm4184_vm15 = vmmov %vm4179_vm6 }
 0x5e7   : > { %v1460_v10 = vpop.permute.xlu0 %1459  ;;  %v1490_v28 = vrot.slane %v3475_v45, 7 }
 0x5e8   : > { %v1496_v49 = vsel %vm4179_vm6, %v1484_v27, %v1485_v41  ;;  %vm1475_vm10 = vcmp.lt.s32.totalorder %v1444_v33, %v1460_v10  ;;  %v1528_v38 = vsel %vm4180_vm7, %v1516_v36, %v1517_v42  ;;  %v1495_v6 = vsel %vm4181_vm9, %v1485_v41, %v1486_v25  ;;  %vm4186_vm9 = vmmov %vm4182_vm4 }
 0x5e9   : > { %vm1503_vm13 = vcmp.lt.s32.totalorder %v1472_v39, %v1496_v49  ;;  %v1476_v50 = vsel %vm1475_vm10, %v1444_v33, %v1460_v10  ;;  %vm1533_vm12 = vcmp.lt.s32.totalorder %v1502_v40, %v1528_v38  ;;  %v1498_v22 = vsel %vm4183_vm11, %v1490_v28, %v1483_v31 }
 0x5ea   : > { %v1504_v51 = vsel %vm1503_vm13, %v1472_v39, %v1496_v49  ;;  %v1487_v55 = vrot.slane %v1476_v50, 7  ;;  %v1519_v13 = vrot.slane %v1476_v50, 1  ;;  %v1534_v14 = vsel %vm1533_vm12, %v1502_v40, %v1528_v38  ;;  %vm4185_vm13 = vmmov %vm4182_vm4 }
 0x5eb   : > { %v1464_v48 = vpop.permute.xlu0 %1463  ;;  %vm1505_vm14 = vcmp.lt.s32.totalorder %v1474_v21, %v1495_v6  ;;  %v3494_v20 = vsel %vm2374_vm1, %v1534_v14, 258  ;;  %vm1499_vm6 = vcmp.lt.s32.totalorder %v3465_v7, %v1498_v22  ;;  %v1527_v17 = vsel %vm4185_vm13, %v1517_v42, %v1518_v26  ;;  %vm4187_vm4 = vmmov %vm4183_vm11 }
 0x5ec   : > { %v1494_v43 = vsel %vm4184_vm15, %v1486_v25, %v1487_v55  ;;  %vm1479_vm8 = vcmp.lt.s32.totalorder %v1448_v8, %v1464_v48  ;;  %1557 = vrot.lane.b32.xlu1 %v3494_v20, %s2342_s10  ;;  %v1500_v46 = vsel %vm1499_vm6, %v3465_v7, %v1498_v22  ;;  %v1506_v23 = vsel %vm1505_vm14, %v1474_v21, %v1495_v6  ;;  %vm4188_vm11 = vmmov %vm4187_vm4 }
 0x5ed   : > { %vm1507_vm10 = vcmp.lt.s32.totalorder %v1476_v50, %v1494_v43  ;;  %v1480_v9 = vsel %vm1479_vm8, %v1448_v8, %v1464_v48  ;;  %vm1531_vm7 = vcmp.lt.s32.totalorder %v1500_v46, %v1529_v11  ;;  %v1526_v12 = vsel %vm4186_vm9, %v1518_v26, %v1519_v13  ;;  %vm4189_vm6 = vmmov %vm4186_vm9 }
 0x5ee   : > { %v1489_v15 = vrot.slane %v1480_v9, 7  ;;  %v1521_v19 = vrot.slane %v1480_v9, 1  ;;  %v1532_v24 = vsel %vm1531_vm7, %v1500_v46, %v1529_v11  ;;  %vm1535_vm12 = vcmp.lt.s32.totalorder %v1504_v51, %v1527_v17  ;;  %vm4190_vm13 = vmmov %vm4189_vm6 }
 0x5ef   : > { %v1493_v27 = vsel %vm4187_vm4, %v1487_v55, %v1488_v18  ;;  %v1508_v44 = vsel %vm1507_vm10, %v1476_v50, %v1494_v43  ;;  %v1547_v29 = vsel %vm2370_vm0, %v1532_v24, 258  ;;  %vm1537_vm15 = vcmp.lt.s32.totalorder %v1506_v23, %v1526_v12  ;;  %vm4191_vm7 = vmmov %vm4187_vm4 }
 0x5f0   : > { %v1492_v31 = vsel %vm4188_vm11, %v1488_v18, %v1489_v15  ;;  %1555 = vrot.lane.b32.xlu0 %v1547_v29, %s2342_s10  ;;  %v1538_v21 = vsel %vm1537_vm15, %v1506_v23, %v1526_v12  ;;  %v1536_v52 = vsel %vm1535_vm12, %v1504_v51, %v1527_v17  ;;  %vm1509_vm14 = vcmp.lt.s32.totalorder %v3468_v32, %v1493_v27  ;;  %vm4192_vm4 = vmmov %vm4189_vm6 }
 0x5f1   : > { %vm1511_vm8 = vcmp.lt.s32.totalorder %v1480_v9, %v1492_v31  ;;  %v1522_v33 = vrot.slane %v3475_v45, 1  ;;  %v1550_v35 = vsel %vm2382_vm3, %v1538_v21, 258  ;;  %v1510_v36 = vsel %vm1509_vm14, %v3468_v32, %v1493_v27  ;;  %vm4193_vm15 = vmmov %vm4192_vm4 }
 0x5f2   : > { %v1524_v30 = vsel %vm4189_vm6, %v1520_v47, %v1521_v19  ;;  %v1512_v25 = vsel %vm1511_vm8, %v1480_v9, %v1492_v31  ;;  %1561 = vrot.lane.b32.xlu1 %v1550_v35, %s2342_s10  ;;  %v1525_v8 = vsel %vm4190_vm13, %v1519_v13, %v1520_v47  ;;  %v1491_v37 = vsel %vm4191_vm7, %v1489_v15, %v1490_v28 }
 0x5f3   : > { %vm1541_vm10 = vcmp.lt.s32.totalorder %v1510_v36, %v1524_v30  ;;  %v1549_v39 = vsel %vm2378_vm2, %v1536_v52, 258  ;;  %vm1539_vm9 = vcmp.lt.s32.totalorder %v1508_v44, %v1525_v8  ;;  %vm1513_vm12 = vcmp.lt.s32.totalorder %v3475_v45, %v1491_v37 }
 0x5f4   : > { %v1542_v41 = vsel %vm1541_vm10, %v1510_v36, %v1524_v30  ;;  %1559 = vrot.lane.b32.xlu0 %v1549_v39, %s2342_s10  ;;  %v1540_v42 = vsel %vm1539_vm9, %v1508_v44, %v1525_v8  ;;  %v1523_v26 = vsel %vm4192_vm4, %v1521_v19, %v1522_v33  ;;  %v1514_v18 = vsel %vm1513_vm12, %v3475_v45, %v1491_v37 }
 0x5f5   : > { %v1552_v32 = vsel %vm4033_vm5, %v1542_v41, 258  ;;  %vm1543_vm11 = vcmp.lt.s32.totalorder %v1512_v25, %v1523_v26  ;;  %v1530_v47 = vsel %vm4193_vm15, %v1522_v33, %v1515_v16  ;;  %vm4194_vm14 = vnez %v4011_v57 }
 0x5f6   : > { %1565 = vrot.lane.b32.xlu1 %v1552_v32, %s2342_s10  ;;  %vm1545_vm8 = vcmp.lt.s32.totalorder %v1514_v18, %v1530_v47  ;;  %v1551_v10 = vsel %vm4194_vm14, %v1540_v42, 258  ;;  %v1544_v49 = vsel %vm1543_vm11, %v1512_v25, %v1523_v26  ;;  %vm4195_vm6 = vnez %v4017_v60 }
 0x5f7   : > { %v1546_v28 = vsel %vm1545_vm8, %v1514_v18, %v1530_v47  ;;  %vm4196_vm10 = vnez %v4015_v59 }
 0x5f8   : > { %1563 = vrot.lane.b32.xlu0 %v1551_v10, %s2342_s10  ;;  %v3542_v40 = vsel %vm4195_vm6, %v1546_v28, 258  ;;  %v1553_v7 = vsel %vm4196_vm10, %v1544_v49, 258 }
 0x5fa   : > { %1569 = vrot.lane.b32.xlu1 %v3542_v40, %s2342_s10 }
 0x5fc   : > { %1567 = vrot.lane.b32.xlu0 %v1553_v7, %s2342_s10 }
 0x5fe   : > { %1589 = vrot.lane.b32.xlu1 %v3494_v20, %s2343_s11 }
 0x600   : > { %1587 = vrot.lane.b32.xlu0 %v1547_v29, %s2343_s11 }
 0x602   : > { %1593 = vrot.lane.b32.xlu1 %v1550_v35, %s2343_s11 }
 0x604   : > { %1591 = vrot.lane.b32.xlu0 %v1549_v39, %s2343_s11 }
 0x606   : > { %1597 = vrot.lane.b32.xlu1 %v1552_v32, %s2343_s11 }
 0x608   : > { %1595 = vrot.lane.b32.xlu0 %v1551_v10, %s2343_s11 }
 0x60a   : > { %1601 = vrot.lane.b32.xlu1 %v3542_v40, %s2343_s11 }
 0x60c   : > { %1599 = vrot.lane.b32.xlu0 %v1553_v7, %s2343_s11 }
 0x65e   : > { %v1558_v16 = vpop.permute.xlu1 %1557 }
 0x65f   : > { %vm1573_vm13 = vcmp.lt.s32.totalorder %v3494_v20, %v1558_v16 }
 0x660   : > { %v1574_v13 = vsel %vm1573_vm13, %v3494_v20, %v1558_v16 }
 0x662   : > { %v1556_v45 = vpop.permute.xlu0 %1555 }
 0x663   : > { %vm1571_vm7 = vcmp.lt.s32.totalorder %v1547_v29, %v1556_v45 }
 0x664   : > { %v1562_v50 = vpop.permute.xlu1 %1561  ;;  %v1572_v14 = vsel %vm1571_vm7, %v1547_v29, %v1556_v45 }
 0x665   : > { %vm1577_vm9 = vcmp.lt.s32.totalorder %v1550_v35, %v1562_v50 }
 0x666   : > { %v1560_v38 = vpop.permute.xlu0 %1559  ;;  %v1578_v9 = vsel %vm1577_vm9, %v1550_v35, %v1562_v50 }
 0x667   : > { %vm1575_vm4 = vcmp.lt.s32.totalorder %v1549_v39, %v1560_v38 }
 0x668   : > { %v1566_v6 = vpop.permute.xlu1 %1565  ;;  %v1576_v15 = vsel %vm1575_vm4, %v1549_v39, %v1560_v38  ;;  %vm4197_vm4 = vcmp.lt.s32.totalorder %v2360_v3, 1 }
 0x669   : > { %vm1581_vm8 = vcmp.lt.s32.totalorder %v1552_v32, %v1566_v6 }
 0x66a   : > { %v1564_v51 = vpop.permute.xlu0 %1563  ;;  %v1582_v44 = vsel %vm1581_vm8, %v1552_v32, %v1566_v6  ;;  %vm4199_vm8 = vmmov %vm4197_vm4 }
 0x66b   : > { %vm1579_vm15 = vcmp.lt.s32.totalorder %v1551_v10, %v1564_v51 }
 0x66c   : > { %v1570_v55 = vpop.permute.xlu1 %1569  ;;  %v1580_v27 = vsel %vm1579_vm15, %v1551_v10, %v1564_v51 }
 0x66d   : > { %vm1585_vm9 = vcmp.lt.s32.totalorder %v3542_v40, %v1570_v55 }
 0x66e   : > { %v1568_v11 = vpop.permute.xlu0 %1567  ;;  %v1586_v41 = vsel %vm1585_vm9, %v3542_v40, %v1570_v55  ;;  %vm4201_vm9 = vmmov %vm4197_vm4 }
 0x66f   : > { %vm1583_vm7 = vcmp.lt.s32.totalorder %v1553_v7, %v1568_v11 }
 0x670   : > { %v1590_v48 = vpop.permute.xlu1 %1589  ;;  %v1584_v39 = vsel %vm1583_vm7, %v1553_v7, %v1568_v11  ;;  %vm4200_vm7 = vcmp.lt.s32.totalorder %v2360_v3, 7 }
 0x671   : > { %vm1605_vm12 = vcmp.lt.s32.totalorder %v1574_v13, %v1590_v48 }
 0x672   : > { %v1588_v22 = vpop.permute.xlu0 %1587  ;;  %v1606_v43 = vsel %vm1605_vm12, %v1574_v13, %v1590_v48 }
 0x673   : > { %vm1603_vm11 = vcmp.lt.s32.totalorder %v1572_v14, %v1588_v22  ;;  %v1620_v23 = vrot.slane %v1606_v43, 7  ;;  %v1652_v35 = vrot.slane %v1606_v43, 1 }
 0x674   : > { %v3561_v46 = vsel %vm1603_vm11, %v1572_v14, %v1588_v22  ;;  %v1594_v17 = vpop.permute.xlu1 %1593 }
 0x675   : > { %vm1609_vm10 = vcmp.lt.s32.totalorder %v1578_v9, %v1594_v17  ;;  %v1619_v19 = vrot.slane %v3561_v46, 7  ;;  %v1651_v52 = vrot.slane %v3561_v46, 1 }
 0x676   : > { %v1592_v20 = vpop.permute.xlu0 %1591  ;;  %v3564_v24 = vsel %vm1609_vm10, %v1578_v9, %v1594_v17  ;;  %vm4198_vm10 = vmmov %vm4197_vm4 }
 0x677   : > { %vm1607_vm13 = vcmp.lt.s32.totalorder %v1576_v15, %v1592_v20  ;;  %v1622_v12 = vrot.slane %v3564_v24, 7  ;;  %v1633_v33 = vsel %vm4197_vm4, %v1619_v19, %v1620_v23  ;;  %v1654_v18 = vrot.slane %v3564_v24, 1 }
 0x678   : > { %v1608_v31 = vsel %vm1607_vm13, %v1576_v15, %v1592_v20  ;;  %v1598_v29 = vpop.permute.xlu1 %1597  ;;  %vm1637_vm15 = vcmp.lt.s32.totalorder %v1606_v43, %v1633_v33  ;;  %v1665_v49 = vsel %vm4200_vm7, %v1651_v52, %v1652_v35 }
 0x679   : > { %v1621_v21 = vrot.slane %v1608_v31, 7  ;;  %vm1613_vm12 = vcmp.lt.s32.totalorder %v1582_v44, %v1598_v29  ;;  %v1653_v25 = vrot.slane %v1608_v31, 1  ;;  %v1638_v45 = vsel %vm1637_vm15, %v1606_v43, %v1633_v33  ;;  %vm4204_vm15 = vmmov %vm4199_vm8 }
 0x67a   : > { %v1596_v36 = vpop.permute.xlu0 %1595  ;;  %v3571_v30 = vsel %vm1613_vm12, %v1582_v44, %v1598_v29 }
 0x67b   : > { %v1631_v8 = vsel %vm4198_vm10, %v1621_v21, %v1622_v12  ;;  %vm1611_vm11 = vcmp.lt.s32.totalorder %v1580_v27, %v1596_v36  ;;  %v1624_v37 = vrot.slane %v3571_v30, 7  ;;  %v1632_v26 = vsel %vm4199_vm8, %v1620_v23, %v1621_v21  ;;  %vm4202_vm10 = vmmov %vm4200_vm7 }
 0x67c   : > { %v1612_v32 = vsel %vm1611_vm11, %v1580_v27, %v1596_v36  ;;  %v1602_v42 = vpop.permute.xlu1 %1601  ;;  %vm1641_vm13 = vcmp.lt.s32.totalorder %v3564_v24, %v1631_v8  ;;  %v1664_v16 = vsel %vm4202_vm10, %v1652_v35, %v1653_v25  ;;  %vm1639_vm11 = vcmp.lt.s32.totalorder %v1608_v31, %v1632_v26 }
 0x67d   : > { %v1623_v47 = vrot.slane %v1612_v32, 7  ;;  %v1655_v10 = vrot.slane %v1612_v32, 1  ;;  %vm1617_vm12 = vcmp.lt.s32.totalorder %v1586_v41, %v1602_v42  ;;  %v1642_v6 = vsel %vm1641_vm13, %v3564_v24, %v1631_v8  ;;  %vm4205_vm13 = vmmov %vm4199_vm8 }
 0x67e   : > { %v1600_v28 = vpop.permute.xlu0 %1599  ;;  %v1618_v7 = vsel %vm1617_vm12, %v1586_v41, %v1602_v42  ;;  %v1656_v51 = vrot.slane %v3571_v30, 1  ;;  %vm4203_vm12 = vmmov %vm4202_vm10  ;;  %v1640_v9 = vsel %vm1639_vm11, %v1608_v31, %v1632_v26 }
 0x67f   : > { %v1629_v40 = vsel %vm4201_vm9, %v1623_v47, %v1624_v37  ;;  %vm1615_vm4 = vcmp.lt.s32.totalorder %v1584_v39, %v1600_v28  ;;  %v1626_v38 = vrot.slane %v1618_v7, 7  ;;  %v1630_v13 = vsel %vm4199_vm8, %v1622_v12, %v1623_v47  ;;  %vm4206_vm8 = vmmov %vm4203_vm12 }
 0x680   : > { %v1616_v50 = vsel %vm1615_vm4, %v1584_v39, %v1600_v28  ;;  %vm1645_vm7 = vcmp.lt.s32.totalorder %v3571_v30, %v1629_v40  ;;  %vm1669_vm9 = vcmp.lt.s32.totalorder %v1638_v45, %v1664_v16  ;;  %v1662_v48 = vsel %vm4203_vm12, %v1654_v18, %v1655_v10 }
 0x681   : > { %v1625_v55 = vrot.slane %v1616_v50, 7  ;;  %v1657_v11 = vrot.slane %v1616_v50, 1  ;;  %v1670_v22 = vsel %vm1669_vm9, %v1638_v45, %v1664_v16  ;;  %vm1673_vm4 = vcmp.lt.s32.totalorder %v1642_v6, %v1662_v48  ;;  %vm4207_vm9 = vmmov %vm4206_vm8 }
 0x682   : > { %v1634_v43 = vsel %vm4205_vm13, %v1626_v38, %v1619_v19  ;;  %v1684_v17 = vsel %vm2374_vm1, %v1670_v22, 258  ;;  %v1674_v15 = vsel %vm1673_vm4, %v1642_v6, %v1662_v48  ;;  %v1646_v23 = vsel %vm1645_vm7, %v3571_v30, %v1629_v40  ;;  %vm4208_vm4 = vmmov %vm4205_vm13 }
 0x683   : > { %v1627_v14 = vsel %vm4204_vm15, %v1625_v55, %v1626_v38  ;;  %v1658_v20 = vrot.slane %v1618_v7, 1  ;;  %1693 = vrot.lane.b32.xlu1 %v1684_v17, %s2342_s10  ;;  %v1660_v24 = vsel %vm4206_vm8, %v1656_v51, %v1657_v11  ;;  %v1663_v12 = vsel %vm4207_vm9, %v1653_v25, %v1654_v18 }
 0x684   : > { %vm1649_vm10 = vcmp.lt.s32.totalorder %v1618_v7, %v1627_v14  ;;  %vm1643_vm12 = vcmp.lt.s32.totalorder %v1612_v32, %v1630_v13  ;;  %v1686_v19 = vsel %vm2382_vm3, %v1674_v15, 258  ;;  %vm1677_vm11 = vcmp.lt.s32.totalorder %v1646_v23, %v1660_v24 }
 0x685   : > { %vm1635_vm15 = vcmp.lt.s32.totalorder %v3561_v46, %v1634_v43  ;;  %v1628_v27 = vsel %vm4208_vm4, %v1624_v37, %v1625_v55  ;;  %v1650_v44 = vsel %vm1649_vm10, %v1618_v7, %v1627_v14  ;;  %v1678_v31 = vsel %vm1677_vm11, %v1646_v23, %v1660_v24 }
 0x686   : > { %v1636_v29 = vsel %vm1635_vm15, %v3561_v46, %v1634_v43  ;;  %vm1671_vm13 = vcmp.lt.s32.totalorder %v1640_v9, %v1663_v12  ;;  %v1644_v21 = vsel %vm1643_vm12, %v1612_v32, %v1630_v13  ;;  %v1666_v35 = vsel %vm4206_vm8, %v1658_v20, %v1651_v52  ;;  %vm4209_vm12 = vmmov %vm4206_vm8 }
 0x687   : > { %vm1667_vm7 = vcmp.lt.s32.totalorder %v1636_v29, %v1665_v49  ;;  %1697 = vrot.lane.b32.xlu1 %v1686_v19, %s2342_s10  ;;  %vm1647_vm9 = vcmp.lt.s32.totalorder %v1616_v50, %v1628_v27  ;;  %v1688_v36 = vsel %vm4033_vm5, %v1678_v31, 258  ;;  %vm1681_vm10 = vcmp.lt.s32.totalorder %v1650_v44, %v1666_v35  ;;  %vm4210_vm15 = vmmov %vm4206_vm8 }
 0x688   : > { %v1668_v33 = vsel %vm1667_vm7, %v1636_v29, %v1665_v49  ;;  %v1672_v25 = vsel %vm1671_vm13, %v1640_v9, %v1663_v12  ;;  %v1661_v8 = vsel %vm4209_vm12, %v1655_v10, %v1656_v51  ;;  %v1648_v37 = vsel %vm1647_vm9, %v1616_v50, %v1628_v27 }
 0x689   : > { %v1683_v30 = vsel %vm2370_vm0, %v1668_v33, 258  ;;  %vm1675_vm11 = vcmp.lt.s32.totalorder %v1644_v21, %v1661_v8  ;;  %v1682_v46 = vsel %vm1681_vm10, %v1650_v44, %v1666_v35  ;;  %v1685_v52 = vsel %vm2378_vm2, %v1672_v25, 258 }
 0x68a   : > { %1691 = vrot.lane.b32.xlu0 %v1683_v30, %s2342_s10  ;;  %v1676_v39 = vsel %vm1675_vm11, %v1644_v21, %v1661_v8  ;;  %v1659_v41 = vsel %vm4210_vm15, %v1657_v11, %v1658_v20  ;;  %v1690_v32 = vsel %vm4195_vm6, %v1682_v46, 258  ;;  %vm4211_vm7 = vnez %v4015_v59 }
 0x68b   : > { %1701 = vrot.lane.b32.xlu1 %v1688_v36, %s2342_s10  ;;  %vm1679_vm4 = vcmp.lt.s32.totalorder %v1648_v37, %v1659_v41  ;;  %v1687_v42 = vsel %vm4194_vm14, %v1676_v39, 258 }
 0x68c   : > { %v1680_v26 = vsel %vm1679_vm4, %v1648_v37, %v1659_v41 }
 0x68d   : > { %v1689_v18 = vsel %vm4211_vm7, %v1680_v26, 258 }
 0x68e   : > { %1695 = vrot.lane.b32.xlu0 %v1685_v52, %s2342_s10 }
 0x68f   : > { %1705 = vrot.lane.b32.xlu1 %v1690_v32, %s2342_s10 }
 0x692   : > { %1699 = vrot.lane.b32.xlu0 %v1687_v42, %s2342_s10 }
 0x693   : > { %1725 = vrot.lane.b32.xlu1 %v1684_v17, %s2343_s11 }
 0x696   : > { %1703 = vrot.lane.b32.xlu0 %v1689_v18, %s2342_s10 }
 0x697   : > { %1729 = vrot.lane.b32.xlu1 %v1686_v19, %s2343_s11 }
 0x69a   : > { %1723 = vrot.lane.b32.xlu0 %v1683_v30, %s2343_s11 }
 0x69b   : > { %1733 = vrot.lane.b32.xlu1 %v1688_v36, %s2343_s11 }
 0x69e   : > { %1727 = vrot.lane.b32.xlu0 %v1685_v52, %s2343_s11 }
 0x69f   : > { %1737 = vrot.lane.b32.xlu1 %v1690_v32, %s2343_s11 }
 0x6a2   : > { %1731 = vrot.lane.b32.xlu0 %v1687_v42, %s2343_s11 }
 0x6a6   : > { %1735 = vrot.lane.b32.xlu0 %v1689_v18, %s2343_s11 }
 0x6f5   : > { %v1694_v47 = vpop.permute.xlu1 %1693 }
 0x6f6   : > { %vm1709_vm13 = vcmp.lt.s32.totalorder %v1684_v17, %v1694_v47 }
 0x6f7   : > { %v1710_v50 = vsel %vm1709_vm13, %v1684_v17, %v1694_v47 }
 0x6f9   : > { %v1698_v10 = vpop.permute.xlu1 %1697 }
 0x6fa   : > { %vm1713_vm8 = vcmp.lt.s32.totalorder %v1686_v19, %v1698_v10 }
 0x6fb   : > { %v1714_v51 = vsel %vm1713_vm8, %v1686_v19, %v1698_v10 }
 0x6fc   : > { %v1692_v28 = vpop.permute.xlu0 %1691 }
 0x6fd   : > { %v1702_v49 = vpop.permute.xlu1 %1701  ;;  %vm1707_vm10 = vcmp.lt.s32.totalorder %v1683_v30, %v1692_v28 }
 0x6fe   : > { %vm1717_vm12 = vcmp.lt.s32.totalorder %v1688_v36, %v1702_v49  ;;  %v1708_v11 = vsel %vm1707_vm10, %v1683_v30, %v1692_v28 }
 0x6ff   : > { %v1718_v48 = vsel %vm1717_vm12, %v1688_v36, %v1702_v49 }
 0x700   : > { %v1696_v40 = vpop.permute.xlu0 %1695 }
 0x701   : > { %v1706_v7 = vpop.permute.xlu1 %1705  ;;  %vm1711_vm4 = vcmp.lt.s32.totalorder %v1685_v52, %v1696_v40 }
 0x702   : > { %vm1721_vm15 = vcmp.lt.s32.totalorder %v1690_v32, %v1706_v7  ;;  %v1712_v23 = vsel %vm1711_vm4, %v1685_v52, %v1696_v40 }
 0x703   : > { %v1722_v15 = vsel %vm1721_vm15, %v1690_v32, %v1706_v7 }
 0x704   : > { %v1700_v16 = vpop.permute.xlu0 %1699 }
 0x705   : > { %v1726_v45 = vpop.permute.xlu1 %1725  ;;  %vm1715_vm7 = vcmp.lt.s32.totalorder %v1687_v42, %v1700_v16 }
 0x706   : > { %vm1741_vm9 = vcmp.lt.s32.totalorder %v1710_v50, %v1726_v45  ;;  %v1716_v20 = vsel %vm1715_vm7, %v1687_v42, %v1700_v16 }
 0x707   : > { %v1742_v55 = vsel %vm1741_vm9, %v1710_v50, %v1726_v45  ;;  %vm4212_vm9 = vcmp.lt.s32.totalorder %v2360_v3, 1 }
 0x708   : > { %v1704_v38 = vpop.permute.xlu0 %1703  ;;  %v1756_v14 = vrot.slane %v1742_v55, 7  ;;  %v1788_v12 = vrot.slane %v1742_v55, 1  ;;  %vm4215_vm15 = vmmov %vm4212_vm9 }
 0x709   : > { %v1730_v6 = vpop.permute.xlu1 %1729  ;;  %vm1719_vm13 = vcmp.lt.s32.totalorder %v1689_v18, %v1704_v38 }
 0x70a   : > { %vm1745_vm11 = vcmp.lt.s32.totalorder %v1714_v51, %v1730_v6  ;;  %v1720_v31 = vsel %vm1719_vm13, %v1689_v18, %v1704_v38 }
 0x70b   : > { %v1746_v9 = vsel %vm1745_vm11, %v1714_v51, %v1730_v6  ;;  %vm4214_vm11 = vcmp.lt.s32.totalorder %v2360_v3, 7 }
 0x70c   : > { %v1724_v13 = vpop.permute.xlu0 %1723  ;;  %v1758_v44 = vrot.slane %v1746_v9, 7  ;;  %v1790_v30 = vrot.slane %v1746_v9, 1  ;;  %vm4216_vm13 = vmmov %vm4214_vm11 }
 0x70d   : > { %vm1739_vm6 = vcmp.lt.s32.totalorder %v1708_v11, %v1724_v13  ;;  %v1734_v22 = vpop.permute.xlu1 %1733 }
 0x70e   : > { %v3649_v43 = vsel %vm1739_vm6, %v1708_v11, %v1724_v13  ;;  %vm1749_vm14 = vcmp.lt.s32.totalorder %v1718_v48, %v1734_v22 }
 0x70f   : > { %v1755_v17 = vrot.slane %v3649_v43, 7  ;;  %v3652_v19 = vsel %vm1749_vm14, %v1718_v48, %v1734_v22  ;;  %v1787_v33 = vrot.slane %v3649_v43, 1  ;;  %vm4213_vm14 = vmmov %vm4212_vm9 }
 0x710   : > { %v1728_v24 = vpop.permute.xlu0 %1727  ;;  %v1760_v25 = vrot.slane %v3652_v19, 7  ;;  %v1792_v8 = vrot.slane %v3652_v19, 1 }
 0x711   : > { %vm1743_vm8 = vcmp.lt.s32.totalorder %v1712_v23, %v1728_v24  ;;  %v1769_v27 = vsel %vm4212_vm9, %v1755_v17, %v1756_v14  ;;  %v1738_v29 = vpop.permute.xlu1 %1737  ;;  %v1801_v10 = vsel %vm4216_vm13, %v1787_v33, %v1788_v12 }
 0x712   : > { %v1744_v21 = vsel %vm1743_vm8, %v1712_v23, %v1728_v24  ;;  %vm1773_vm6 = vcmp.lt.s32.totalorder %v1742_v55, %v1769_v27  ;;  %vm1753_vm10 = vcmp.lt.s32.totalorder %v1722_v15, %v1738_v29  ;;  %vm4217_vm8 = vmmov %vm4212_vm9 }
 0x713   : > { %v1757_v35 = vrot.slane %v1744_v21, 7  ;;  %v1789_v36 = vrot.slane %v1744_v21, 1  ;;  %v3659_v37 = vsel %vm1753_vm10, %v1722_v15, %v1738_v29  ;;  %v1774_v41 = vsel %vm1773_vm6, %v1742_v55, %v1769_v27  ;;  %vm4218_vm6 = vmmov %vm4217_vm8 }
 0x714   : > { %v1732_v46 = vpop.permute.xlu0 %1731  ;;  %v1762_v52 = vrot.slane %v3659_v37, 7  ;;  %vm4221_vm13 = vmmov %vm4218_vm6 }
 0x715   : > { %v1768_v39 = vsel %vm4213_vm14, %v1756_v14, %v1757_v35  ;;  %vm1747_vm7 = vcmp.lt.s32.totalorder %v1716_v20, %v1732_v46  ;;  %v1800_v42 = vsel %vm4214_vm11, %v1788_v12, %v1789_v36  ;;  %v1767_v26 = vsel %vm4215_vm15, %v1757_v35, %v1758_v44 }
 0x716   : > { %vm1775_vm12 = vcmp.lt.s32.totalorder %v1744_v21, %v1768_v39  ;;  %v1748_v32 = vsel %vm1747_vm7, %v1716_v20, %v1732_v46  ;;  %vm1805_vm4 = vcmp.lt.s32.totalorder %v1774_v41, %v1800_v42  ;;  %v1770_v7 = vsel %vm4217_vm8, %v1762_v52, %v1755_v17  ;;  %vm4222_vm8 = vmmov %vm4218_vm6 }
 0x717   : > { %v1776_v18 = vsel %vm1775_vm12, %v1744_v21, %v1768_v39  ;;  %v1759_v47 = vrot.slane %v1748_v32, 7  ;;  %v1791_v28 = vrot.slane %v1748_v32, 1  ;;  %v1806_v40 = vsel %vm1805_vm4, %v1774_v41, %v1800_v42  ;;  %vm4219_vm12 = vmmov %vm4214_vm11 }
 0x718   : > { %v1736_v49 = vpop.permute.xlu0 %1735  ;;  %vm1777_vm9 = vcmp.lt.s32.totalorder %v1746_v9, %v1767_v26  ;;  %v3678_v45 = vsel %vm2374_vm1, %v1806_v40, 258  ;;  %vm1771_vm14 = vcmp.lt.s32.totalorder %v3649_v43, %v1770_v7  ;;  %v1799_v6 = vsel %vm4219_vm12, %v1789_v36, %v1790_v30  ;;  %vm4220_vm15 = vmmov %vm4219_vm12 }
 0x719   : > { %v1766_v16 = vsel %vm4218_vm6, %v1758_v44, %v1759_v47  ;;  %vm1751_vm10 = vcmp.lt.s32.totalorder %v1720_v31, %v1736_v49  ;;  %1829 = vrot.lane.b32.xlu1 %v3678_v45, %s2342_s10  ;;  %v1772_v38 = vsel %vm1771_vm14, %v3649_v43, %v1770_v7  ;;  %v1778_v11 = vsel %vm1777_vm9, %v1746_v9, %v1767_v26  ;;  %vm4223_vm14 = vmmov %vm4219_vm12 }
 0x71a   : > { %vm1779_vm7 = vcmp.lt.s32.totalorder %v1748_v32, %v1766_v16  ;;  %v1752_v50 = vsel %vm1751_vm10, %v1720_v31, %v1736_v49  ;;  %vm1803_vm11 = vcmp.lt.s32.totalorder %v1772_v38, %v1801_v10  ;;  %v1798_v48 = vsel %vm4220_vm15, %v1790_v30, %v1791_v28 }
 0x71b   : > { %v1761_v51 = vrot.slane %v1752_v50, 7  ;;  %v1793_v55 = vrot.slane %v1752_v50, 1  ;;  %v1804_v13 = vsel %vm1803_vm11, %v1772_v38, %v1801_v10  ;;  %vm1807_vm4 = vcmp.lt.s32.totalorder %v1776_v18, %v1799_v6  ;;  %vm4224_vm11 = vmmov %vm4222_vm8 }
 0x71c   : > { %v1765_v14 = vsel %vm4221_vm13, %v1759_v47, %v1760_v25  ;;  %v1780_v22 = vsel %vm1779_vm7, %v1748_v32, %v1766_v16  ;;  %v1819_v15 = vsel %vm2370_vm0, %v1804_v13, 258  ;;  %vm1809_vm6 = vcmp.lt.s32.totalorder %v1778_v11, %v1798_v48  ;;  %vm4225_vm13 = vmmov %vm4219_vm12 }
 0x71d   : > { %v1764_v17 = vsel %vm4222_vm8, %v1760_v25, %v1761_v51  ;;  %1827 = vrot.lane.b32.xlu0 %v1819_v15, %s2342_s10  ;;  %v1810_v9 = vsel %vm1809_vm6, %v1778_v11, %v1798_v48  ;;  %v1808_v23 = vsel %vm1807_vm4, %v1776_v18, %v1799_v6  ;;  %vm1781_vm9 = vcmp.lt.s32.totalorder %v3652_v19, %v1765_v14  ;;  %vm4226_vm6 = vmmov %vm4219_vm12 }
 0x71e   : > { %vm1783_vm10 = vcmp.lt.s32.totalorder %v1752_v50, %v1764_v17  ;;  %v1794_v20 = vrot.slane %v3659_v37, 1  ;;  %v1822_v24 = vsel %vm2382_vm3, %v1810_v9, 258  ;;  %v1782_v12 = vsel %vm1781_vm9, %v3652_v19, %v1765_v14 }
 0x71f   : > { %v1796_v27 = vsel %vm4223_vm14, %v1792_v8, %v1793_v55  ;;  %v1784_v44 = vsel %vm1783_vm10, %v1752_v50, %v1764_v17  ;;  %1833 = vrot.lane.b32.xlu1 %v1822_v24, %s2342_s10  ;;  %v1797_v31 = vsel %vm4219_vm12, %v1791_v28, %v1792_v8  ;;  %v1763_v29 = vsel %vm4224_vm11, %v1761_v51, %v1762_v52 }
 0x720   : > { %vm1813_vm7 = vcmp.lt.s32.totalorder %v1782_v12, %v1796_v27  ;;  %v1821_v21 = vsel %vm2378_vm2, %v1808_v23, 258  ;;  %vm1811_vm15 = vcmp.lt.s32.totalorder %v1780_v22, %v1797_v31  ;;  %vm1785_vm4 = vcmp.lt.s32.totalorder %v3659_v37, %v1763_v29 }
 0x721   : > { %v1814_v35 = vsel %vm1813_vm7, %v1782_v12, %v1796_v27  ;;  %1831 = vrot.lane.b32.xlu0 %v1821_v21, %s2342_s10  ;;  %v1812_v36 = vsel %vm1811_vm15, %v1780_v22, %v1797_v31  ;;  %v1795_v30 = vsel %vm4225_vm13, %v1793_v55, %v1794_v20  ;;  %v1786_v25 = vsel %vm1785_vm4, %v3659_v37, %v1763_v29 }
 0x722   : > { %v1824_v19 = vsel %vm4033_vm5, %v1814_v35, 258  ;;  %vm1815_vm8 = vcmp.lt.s32.totalorder %v1784_v44, %v1795_v30  ;;  %v1802_v8 = vsel %vm4226_vm6, %v1794_v20, %v1787_v33  ;;  %vm4227_vm9 = vnez %v4011_v57 }
 0x723   : > { %1837 = vrot.lane.b32.xlu1 %v1824_v19, %s2342_s10  ;;  %vm1817_vm10 = vcmp.lt.s32.totalorder %v1786_v25, %v1802_v8  ;;  %v1823_v46 = vsel %vm4227_vm9, %v1812_v36, 258  ;;  %v1816_v39 = vsel %vm1815_vm8, %v1784_v44, %v1795_v30  ;;  %vm4228_vm14 = vnez %v4017_v60 }
 0x724   : > { %v1818_v52 = vsel %vm1817_vm10, %v1786_v25, %v1802_v8  ;;  %vm4229_vm7 = vnez %v4015_v59 }
 0x725   : > { %1835 = vrot.lane.b32.xlu0 %v1823_v46, %s2342_s10  ;;  %v3726_v41 = vsel %vm4228_vm14, %v1818_v52, 258  ;;  %v1825_v43 = vsel %vm4229_vm7, %v1816_v39, 258 }
 0x727   : > { %1841 = vrot.lane.b32.xlu1 %v3726_v41, %s2342_s10 }
 0x729   : > { %1839 = vrot.lane.b32.xlu0 %v1825_v43, %s2342_s10 }
 0x72b   : > { %1861 = vrot.lane.b32.xlu1 %v3678_v45, %s2343_s11 }
 0x72d   : > { %1859 = vrot.lane.b32.xlu0 %v1819_v15, %s2343_s11 }
 0x72f   : > { %1865 = vrot.lane.b32.xlu1 %v1822_v24, %s2343_s11 }
 0x731   : > { %1863 = vrot.lane.b32.xlu0 %v1821_v21, %s2343_s11 }
 0x733   : > { %1869 = vrot.lane.b32.xlu1 %v1824_v19, %s2343_s11 }
 0x735   : > { %1867 = vrot.lane.b32.xlu0 %v1823_v46, %s2343_s11 }
 0x737   : > { %1873 = vrot.lane.b32.xlu1 %v3726_v41, %s2343_s11 }
 0x739   : > { %1871 = vrot.lane.b32.xlu0 %v1825_v43, %s2343_s11 }
 0x78b   : > { %v1830_v33 = vpop.permute.xlu1 %1829 }
 0x78c   : > { %vm1845_vm12 = vcmp.lt.s32.totalorder %v3678_v45, %v1830_v33 }
 0x78d   : > { %v1846_v28 = vsel %vm1845_vm12, %v3678_v45, %v1830_v33 }
 0x78f   : > { %v1828_v37 = vpop.permute.xlu0 %1827 }
 0x790   : > { %vm1843_vm11 = vcmp.lt.s32.totalorder %v1819_v15, %v1828_v37 }
 0x791   : > { %v1834_v32 = vpop.permute.xlu1 %1833  ;;  %v1844_v40 = vsel %vm1843_vm11, %v1819_v15, %v1828_v37 }
 0x792   : > { %vm1849_vm15 = vcmp.lt.s32.totalorder %v1822_v24, %v1834_v32 }
 0x793   : > { %v1832_v42 = vpop.permute.xlu0 %1831  ;;  %v1850_v50 = vsel %vm1849_vm15, %v1822_v24, %v1834_v32 }
 0x794   : > { %vm1847_vm13 = vcmp.lt.s32.totalorder %v1821_v21, %v1832_v42 }
 0x795   : > { %v1838_v26 = vpop.permute.xlu1 %1837  ;;  %v1848_v51 = vsel %vm1847_vm13, %v1821_v21, %v1832_v42  ;;  %vm4230_vm13 = vcmp.lt.s32.totalorder %v2360_v3, 1 }
 0x796   : > { %vm1853_vm10 = vcmp.lt.s32.totalorder %v1824_v19, %v1838_v26 }
 0x797   : > { %v1836_v18 = vpop.permute.xlu0 %1835  ;;  %v1854_v22 = vsel %vm1853_vm10, %v1824_v19, %v1838_v26 }
 0x798   : > { %vm1851_vm6 = vcmp.lt.s32.totalorder %v1823_v46, %v1836_v18 }
 0x799   : > { %v1842_v47 = vpop.permute.xlu1 %1841  ;;  %v1852_v14 = vsel %vm1851_vm6, %v1823_v46, %v1836_v18 }
 0x79a   : > { %vm1857_vm15 = vcmp.lt.s32.totalorder %v3726_v41, %v1842_v47 }
 0x79b   : > { %v1840_v10 = vpop.permute.xlu0 %1839  ;;  %v1858_v35 = vsel %vm1857_vm15, %v3726_v41, %v1842_v47 }
 0x79c   : > { %vm1855_vm11 = vcmp.lt.s32.totalorder %v1825_v43, %v1840_v10 }
 0x79d   : > { %v1862_v49 = vpop.permute.xlu1 %1861  ;;  %v1856_v21 = vsel %vm1855_vm11, %v1825_v43, %v1840_v10  ;;  %vm4233_vm11 = vcmp.lt.s32.totalorder %v2360_v3, 7 }
 0x79e   : > { %vm1877_vm4 = vcmp.lt.s32.totalorder %v1846_v28, %v1862_v49 }
 0x79f   : > { %v1860_v7 = vpop.permute.xlu0 %1859  ;;  %v1878_v16 = vsel %vm1877_vm4, %v1846_v28, %v1862_v49 }
 0x7a0   : > { %vm1875_vm8 = vcmp.lt.s32.totalorder %v1844_v40, %v1860_v7  ;;  %v1892_v11 = vrot.slane %v1878_v16, 7  ;;  %v1924_v24 = vrot.slane %v1878_v16, 1 }
 0x7a1   : > { %v3745_v38 = vsel %vm1875_vm8, %v1844_v40, %v1860_v7  ;;  %v1866_v6 = vpop.permute.xlu1 %1865 }
 0x7a2   : > { %vm1881_vm7 = vcmp.lt.s32.totalorder %v1850_v50, %v1866_v6  ;;  %v1891_v55 = vrot.slane %v3745_v38, 7  ;;  %v1923_v23 = vrot.slane %v3745_v38, 1 }
 0x7a3   : > { %v1864_v45 = vpop.permute.xlu0 %1863  ;;  %v3748_v13 = vsel %vm1881_vm7, %v1850_v50, %v1866_v6  ;;  %vm4231_vm7 = vmmov %vm4230_vm13 }
 0x7a4   : > { %vm1879_vm12 = vcmp.lt.s32.totalorder %v1848_v51, %v1864_v45  ;;  %v1894_v48 = vrot.slane %v3748_v13, 7  ;;  %v1905_v20 = vsel %vm4230_vm13, %v1891_v55, %v1892_v11  ;;  %vm4232_vm10 = vmmov %vm4231_vm7  ;;  %v1926_v25 = vrot.slane %v3748_v13, 1 }
 0x7a5   : > { %v1880_v17 = vsel %vm1879_vm12, %v1848_v51, %v1864_v45  ;;  %v1870_v15 = vpop.permute.xlu1 %1869  ;;  %vm1909_vm6 = vcmp.lt.s32.totalorder %v1878_v16, %v1905_v20  ;;  %v1937_v39 = vsel %vm4233_vm11, %v1923_v23, %v1924_v24  ;;  %vm4234_vm15 = vmmov %vm4231_vm7 }
 0x7a6   : > { %v1893_v9 = vrot.slane %v1880_v17, 7  ;;  %vm1885_vm4 = vcmp.lt.s32.totalorder %v1854_v22, %v1870_v15  ;;  %v1925_v44 = vrot.slane %v1880_v17, 1  ;;  %v1910_v37 = vsel %vm1909_vm6, %v1878_v16, %v1905_v20  ;;  %vm4237_vm6 = vmmov %vm4232_vm10 }
 0x7a7   : > { %v1868_v12 = vpop.permute.xlu0 %1867  ;;  %v3755_v27 = vsel %vm1885_vm4, %v1854_v22, %v1870_v15 }
 0x7a8   : > { %v1903_v31 = vsel %vm4231_vm7, %v1893_v9, %v1894_v48  ;;  %vm1883_vm8 = vcmp.lt.s32.totalorder %v1852_v14, %v1868_v12  ;;  %v1896_v29 = vrot.slane %v3755_v27, 7  ;;  %v1904_v30 = vsel %vm4232_vm10, %v1892_v11, %v1893_v9  ;;  %vm4235_vm7 = vmmov %vm4233_vm11 }
 0x7a9   : > { %v1884_v19 = vsel %vm1883_vm8, %v1852_v14, %v1868_v12  ;;  %v1874_v36 = vpop.permute.xlu1 %1873  ;;  %vm1913_vm12 = vcmp.lt.s32.totalorder %v3748_v13, %v1903_v31  ;;  %v1936_v33 = vsel %vm4235_vm7, %v1924_v24, %v1925_v44  ;;  %vm1911_vm8 = vcmp.lt.s32.totalorder %v1880_v17, %v1904_v30 }
 0x7aa   : > { %v1895_v8 = vrot.slane %v1884_v19, 7  ;;  %v1927_v46 = vrot.slane %v1884_v19, 1  ;;  %vm1889_vm4 = vcmp.lt.s32.totalorder %v1858_v35, %v1874_v36  ;;  %v1914_v26 = vsel %vm1913_vm12, %v3748_v13, %v1903_v31  ;;  %vm4238_vm12 = vmmov %vm4237_vm6 }
 0x7ab   : > { %v1872_v52 = vpop.permute.xlu0 %1871  ;;  %v1890_v43 = vsel %vm1889_vm4, %v1858_v35, %v1874_v36  ;;  %v1928_v18 = vrot.slane %v3755_v27, 1  ;;  %vm4236_vm4 = vmmov %vm4235_vm7  ;;  %v1912_v50 = vsel %vm1911_vm8, %v1880_v17, %v1904_v30 }
 0x7ac   : > { %v1901_v41 = vsel %vm4234_vm15, %v1895_v8, %v1896_v29  ;;  %vm1887_vm13 = vcmp.lt.s32.totalorder %v1856_v21, %v1872_v52  ;;  %v1898_v42 = vrot.slane %v1890_v43, 7  ;;  %v1902_v28 = vsel %vm4232_vm10, %v1894_v48, %v1895_v8  ;;  %vm4239_vm10 = vmmov %vm4236_vm4 }
 0x7ad   : > { %v1888_v32 = vsel %vm1887_vm13, %v1856_v21, %v1872_v52  ;;  %vm1917_vm11 = vcmp.lt.s32.totalorder %v3755_v27, %v1901_v41  ;;  %vm1941_vm15 = vcmp.lt.s32.totalorder %v1910_v37, %v1936_v33  ;;  %v1934_v49 = vsel %vm4236_vm4, %v1926_v25, %v1927_v46 }
 0x7ae   : > { %v1897_v47 = vrot.slane %v1888_v32, 7  ;;  %v1929_v10 = vrot.slane %v1888_v32, 1  ;;  %v1942_v7 = vsel %vm1941_vm15, %v1910_v37, %v1936_v33  ;;  %vm1945_vm13 = vcmp.lt.s32.totalorder %v1914_v26, %v1934_v49  ;;  %vm4240_vm15 = vmmov %vm4236_vm4 }
 0x7af   : > { %v1906_v16 = vsel %vm4238_vm12, %v1898_v42, %v1891_v55  ;;  %v1956_v6 = vsel %vm2374_vm1, %v1942_v7, 258  ;;  %v1946_v51 = vsel %vm1945_vm13, %v1914_v26, %v1934_v49  ;;  %v1918_v11 = vsel %vm1917_vm11, %v3755_v27, %v1901_v41  ;;  %vm4241_vm13 = vmmov %vm4238_vm12 }
 0x7b0   : > { %v1899_v40 = vsel %vm4237_vm6, %v1897_v47, %v1898_v42  ;;  %v1930_v45 = vrot.slane %v1890_v43, 1  ;;  %1965 = vrot.lane.b32.xlu1 %v1956_v6, %s2342_s10  ;;  %v1932_v13 = vsel %vm4239_vm10, %v1928_v18, %v1929_v10  ;;  %v1935_v48 = vsel %vm4240_vm15, %v1925_v44, %v1926_v25 }
 0x7b1   : > { %vm1921_vm7 = vcmp.lt.s32.totalorder %v1890_v43, %v1899_v40  ;;  %vm1915_vm4 = vcmp.lt.s32.totalorder %v1884_v19, %v1902_v28  ;;  %v1958_v55 = vsel %vm2382_vm3, %v1946_v51, 258  ;;  %vm1949_vm8 = vcmp.lt.s32.totalorder %v1918_v11, %v1932_v13 }
 0x7b2   : > { %vm1907_vm6 = vcmp.lt.s32.totalorder %v3745_v38, %v1906_v16  ;;  %v1900_v14 = vsel %vm4241_vm13, %v1896_v29, %v1897_v47  ;;  %v1922_v22 = vsel %vm1921_vm7, %v1890_v43, %v1899_v40  ;;  %v1950_v17 = vsel %vm1949_vm8, %v1918_v11, %v1932_v13 }
 0x7b3   : > { %v1908_v15 = vsel %vm1907_vm6, %v3745_v38, %v1906_v16  ;;  %vm1943_vm12 = vcmp.lt.s32.totalorder %v1912_v50, %v1935_v48  ;;  %v1916_v9 = vsel %vm1915_vm4, %v1884_v19, %v1902_v28  ;;  %v1938_v24 = vsel %vm4239_vm10, %v1930_v45, %v1923_v23  ;;  %vm4242_vm4 = vmmov %vm4239_vm10 }
 0x7b4   : > { %vm1939_vm11 = vcmp.lt.s32.totalorder %v1908_v15, %v1937_v39  ;;  %1969 = vrot.lane.b32.xlu1 %v1958_v55, %s2342_s10  ;;  %vm1919_vm15 = vcmp.lt.s32.totalorder %v1888_v32, %v1900_v14  ;;  %v1960_v12 = vsel %vm4033_vm5, %v1950_v17, 258  ;;  %vm1953_vm7 = vcmp.lt.s32.totalorder %v1922_v22, %v1938_v24  ;;  %vm4243_vm6 = vmmov %vm4242_vm4 }
 0x7b5   : > { %v1940_v20 = vsel %vm1939_vm11, %v1908_v15, %v1937_v39  ;;  %v1944_v44 = vsel %vm1943_vm12, %v1912_v50, %v1935_v48  ;;  %v1933_v31 = vsel %vm4242_vm4, %v1927_v46, %v1928_v18  ;;  %v1920_v29 = vsel %vm1919_vm15, %v1888_v32, %v1900_v14 }
 0x7b6   : > { %v1955_v27 = vsel %vm2370_vm0, %v1940_v20, 258  ;;  %vm1947_vm8 = vcmp.lt.s32.totalorder %v1916_v9, %v1933_v31  ;;  %v1954_v38 = vsel %vm1953_vm7, %v1922_v22, %v1938_v24  ;;  %v1957_v23 = vsel %vm2378_vm2, %v1944_v44, 258 }
 0x7b7   : > { %1963 = vrot.lane.b32.xlu0 %v1955_v27, %s2342_s10  ;;  %v1948_v21 = vsel %vm1947_vm8, %v1916_v9, %v1933_v31  ;;  %v1931_v35 = vsel %vm4243_vm6, %v1929_v10, %v1930_v45  ;;  %v1962_v19 = vsel %vm4228_vm14, %v1954_v38, 258  ;;  %vm4244_vm11 = vnez %v4015_v59 }
 0x7b8   : > { %1973 = vrot.lane.b32.xlu1 %v1960_v12, %s2342_s10  ;;  %vm1951_vm13 = vcmp.lt.s32.totalorder %v1920_v29, %v1931_v35  ;;  %v1959_v36 = vsel %vm4227_vm9, %v1948_v21, 258 }
 0x7b9   : > { %v1952_v30 = vsel %vm1951_vm13, %v1920_v29, %v1931_v35 }
 0x7ba   : > { %v1961_v25 = vsel %vm4244_vm11, %v1952_v30, 258 }
 0x7bb   : > { %1967 = vrot.lane.b32.xlu0 %v1957_v23, %s2342_s10 }
 0x7bc   : > { %1977 = vrot.lane.b32.xlu1 %v1962_v19, %s2342_s10 }
 0x7bf   : > { %1971 = vrot.lane.b32.xlu0 %v1959_v36, %s2342_s10 }
 0x7c0   : > { %1997 = vrot.lane.b32.xlu1 %v1956_v6, %s2343_s11 }
 0x7c3   : > { %1975 = vrot.lane.b32.xlu0 %v1961_v25, %s2342_s10 }
 0x7c4   : > { %2001 = vrot.lane.b32.xlu1 %v1958_v55, %s2343_s11 }
 0x7c7   : > { %1995 = vrot.lane.b32.xlu0 %v1955_v27, %s2343_s11 }
 0x7c8   : > { %2005 = vrot.lane.b32.xlu1 %v1960_v12, %s2343_s11 }
 0x7cb   : > { %1999 = vrot.lane.b32.xlu0 %v1957_v23, %s2343_s11 }
 0x7cc   : > { %2009 = vrot.lane.b32.xlu1 %v1962_v19, %s2343_s11 }
 0x7cf   : > { %2003 = vrot.lane.b32.xlu0 %v1959_v36, %s2343_s11 }
 0x7d3   : > { %2007 = vrot.lane.b32.xlu0 %v1961_v25, %s2343_s11 }
 0x822   : > { %v1966_v8 = vpop.permute.xlu1 %1965 }
 0x823   : > { %vm1981_vm12 = vcmp.lt.s32.totalorder %v1956_v6, %v1966_v8 }
 0x824   : > { %v1982_v32 = vsel %vm1981_vm12, %v1956_v6, %v1966_v8 }
 0x826   : > { %v1970_v46 = vpop.permute.xlu1 %1969 }
 0x827   : > { %vm1985_vm10 = vcmp.lt.s32.totalorder %v1958_v55, %v1970_v46 }
 0x828   : > { %v1986_v18 = vsel %vm1985_vm10, %v1958_v55, %v1970_v46  ;;  %vm4245_vm10 = vcmp.lt.s32.totalorder %v2360_v3, 1 }
 0x829   : > { %v1964_v52 = vpop.permute.xlu0 %1963 }
 0x82a   : > { %v1974_v39 = vpop.permute.xlu1 %1973  ;;  %vm1979_vm7 = vcmp.lt.s32.totalorder %v1955_v27, %v1964_v52 }
 0x82b   : > { %vm1989_vm4 = vcmp.lt.s32.totalorder %v1960_v12, %v1974_v39  ;;  %v1980_v10 = vsel %vm1979_vm7, %v1955_v27, %v1964_v52 }
 0x82c   : > { %v1990_v49 = vsel %vm1989_vm4, %v1960_v12, %v1974_v39  ;;  %vm4247_vm4 = vmmov %vm4245_vm10 }
 0x82d   : > { %v1968_v41 = vpop.permute.xlu0 %1967 }
 0x82e   : > { %v1978_v43 = vpop.permute.xlu1 %1977  ;;  %vm1983_vm13 = vcmp.lt.s32.totalorder %v1957_v23, %v1968_v41 }
 0x82f   : > { %vm1993_vm6 = vcmp.lt.s32.totalorder %v1962_v19, %v1978_v43  ;;  %v1984_v11 = vsel %vm1983_vm13, %v1957_v23, %v1968_v41  ;;  %vm4250_vm13 = vmmov %vm4247_vm4 }
 0x830   : > { %v1994_v51 = vsel %vm1993_vm6, %v1962_v19, %v1978_v43 }
 0x831   : > { %v1972_v33 = vpop.permute.xlu0 %1971 }
 0x832   : > { %v1998_v37 = vpop.permute.xlu1 %1997  ;;  %vm1987_vm11 = vcmp.lt.s32.totalorder %v1959_v36, %v1972_v33 }
 0x833   : > { %vm2013_vm15 = vcmp.lt.s32.totalorder %v1982_v32, %v1998_v37  ;;  %v1988_v55 = vsel %vm1987_vm11, %v1959_v36, %v1972_v33 }
 0x834   : > { %v2014_v47 = vsel %vm2013_vm15, %v1982_v32, %v1998_v37 }
 0x835   : > { %v1976_v42 = vpop.permute.xlu0 %1975  ;;  %v2028_v40 = vrot.slane %v2014_v47, 7  ;;  %v2060_v48 = vrot.slane %v2014_v47, 1 }
 0x836   : > { %v2002_v26 = vpop.permute.xlu1 %2001  ;;  %vm1991_vm12 = vcmp.lt.s32.totalorder %v1961_v25, %v1976_v42 }
 0x837   : > { %vm2017_vm8 = vcmp.lt.s32.totalorder %v1986_v18, %v2002_v26  ;;  %v1992_v15 = vsel %vm1991_vm12, %v1961_v25, %v1976_v42 }
 0x838   : > { %v3833_v50 = vsel %vm2017_vm8, %v1986_v18, %v2002_v26  ;;  %vm4248_vm8 = vmmov %vm4247_vm4 }
 0x839   : > { %v1996_v28 = vpop.permute.xlu0 %1995  ;;  %v2030_v17 = vrot.slane %v3833_v50, 7  ;;  %v2062_v20 = vrot.slane %v3833_v50, 1 }
 0x83a   : > { %vm2011_vm14 = vcmp.lt.s32.totalorder %v1980_v10, %v1996_v28  ;;  %v2006_v7 = vpop.permute.xlu1 %2005 }
 0x83b   : > { %v2012_v16 = vsel %vm2011_vm14, %v1980_v10, %v1996_v28  ;;  %vm2021_vm5 = vcmp.lt.s32.totalorder %v1990_v49, %v2006_v7 }
 0x83c   : > { %v2027_v6 = vrot.slane %v2012_v16, 7  ;;  %v3835_v45 = vsel %vm2021_vm5, %v1990_v49, %v2006_v7  ;;  %v2059_v22 = vrot.slane %v2012_v16, 1  ;;  %vm4246_vm5 = vcmp.lt.s32.totalorder %v2360_v3, 7 }
 0x83d   : > { %v2000_v13 = vpop.permute.xlu0 %1999  ;;  %v2032_v24 = vrot.slane %v3835_v45, 7  ;;  %v2064_v27 = vrot.slane %v3835_v45, 1  ;;  %vm4249_vm6 = vmmov %vm4246_vm5 }
 0x83e   : > { %v2041_v14 = vsel %vm4245_vm10, %v2027_v6, %v2028_v40  ;;  %v2010_v9 = vpop.permute.xlu1 %2009  ;;  %vm2015_vm15 = vcmp.lt.s32.totalorder %v1984_v11, %v2000_v13  ;;  %v2073_v23 = vsel %vm4246_vm5, %v2059_v22, %v2060_v48 }
 0x83f   : > { %vm2045_vm14 = vcmp.lt.s32.totalorder %v2014_v47, %v2041_v14  ;;  %vm2025_vm7 = vcmp.lt.s32.totalorder %v1994_v51, %v2010_v9  ;;  %v2016_v12 = vsel %vm2015_vm15, %v1984_v11, %v2000_v13  ;;  %vm4251_vm15 = vmmov %vm4246_vm5 }
 0x840   : > { %v2026_v44 = vsel %vm2025_vm7, %v1994_v51, %v2010_v9  ;;  %v2029_v31 = vrot.slane %v2016_v12, 7  ;;  %v2061_v29 = vrot.slane %v2016_v12, 1  ;;  %v2046_v35 = vsel %vm2045_vm14, %v2014_v47, %v2041_v14 }
 0x841   : > { %v2004_v38 = vpop.permute.xlu0 %2003  ;;  %v2034_v21 = vrot.slane %v2026_v44, 7  ;;  %v2066_v19 = vrot.slane %v2026_v44, 1 }
 0x842   : > { %vm2019_vm11 = vcmp.lt.s32.totalorder %v1988_v55, %v2004_v38  ;;  %v2039_v36 = vsel %vm4247_vm4, %v2029_v31, %v2030_v17  ;;  %v2040_v30 = vsel %vm4248_vm8, %v2028_v40, %v2029_v31  ;;  %v2072_v25 = vsel %vm4249_vm6, %v2060_v48, %v2061_v29  ;;  %vm4252_vm4 = vmmov %vm4249_vm6 }
 0x843   : > { %v2042_v8 = vsel %vm4250_vm13, %v2034_v21, %v2027_v6  ;;  %vm2047_vm12 = vcmp.lt.s32.totalorder %v2016_v12, %v2040_v30  ;;  %vm2049_vm10 = vcmp.lt.s32.totalorder %v3833_v50, %v2039_v36  ;;  %v2071_v46 = vsel %vm4251_vm15, %v2061_v29, %v2062_v20 }
 0x844   : > { %vm2043_vm14 = vcmp.lt.s32.totalorder %v2012_v16, %v2042_v8  ;;  %v2048_v52 = vsel %vm2047_vm12, %v2016_v12, %v2040_v30  ;;  %vm2077_vm7 = vcmp.lt.s32.totalorder %v2046_v35, %v2072_v25  ;;  %v2020_v39 = vsel %vm2019_vm11, %v1988_v55, %v2004_v38  ;;  %vm4253_vm11 = vmmov %vm4250_vm13 }
 0x845   : > { %v2044_v41 = vsel %vm2043_vm14, %v2012_v16, %v2042_v8  ;;  %v2078_v43 = vsel %vm2077_vm7, %v2046_v35, %v2072_v25  ;;  %vm2079_vm5 = vcmp.lt.s32.totalorder %v2048_v52, %v2071_v46  ;;  %v2031_v33 = vrot.slane %v2020_v39, 7  ;;  %v2008_v37 = vpop.permute.xlu0 %2007  ;;  %vm4254_vm6 = vmmov %vm4253_vm11 }
 0x846   : > { %v2074_v32 = vsel %vm4252_vm4, %v2066_v19, %v2059_v22  ;;  %vm2075_vm8 = vcmp.lt.s32.totalorder %v2044_v41, %v2073_v23  ;;  %v2080_v42 = vsel %vm2079_vm5, %v2048_v52, %v2071_v46  ;;  %v3860_v26 = vsel %vm2374_vm1, %v2078_v43, 258   ;;  %vm4255_vm14 = vmmov %vm4252_vm4 }
 0x847   : > { %v3864_v18 = vsel %vm2378_vm2, %v2080_v42, 258   ;;  %v2037_v47 = vsel %vm4253_vm11, %v2031_v33, %v2032_v24  ;;  %v2038_v10 = vsel %vm4254_vm6, %v2030_v17, %v2031_v33  ;;  %v2063_v28 = vrot.slane %v2020_v39, 1  ;;  %vm4256_vm7 = vmmov %vm4252_vm4 }
 0x848   : > { %v2050_v49 = vsel %vm2049_vm10, %v3833_v50, %v2039_v36  ;;  %vm2051_vm13 = vcmp.lt.s32.totalorder %v2020_v39, %v2038_v10  ;;  %vm2053_vm12 = vcmp.lt.s32.totalorder %v3835_v45, %v2037_v47  ;;  %vm2023_vm15 = vcmp.lt.s32.totalorder %v1992_v15, %v2008_v37  ;;  %vm4257_vm10 = vmmov %vm4254_vm6 }
 0x849   : > { %v2052_v40 = vsel %vm2051_vm13, %v2020_v39, %v2038_v10  ;;  %v2069_v7 = vsel %vm4255_vm14, %v2063_v28, %v2064_v27  ;;  %v2070_v16 = vsel %vm4256_vm7, %v2062_v20, %v2063_v28  ;;  %v2024_v6 = vsel %vm2023_vm15, %v1992_v15, %v2008_v37  ;;  %vm4258_vm11 = vmmov %vm4254_vm6 }
 0x84a   : > { %v2101_v51 = vsub.s32 %v2328_v63, %v3864_v18  ;;  %vm2081_vm5 = vcmp.lt.s32.totalorder %v2050_v49, %v2070_v16  ;;  %vm2083_vm4 = vcmp.lt.s32.totalorder %v2052_v40, %v2069_v7  ;;  %v2033_v11 = vrot.slane %v2024_v6, 7  ;;  %vm4259_vm13 = vmmov %vm4256_vm7 }
 0x84b   : > { %v2082_v13 = vsel %vm2081_vm5, %v2050_v49, %v2070_v16  ;;  %v2084_v50 = vsel %vm2083_vm4, %v2052_v40, %v2069_v7  ;;  %v2065_v48 = vrot.slane %v2024_v6, 1  ;;  %v2076_v55 = vsel %vm2075_vm8, %v2044_v41, %v2073_v23 }
 0x84c   : > { %v3883_v14 = vsel %vm4227_vm9, %v2084_v50, 258   ;;  %v2035_v22 = vsel %vm4257_vm10, %v2033_v11, %v2034_v21  ;;  %v2036_v17 = vsel %vm4258_vm11, %v2032_v24, %v2033_v11  ;;  %v2054_v63 = vsel %vm2053_vm12, %v3835_v45, %v2037_v47  ;;  %vm4260_vm9 = vmmov %vm4256_vm7 }
 0x84d   : > { %v3894_v15 = vsel %vm2382_vm3, %v2082_v13, 258   ;;  %vm2055_vm6 = vcmp.lt.s32.totalorder %v2024_v6, %v2036_v17  ;;  %vm2057_vm8 = vcmp.lt.s32.totalorder %v2026_v44, %v2035_v22  ;;  %v2067_v9 = vsel %vm4259_vm13, %v2065_v48, %v2066_v19 }
 0x84e   : > { %v2056_v20 = vsel %vm2055_vm6, %v2024_v6, %v2036_v17  ;;  %v2058_v12 = vsel %vm2057_vm8, %v2026_v44, %v2035_v22  ;;  %v2068_v31 = vsel %vm4260_vm9, %v2064_v27, %v2065_v48  ;;  %v2091_v24 = vsel %vm2370_vm0, %v2076_v55, 258  }
 0x84f   : > { %v2103_v45 = vsub.s32 %v2320_v1, %v3883_v14  ;;  %vm2085_vm12 = vcmp.lt.s32.totalorder %v2054_v63, %v2068_v31  ;;  %vm2087_vm15 = vcmp.lt.s32.totalorder %v2056_v20, %v2067_v9  ;;  %vm2089_vm14 = vcmp.lt.s32.totalorder %v2058_v12, %v2074_v32 }
 0x850   : > { %v2086_v29 = vsel %vm2085_vm12, %v2054_v63, %v2068_v31  ;;  %v2088_v38 = vsel %vm2087_vm15, %v2056_v20, %v2067_v9  ;;  %v2090_v23 = vsel %vm2089_vm14, %v2058_v12, %v2074_v32  ;;  %v2099_v21 = vsub.s32 %v2336_v61, %v2091_v24 }
 0x851   : > { %vm4261_vm7 = vnez %v4013_v58  ;;  %vm4262_vm5 = vnez %v4015_v59  ;;  %vm4263_vm4 = vnez %v4017_v60  ;;  %v2100_v1 = vsub.s32 %v2332_v62, %v3860_v26 }
 0x852   : > { %v2096_v44 = vsel %vm4261_vm7, %v2086_v29, 258   ;;  %v2097_v27 = vsel %vm4262_vm5, %v2088_v38, 258   ;;  %v2098_v35 = vsel %vm4263_vm4, %v2090_v23, 258   ;;  %v2102_v36 = vsub.s32 %v2324_v0, %v3894_v15 }
 0x853   : > { %v2105_v19 = vsub.s32 %v2312_v4, %v2097_v27  ;;  %v2104_v61 = vsub.s32 %v2316_v2, %v2096_v44  ;;  %v2106_v30 = vsub.s32 %v2308_v5, %v2098_v35  ;;  %v2107_v25 = vadd.s32 %v2103_v45, %v2099_v21 }
 0x854   : > { %v4269_v63 = vmov %v3864_v18 }
 0x855   : > { %v2108_v8 = vadd.s32 %v2104_v61, %v2100_v1  ;;  %v2109_v46 = vadd.s32 %v2105_v19, %v2101_v51  ;;  %v2110_v52 = vadd.s32 %v2106_v30, %v2102_v36  ;;  %v4267_v1 = vmov %v3883_v14 }
 0x856   : > { %v4271_v61 = vmov %v2091_v24 }
 0x857   : > { %v2111_v39 = vadd.s32 %v2108_v8, %v2107_v25  ;;  %v2112_v41 = vadd.s32 %v2110_v52, %v2109_v46 }
 0x859   : > { %v2113_v43 = vadd.s32 %v2112_v41, %v2111_v39 }
 0x85b   : > { %v2115_v33 = vshrl.u32 %v2113_v43, 16  ;;  %v2114_v37 = vand.u32 65535, %v2113_v43 }
 0x85d   : > { %v2117_v62 = vcvt.s32.f32 %v2115_v33  ;;  %v2116_v32 = vcvt.s32.f32 %v2114_v37 }
 0x85f   : > { %2120 = vadd.xlane.f32.xlu0 %v2117_v62  ;;  %2118 = vadd.xlane.f32.xlu1 %v2116_v32  ;;  %v4270_v62 = vmov %v3860_v26 }
 0x8e8   : > { %v2121_v0 = vpop.xlane.xlu0 %2120  ;;  %v2119_v4 = vpop.xlane.xlu1 %2118 }
 0x8e9   : > { %v2123_v42 = vcvt.f32.s32 %v2121_v0  ;;  %v2122_v47 = vcvt.f32.s32 %v2119_v4  ;;  %v4265_v4 = vmov %v2097_v27  ;;  %v4268_v0 = vmov %v3894_v15 }
 0x8eb   : > { %v2124_v2 = vshll.u32 %v2123_v42, 16 }
 0x8ed   : > { %v2125_v5 = vadd.s32 %v2124_v2, %v2122_v47  ;;  %v4266_v2 = vmov %v2096_v44 }
 0x8ef   : > { %v2126_v10 = vrot.slane %v2125_v5, 4 }
 0x8f1   : > { %v2127_v28 = vadd.s32 %v2126_v10, %v2125_v5  ;;  %v4264_v5 = vmov %v2098_v35 }
 0x8f3   : > { %v2128_v49 = vrot.slane %v2127_v28, 2 }
 0x8f5   : > { %v2129_v40 = vadd.s32 %v2128_v49, %v2127_v28 }
 0x8f7   : > { %v2130_v7 = vrot.slane %v2129_v40, 1 }
 0x8f9   : > { %v2131_v16 = vadd.s32 %v2130_v7, %v2129_v40 }
 0x8fb   : > { %2194 = vpush %v2131_v16 }
 0x92c   : > { %s2195_s12 = spop %2194 }
 0x92d   : > { %p2133_p0 = scmp.gt.s32.totalorder %s2195_s12, 0 }
 0x92f   : > { %p189_p2 = pnand %p2133_p0, %p188_p1 }
 0x930   :  { %v2135_v6 = vsel (%p189_p2), %vm2370_vm0, %v2091_v24, 0  ;;  %v2136_v51 = vsel (%p189_p2), %vm2374_vm1, %v3860_v26, 0  ;;  %v2137_v11 = vsel (%p189_p2), %vm2378_vm2, %v3864_v18, 0  ;;  %v2138_v13 = vsel (%p189_p2), %vm2382_vm3, %v3894_v15, 0 }
 0x931   :  { %192 = sbr.rel (!%p189_p2) target bundleno = 20 (0x14), region = 31  ;;  %v2143_v50 = vpack.c.b16 (%p189_p2), %v2135_v6, %v2135_v6  ;;  %v2144_v48 = vpack.c.b16 (%p189_p2), %v2136_v51, %v2136_v51  ;;  %v2145_v55 = vpack.c.b16 (%p189_p2), %v2137_v11, %v2137_v11  ;;  %v2146_v22 = vpack.c.b16 (%p189_p2), %v2138_v13, %v2138_v13 }
 0x932   :  { %vm4272_vm10 = vnez (%p189_p2), %v4011_v57  ;;  %vm4273_vm0 = vnez (%p189_p2), %v4013_v58  ;;  %vm4274_vm1 = vnez (%p189_p2), %v4015_v59  ;;  %vm4275_vm2 = vnez (%p189_p2), %v4017_v60 }
 0x933   :  { %v2139_v3 = vsel (%p189_p2), %vm4272_vm10, %v3883_v14, 0  ;;  %v2140_v34 = vsel (%p189_p2), %vm4273_vm0, %v2096_v44, 0  ;;  %v2141_v53 = vsel (%p189_p2), %vm4274_vm1, %v2097_v27, 0  ;;  %v2142_v54 = vsel (%p189_p2), %vm4275_vm2, %v2098_v35, 0  ;;  %2151 = vst [vmem:[%s3986_s1] sm:$0xf] (%p189_p2), %v2143_v50 }
 0x934   :  { %2152 = vst [vmem:[%s3986_s1 + $0x4] sm:$0xf] (%p189_p2), %v2144_v48  ;;  %2153 = vst [vmem:[%s3986_s1 + $0x8] sm:$0xf] (%p189_p2), %v2145_v55  ;;  %v2147_v56 = vpack.c.b16 (%p189_p2), %v2139_v3, %v2139_v3  ;;  %v2148_v57 = vpack.c.b16 (%p189_p2), %v2140_v34, %v2140_v34  ;;  %v2149_v58 = vpack.c.b16 (%p189_p2), %v2141_v53, %v2141_v53 }
 0x935   :  { %2154 = vst [vmem:[%s3986_s1 + $0xc] sm:$0xf] (%p189_p2), %v2146_v22  ;;  %v2150_v59 = vpack.c.b16 (%p189_p2), %v2142_v54, %v2142_v54 }
 0x936   :  { %2155 = vst [vmem:[%s3986_s1 + $0x10] sm:$0xf] %v2147_v56  ;;  %2156 = vst [vmem:[%s3986_s1 + $0x14] sm:$0xf] %v2148_v57 }
 0x937   :  { %2157 = vst [vmem:[%s3986_s1 + $0x18] sm:$0xf] %v2149_v58  ;;  %2158 = vst [vmem:[%s3986_s1 + $0x1c] sm:$0xf] %v2150_v59 }

</bundles_post_ra>
